<compile_context>
chip_gen: v5e
topology: v5e:2x2
jax: 0.10.0
libtpu: 0.0.40
codegen_flags: <defaults>
</compile_context>

<pallas_src>
import functools

import jax
import jax.numpy as jnp
from jax.experimental import pallas as pl
from jax.experimental.pallas import tpu as pltpu

_EPS = 1e-5

_VMEM = pl.BlockSpec(memory_space=pltpu.MemorySpace.VMEM)


def _vmem(n):
    return [pl.BlockSpec(memory_space=pltpu.MemorySpace.VMEM) for _ in range(n)]


def _ceil_to(x, m):
    return -(-x // m) * m


# ----------------------------- Pallas kernels -----------------------------

def _head_kernel(c_ref, wc_ref, biasc_ref, sc_ref, sct_ref, gc_ref, betac_ref,
                 x_ref, wx_ref, sx_ref, sxt_ref, gx_ref, betax_ref,
                 oc_ref, ox_ref, *, m_c, m_x, eps):
    """in_cond / in_conv1 (1x1-spatial deconvs) as dense GEMMs with the following
    BatchNorm+ReLU fused into the epilogue.  Layout is (B, Cout*k*k) (lane-dense);
    per-channel stats and broadcast-back use 0/1 selection-matrix matmuls (MXU)."""

    def gemm_bn_relu(inp, w, bias_row, sel, sel_t, gamma, beta, m):
        y = jnp.dot(inp, w, preferred_element_type=jnp.float32)      # (B, C*k*k) f32
        if bias_row is not None:
            y = y + bias_row
        cs = jnp.sum(y, axis=0, keepdims=True)                        # (1, C*k*k)
        cs2 = jnp.sum(y * y, axis=0, keepdims=True)
        s = jnp.dot(cs, sel, preferred_element_type=jnp.float32)      # (1, C)
        s2 = jnp.dot(cs2, sel, preferred_element_type=jnp.float32)
        mean = s / m
        var = s2 / m - mean * mean                                    # biased variance
        scale = gamma * jax.lax.rsqrt(var + eps)
        shift = beta - mean * scale
        scale_l = jnp.dot(scale, sel_t, preferred_element_type=jnp.float32)
        shift_l = jnp.dot(shift, sel_t, preferred_element_type=jnp.float32)
        return jnp.maximum(y * scale_l + shift_l, 0.0)

    oc_ref[...] = gemm_bn_relu(c_ref[...], wc_ref[...], biasc_ref[...], sc_ref[...],
                               sct_ref[...], gc_ref[...], betac_ref[...], m_c
                               ).astype(oc_ref.dtype)
    ox_ref[...] = gemm_bn_relu(x_ref[...], wx_ref[...], None, sx_ref[...],
                               sxt_ref[...], gx_ref[...], betax_ref[...], m_x
                               ).astype(ox_ref.dtype)


def _stage2_kernel(px_ref, wx_ref, pc_ref, wc_ref, g_ref, b_ref, o_ref, *,
                   m_true, n_x, eps):
    """in_conv2 GEMM + out_cond GEMM (bias folded via an augmented mask row), channel
    concat, in_bn2 + ReLU.  Lane dim zero-padded to 128; stats use the true M."""
    yx = jnp.dot(wx_ref[...], px_ref[...], preferred_element_type=jnp.float32)
    yc = jnp.dot(wc_ref[...], pc_ref[...], preferred_element_type=jnp.float32)

    def bn_relu(y, gamma, beta):
        s = jnp.sum(y, axis=1, keepdims=True)          # pad columns are exactly zero
        s2 = jnp.sum(y * y, axis=1, keepdims=True)
        mean = s / m_true
        var = s2 / m_true - mean * mean
        scale = gamma * jax.lax.rsqrt(var + eps)
        shift = beta - mean * scale
        return jnp.maximum(y * scale + shift, 0.0)

    n_tot = g_ref.shape[0]
    o_ref[0:n_x, :] = bn_relu(yx, g_ref[0:n_x, :], b_ref[0:n_x, :]).astype(o_ref.dtype)
    o_ref[n_x:n_tot, :] = bn_relu(yc, g_ref[n_x:n_tot, :],
                                  b_ref[n_x:n_tot, :]).astype(o_ref.dtype)


def _deconv4_bn_relu_kernel(p0, w0, p1, w1, p2, w2, p3, w3, g_ref, b_ref,
                            o0, o1, o2, o3, *, m_true, eps):
    """Stride-2 ConvTranspose2d via sub-pixel decomposition: 4 dense phase GEMMs with a
    single shared one-pass BatchNorm (+ReLU) over all phases.  Lane pads are exact 0."""
    ys, s, s2 = [], None, None
    for p_ref, w_ref in ((p0, w0), (p1, w1), (p2, w2), (p3, w3)):
        y = jnp.dot(w_ref[...], p_ref[...], preferred_element_type=jnp.float32)
        ys.append(y)
        ps = jnp.sum(y, axis=1, keepdims=True)
        ps2 = jnp.sum(y * y, axis=1, keepdims=True)
        s = ps if s is None else s + ps
        s2 = ps2 if s2 is None else s2 + ps2
    mean = s / m_true
    var = s2 / m_true - mean * mean
    scale = g_ref[...] * jax.lax.rsqrt(var + eps)
    shift = b_ref[...] - mean * scale
    for y, o_ref in zip(ys, (o0, o1, o2, o3)):
        o_ref[...] = jnp.maximum(y * scale + shift, 0.0).astype(o_ref.dtype)


def _out_kernel(p_ref, w_ref, o_ref):
    """out_conv GEMM (bias folded via augmented mask row) + sigmoid (tanh form -> EUP)."""
    y = jnp.dot(w_ref[...], p_ref[...], preferred_element_type=jnp.float32)
    o_ref[...] = 0.5 * (jnp.tanh(0.5 * y) + 1.0)


# ----------------------------- XLA glue (layout / im2col) -----------------------------

def _im2col_cf(xp, kh, kw):
    """xp: (C, B, Hp, Wp) -> patches (C*kh*kw, B*Ho*Wo); row order (c, i, j) matches
    w.reshape(Cout, Cin*kh*kw); columns (b, i, j) are lane-dense."""
    C, B, Hp, Wp = xp.shape
    Ho, Wo = Hp - kh + 1, Wp - kw + 1
    cols = [xp[:, :, i:i + Ho, j:j + Wo] for i in range(kh) for j in range(kw)]
    patches = jnp.stack(cols, axis=1).reshape(C * kh * kw, B * Ho * Wo)
    return patches, (B, Ho, Wo)


def _prep_conv_patches(x_cf, w_oihw, padding):
    """Stride-1 Conv2d prep: pad, im2col, lane-pad M to a multiple of 128 (zeros)."""
    Cout, Cin, kh, kw = w_oihw.shape
    xp = jnp.pad(x_cf, ((0, 0), (0, 0), (padding, padding), (padding, padding)))
    patches, (B, Ho, Wo) = _im2col_cf(xp, kh, kw)
    M = B * Ho * Wo
    Mp = _ceil_to(M, 128)
    patches = jnp.pad(patches.astype(jnp.bfloat16), ((0, 0), (0, Mp - M)))
    w_mat = w_oihw.reshape(Cout, Cin * kh * kw).astype(jnp.bfloat16)
    return patches, w_mat, M, (B, Ho, Wo)


def _sel(C, kk):
    """(C*kk, C) 0/1 selection matrix: column c sums the kk lanes of channel c."""
    return jnp.kron(jnp.eye(C, dtype=jnp.float32), jnp.ones((kk, 1), jnp.float32))


def _phase_geometry(H, Ho, k, s, p, phase):
    """1-D geometry of one deconv output phase: y[s*m + phase - p], m in [m_min, m_max],
    is a valid cross-correlation of the (cropped / zero-padded) input with the flipped
    sub-kernel w[phase::s][::-1]."""
    k_sub = len(range(phase, k, s))
    m_min = -((phase - p) // s)
    m_max = (Ho - 1 + p - phase) // s
    n = m_max - m_min + 1
    start = m_min - k_sub + 1                     # first input index touched
    crop = max(0, start)
    pad_lo = max(0, -start)
    pad_hi = max(0, m_max - (H - 1))
    used_end = min(H, m_max + 1)
    assert k_sub >= 1 and n >= 1
    assert pad_lo + (used_end - crop) + pad_hi == n + k_sub - 1
    return dict(k=k_sub, n=n, crop=crop, pad_lo=pad_lo, pad_hi=pad_hi,
                used_end=used_end, o_start=s * m_min + phase - p)


def _prep_deconv_subpixel(x_cf, w_iohw, stride, padding):
    """Sub-pixel (phase) decomposition of ConvTranspose2d: one dense stride-1 conv GEMM
    (patches, w_mat) per output phase plus interleave info.  No structural zeros."""
    Cin, Cout, k, _ = w_iohw.shape
    C, B, H, W = x_cf.shape
    assert C == Cin
    Ho = (H - 1) * stride - 2 * padding + k
    Wo = (W - 1) * stride - 2 * padding + k
    phases = []
    for ph in range(stride):
        gh = _phase_geometry(H, Ho, k, stride, padding, ph)
        for pw in range(stride):
            gw = _phase_geometry(W, Wo, k, stride, padding, pw)
            xs = x_cf[:, :, gh["crop"]:gh["used_end"], gw["crop"]:gw["used_end"]]
            xp = jnp.pad(xs, ((0, 0), (0, 0),
                              (gh["pad_lo"], gh["pad_hi"]),
                              (gw["pad_lo"], gw["pad_hi"])))
            patches, (_, hn, wn) = _im2col_cf(xp, gh["k"], gw["k"])
            assert (hn, wn) == (gh["n"], gw["n"])
            m = B * hn * wn
            mp = _ceil_to(m, 128)
            patches = jnp.pad(patches.astype(jnp.bfloat16), ((0, 0), (0, mp - m)))
            # sub-sampled, spatially flipped, channel-swapped kernel -> plain conv weight
            w_sub = w_iohw[:, :, ph::stride, pw::stride][:, :, ::-1, ::-1]
            w_mat = jnp.transpose(w_sub, (1, 0, 2, 3)).reshape(
                Cout, Cin * gh["k"] * gw["k"]).astype(jnp.bfloat16)
            phases.append(dict(patches=patches, w=w_mat, m=m, nh=hn, nw=wn,
                               oh=gh["o_start"], ow=gw["o_start"]))
    return phases, (Cout, Ho, Wo)


# ----------------------------- pallas_call wrappers -----------------------------

def _head(cond2d, x2d, p):
    B = cond2d.shape[0]
    Cc, kc = p["in_cond_w"].shape[1], p["in_cond_w"].shape[2]
    Cx, kx = p["in_conv1_w"].shape[1], p["in_conv1_w"].shape[2]
    kkc, kkx = kc * kc, kx * kx
    wc = p["in_cond_w"].reshape(p["in_cond_w"].shape[0], Cc * kkc).astype(jnp.bfloat16)
    wx = p["in_conv1_w"].reshape(p["in_conv1_w"].shape[0], Cx * kkx).astype(jnp.bfloat16)
    bcrow = jnp.repeat(p["in_cond_b"], kkc)[None, :].astype(jnp.float32)   # (1, Cc*kk)
    Sc, Sx = _sel(Cc, kkc), _sel(Cx, kkx)
    oc, ox = pl.pallas_call(
        functools.partial(_head_kernel, m_c=float(B * kkc), m_x=float(B * kkx), eps=_EPS),
        out_shape=(jax.ShapeDtypeStruct((B, Cc * kkc), jnp.bfloat16),
                   jax.ShapeDtypeStruct((B, Cx * kkx), jnp.bfloat16)),
        in_specs=_vmem(13),
        out_specs=(_VMEM, _VMEM),
    )(cond2d.astype(jnp.bfloat16), wc, bcrow, Sc, Sc.T,
      p["cond_bn1_g"].reshape(1, -1).astype(jnp.float32),
      p["cond_bn1_b"].reshape(1, -1).astype(jnp.float32),
      x2d.astype(jnp.bfloat16), wx, Sx, Sx.T,
      p["in_bn1_g"].reshape(1, -1).astype(jnp.float32),
      p["in_bn1_b"].reshape(1, -1).astype(jnp.float32))
    return oc, ox, (Cc, kc), (Cx, kx)


def _stage2(hx_cf, hc_cf, p):
    px, wxm, M, dims = _prep_conv_patches(hx_cf, p["in_conv2_w"], 1)
    pc, wcm, Mc, _ = _prep_conv_patches(hc_cf, p["out_cond_w"], 1)
    assert M == Mc
    Mp = px.shape[1]
    n_x, n_c = wxm.shape[0], wcm.shape[0]
    c_tot = _ceil_to(n_x + n_c, 8)                 # 44 -> 48: sublane-aligned sub-writes
    # fold out_cond bias into the GEMM so pad columns of the cond slab stay exactly 0.
    mask = (jnp.arange(Mp) < M).astype(jnp.bfloat16)[None, :]
    pc_aug = jnp.concatenate([pc, mask], axis=0)
    wc_aug = jnp.concatenate([wcm, p["out_cond_b"].astype(jnp.bfloat16)[:, None]], axis=1)
    wc_aug = jnp.pad(wc_aug, ((0, c_tot - n_x - n_c), (0, 0)))
    g = jnp.pad(p["in_bn2_g"], (0, c_tot - n_x - n_c)).reshape(-1, 1).astype(jnp.float32)
    b = jnp.pad(p["in_bn2_b"], (0, c_tot - n_x - n_c)).reshape(-1, 1).astype(jnp.float32)
    out = pl.pallas_call(
        functools.partial(_stage2_kernel, m_true=float(M), n_x=n_x, eps=_EPS),
        out_shape=jax.ShapeDtypeStruct((c_tot, Mp), jnp.bfloat16),
        in_specs=_vmem(6),
        out_specs=_VMEM,
    )(px, wxm, pc_aug, wc_aug, g, b)
    return out, M, dims


def _deconv_bn_relu(x_cf, w_iohw, gamma, beta, stride, padding):
    B = x_cf.shape[1]
    phases, (Cout, Ho, Wo) = _prep_deconv_subpixel(x_cf, w_iohw, stride, padding)
    assert len(phases) == 4
    m_total = sum(ph["m"] for ph in phases)
    assert m_total == B * Ho * Wo
    args = []
    for ph in phases:
        args += [ph["patches"], ph["w"]]
    args += [gamma.reshape(-1, 1).astype(jnp.float32),
             beta.reshape(-1, 1).astype(jnp.float32)]
    outs = pl.pallas_call(
        functools.partial(_deconv4_bn_relu_kernel, m_true=float(m_total), eps=_EPS),
        out_shape=tuple(jax.ShapeDtypeStruct((Cout, ph["patches"].shape[1]), jnp.bfloat16)
                        for ph in phases),
        in_specs=_vmem(len(args)),
        out_specs=tuple(_VMEM for _ in phases),
    )(*args)
    # interleave the 4 phase sub-grids back into the full-resolution map (XLA glue)
    y = jnp.zeros((Cout, B, Ho, Wo), jnp.bfloat16)
    for o, ph in zip(outs, phases):
        blk = o[:, :ph["m"]].reshape(Cout, B, ph["nh"], ph["nw"])
        y = y.at[:, :, ph["oh"]::stride, ph["ow"]::stride].set(blk)
    return y


def _out_conv_sigmoid(h_cf, w_oihw, bias):
    Cout, Cin, k, _ = w_oihw.shape
    B = h_cf.shape[1]
    xp = jnp.pad(h_cf, ((0, 0), (0, 0), (1, 1), (1, 1)))
    patches, (_, Ho, Wo) = _im2col_cf(xp, k, k)
    M = B * Ho * Wo
    n_blk = 2
    Mp = _ceil_to(M, 128 * n_blk)
    mask = (jnp.arange(Mp) < M).astype(jnp.bfloat16)[None, :]
    patches = jnp.concatenate(
        [jnp.pad(patches.astype(jnp.bfloat16), ((0, 0), (0, Mp - M))), mask], axis=0)
    w_aug = jnp.concatenate([w_oihw.reshape(Cout, Cin * k * k),
                             bias[:, None]], axis=1).astype(jnp.bfloat16)
    K = patches.shape[0]
    mb = Mp // n_blk
    y = pl.pallas_call(
        _out_kernel,
        out_shape=jax.ShapeDtypeStruct((Cout, Mp), jnp.float32),
        grid=(n_blk,),
        in_specs=[pl.BlockSpec((K, mb), lambda i: (0, i)),
                  pl.BlockSpec((Cout, K), lambda i: (0, 0))],
        out_specs=pl.BlockSpec((Cout, mb), lambda i: (0, i)),
        compiler_params=pltpu.CompilerParams(dimension_semantics=("parallel",)),
    )(patches, w_aug)
    return y[:, :M], (Ho, Wo)


# ----------------------------- Decoder forward -----------------------------

def decoder_forward(params, x, cond):
    """x: (B, nhd, 1, 1) NCHW, cond: (B, 10).  Returns (B, nc, 28, 28) NCHW, float32."""
    p = params
    B = x.shape[0]

    # Stage 1: in_cond & in_conv1 GEMMs with cond_bn1 / in_bn1 + ReLU fused (1 call).
    oc, ox, (Cc, kc), (Cx, kx) = _head(cond, x.reshape(B, -1), p)
    hc = jnp.transpose(oc.reshape(B, Cc, kc, kc), (1, 0, 2, 3))    # (24, B, 6, 6) bf16
    hx = jnp.transpose(ox.reshape(B, Cx, kx, kx), (1, 0, 2, 3))    # (16, B, 6, 6) bf16

    # Stage 2: in_conv2 + out_cond GEMMs, channel concat, in_bn2 + ReLU (1 call).
    h48, M2, (_, H2, W2) = _stage2(hx, hc, p)
    n_real = p["in_bn2_g"].shape[0]                                 # 44
    h = h48[:n_real, :M2].reshape(n_real, B, H2, W2)                # (44, B, 6, 6)

    # Stage 3: mid_conv1 (stride-2 deconv, 4 sub-pixel phases) + mid_bn1 + ReLU (1 call).
    h = _deconv_bn_relu(h, p["mid_conv1_w"], p["mid_bn1_g"], p["mid_bn1_b"], 2, 0)

    # Stage 4: mid_conv2 (stride-2 deconv, 4 sub-pixel phases) + mid_bn2 + ReLU (1 call).
    h = _deconv_bn_relu(h, p["mid_conv2_w"], p["mid_bn2_g"], p["mid_bn2_b"], 2, 1)

    # Stage 5: out_conv + bias + sigmoid, gridded over lanes ("parallel" for v7x).
    y, (Ho, Wo) = _out_conv_sigmoid(h, p["out_conv_w"], p["out_conv_b"])
    return jnp.transpose(y.reshape(-1, B, Ho, Wo), (1, 0, 2, 3))    # (B, nc, 28, 28)


# ----------------------------- Pure-XLA float32 reference -----------------------------

def _reference_forward(params, x, cond):
    p = params

    def bn(h, g, b):
        mean = jnp.mean(h, axis=(0, 2, 3), keepdims=True)
        var = jnp.mean(jnp.square(h - mean), axis=(0, 2, 3), keepdims=True)
        return ((h - mean) * jax.lax.rsqrt(var + _EPS) * g.reshape(1, -1, 1, 1)
                + b.reshape(1, -1, 1, 1))

    def convT(h, w, stride, padding, bias=None):
        k = w.shape[2]
        w_eq = jnp.transpose(w[:, :, ::-1, ::-1], (1, 0, 2, 3))
        out = jax.lax.conv_general_dilated(
            h, w_eq, window_strides=(1, 1),
            padding=[(k - 1 - padding, k - 1 - padding)] * 2,
            lhs_dilation=(stride, stride),
            dimension_numbers=("NCHW", "OIHW", "NCHW"))
        return out if bias is None else out + bias.reshape(1, -1, 1, 1)

    def conv(h, w, padding, bias=None):
        out = jax.lax.conv_general_dilated(
            h, w, (1, 1), [(padding, padding)] * 2,
            dimension_numbers=("NCHW", "OIHW", "NCHW"))
        return out if bias is None else out + bias.reshape(1, -1, 1, 1)

    relu = jax.nn.relu
    c = relu(bn(convT(cond.reshape(-1, cond.shape[1], 1, 1), p["in_cond_w"], 1, 0,
                      p["in_cond_b"]), p["cond_bn1_g"], p["cond_bn1_b"]))
    c = conv(c, p["out_cond_w"], 1, p["out_cond_b"])
    h = relu(bn(convT(x, p["in_conv1_w"], 1, 0), p["in_bn1_g"], p["in_bn1_b"]))
    h = conv(h, p["in_conv2_w"], 1)
    h = relu(bn(jnp.concatenate([h, c], axis=1), p["in_bn2_g"], p["in_bn2_b"]))
    h = relu(bn(convT(h, p["mid_conv1_w"], 2, 0), p["mid_bn1_g"], p["mid_bn1_b"]))
    h = relu(bn(convT(h, p["mid_conv2_w"], 2, 1), p["mid_bn2_g"], p["mid_bn2_b"]))
    return jax.nn.sigmoid(conv(h, p["out_conv_w"], 1, p["out_conv_b"]))


# ----------------------------- Parameter init -----------------------------

def init_params(key, nc=3, ngf=8, ncondf=12, nhd=16):
    ks = jax.random.split(key, 10)
    w = lambda k, shape, s=0.05: s * jax.random.normal(k, shape, jnp.float32)
    return {
        # ConvTranspose2d weights: (Cin, Cout, kH, kW)
        "in_cond_w":   w(ks[0], (10, 2 * ncondf, 6, 6)),
        "in_cond_b":   w(ks[1], (2 * ncondf,)),
        "in_conv1_w":  w(ks[2], (nhd, 2 * ngf, 6, 6)),
        "mid_conv1_w": w(ks[3], (4 * ngf + ncondf, 2 * ngf, 5, 5)),
        "mid_conv2_w": w(ks[4], (2 * ngf, ngf, 3, 3)),
        # Conv2d weights: (Cout, Cin, kH, kW)
        "out_cond_w":  w(ks[5], (ncondf, 2 * ncondf, 3, 3)),
        "out_cond_b":  w(ks[6], (ncondf,)),
        "in_conv2_w":  w(ks[7], (4 * ngf, 2 * ngf, 3, 3)),
        "out_conv_w":  w(ks[8], (nc, ngf, 4, 4)),
        "out_conv_b":  w(ks[9], (nc,)),
        # BatchNorm affine params (PyTorch default init: weight=1, bias=0)
        "cond_bn1_g": jnp.ones((2 * ncondf,)), "cond_bn1_b": jnp.zeros((2 * ncondf,)),
        "in_bn1_g":   jnp.ones((2 * ngf,)),    "in_bn1_b":   jnp.zeros((2 * ngf,)),
        "in_bn2_g":   jnp.ones((4 * ngf + ncondf,)),
        "in_bn2_b":   jnp.zeros((4 * ngf + ncondf,)),
        "mid_bn1_g":  jnp.ones((2 * ngf,)),    "mid_bn1_b":  jnp.zeros((2 * ngf,)),
        "mid_bn2_g":  jnp.ones((ngf,)),        "mid_bn2_b":  jnp.zeros((ngf,)),
    }


# ----------------------------- main -----------------------------

if __name__ == "__main__":
    B, nc_, ngf, ncondf, nhd = 2, 3, 8, 12, 16
    key = jax.random.PRNGKey(0)
    kx, kc, kp = jax.random.split(key, 3)

    params = init_params(kp, nc=nc_, ngf=ngf, ncondf=ncondf, nhd=nhd)
    x = jax.random.normal(kx, (B, nhd, 1, 1), jnp.float32)      # latent, NCHW
    cond = jax.random.normal(kc, (B, 10), jnp.float32)          # conditioning vector

    out = jax.jit(decoder_forward)(params, x, cond)
    out = jax.block_until_ready(out)

    assert out.shape == (B, nc_, 28, 28), out.shape
    assert bool(jnp.all(jnp.isfinite(out)))
    assert bool(jnp.all((out >= 0.0) & (out <= 1.0)))            # sigmoid output range

    # Cross-check against a pure-XLA float32 reference (bf16 operands -> loose tol).
    ref = jax.block_until_ready(jax.jit(_reference_forward)(params, x, cond))
    err = float(jnp.max(jnp.abs(out - ref)))
    assert err < 5e-2, f"max|pallas - reference| = {err}"

    print("KERNEL_OK")
</pallas_src>

<mosaic_0001>
module attributes {stable_mosaic.version = 11 : i64} {
  func.func @_head_kernel(%arg0: memref<2x10xbf16, #tpu.memory_space<vmem>>, %arg1: memref<10x864xbf16, #tpu.memory_space<vmem>>, %arg2: memref<1x864xf32, #tpu.memory_space<vmem>>, %arg3: memref<864x24xf32, #tpu.memory_space<vmem>>, %arg4: memref<24x864xf32, #tpu.memory_space<vmem>>, %arg5: memref<1x24xf32, #tpu.memory_space<vmem>>, %arg6: memref<1x24xf32, #tpu.memory_space<vmem>>, %arg7: memref<2x16xbf16, #tpu.memory_space<vmem>>, %arg8: memref<16x576xbf16, #tpu.memory_space<vmem>>, %arg9: memref<576x16xf32, #tpu.memory_space<vmem>>, %arg10: memref<16x576xf32, #tpu.memory_space<vmem>>, %arg11: memref<1x16xf32, #tpu.memory_space<vmem>>, %arg12: memref<1x16xf32, #tpu.memory_space<vmem>>, %arg13: memref<2x864xbf16, #tpu.memory_space<vmem>>, %arg14: memref<2x576xbf16, #tpu.memory_space<vmem>>) attributes {dimension_semantics = [], scalar_prefetch = 0 : i64, scratch_operands = 0 : i64, tpu.core_type = #tpu.core_type<tc>} {
    %c0 = arith.constant 0 : index
    %c0_0 = arith.constant 0 : index
    %0 = vector.load %arg0[%c0, %c0_0] : memref<2x10xbf16, #tpu.memory_space<vmem>>, vector<2x10xbf16>
    %c0_1 = arith.constant 0 : index
    %c0_2 = arith.constant 0 : index
    %1 = vector.load %arg1[%c0_1, %c0_2] : memref<10x864xbf16, #tpu.memory_space<vmem>>, vector<10x864xbf16>
    %c0_3 = arith.constant 0 : index
    %c0_4 = arith.constant 0 : index
    %2 = vector.load %arg2[%c0_3, %c0_4] : memref<1x864xf32, #tpu.memory_space<vmem>>, vector<1x864xf32>
    %c0_5 = arith.constant 0 : index
    %c0_6 = arith.constant 0 : index
    %3 = vector.load %arg3[%c0_5, %c0_6] : memref<864x24xf32, #tpu.memory_space<vmem>>, vector<864x24xf32>
    %c0_7 = arith.constant 0 : index
    %c0_8 = arith.constant 0 : index
    %4 = vector.load %arg4[%c0_7, %c0_8] : memref<24x864xf32, #tpu.memory_space<vmem>>, vector<24x864xf32>
    %c0_9 = arith.constant 0 : index
    %c0_10 = arith.constant 0 : index
    %5 = vector.load %arg5[%c0_9, %c0_10] : memref<1x24xf32, #tpu.memory_space<vmem>>, vector<1x24xf32>
    %c0_11 = arith.constant 0 : index
    %c0_12 = arith.constant 0 : index
    %6 = vector.load %arg6[%c0_11, %c0_12] : memref<1x24xf32, #tpu.memory_space<vmem>>, vector<1x24xf32>
    %cst = arith.constant dense<0.000000e+00> : vector<2x864xf32>
    %7 = tpu.matmul %0, %1, %cst {dimension_numbers = #tpu.dot_dimension_numbers<[1], [0], [0], [1], [0, 0, 1, 1], [], []>} : vector<2x10xbf16>, vector<10x864xbf16>, vector<2x864xf32> -> vector<2x864xf32>
    %8 = vector.broadcast %2 : vector<1x864xf32> to vector<2x864xf32>
    %9 = arith.addf %7, %8 : vector<2x864xf32>
    %cst_13 = arith.constant dense<0.000000e+00> : vector<864xf32>
    %10 = vector.multi_reduction <add>, %9, %cst_13 [0] : vector<2x864xf32> to vector<864xf32>
    %11 = vector.shape_cast %10 : vector<864xf32> to vector<1x864xf32>
    %12 = arith.mulf %9, %9 : vector<2x864xf32>
    %cst_14 = arith.constant dense<0.000000e+00> : vector<864xf32>
    %13 = vector.multi_reduction <add>, %12, %cst_14 [0] : vector<2x864xf32> to vector<864xf32>
    %14 = vector.shape_cast %13 : vector<864xf32> to vector<1x864xf32>
    %cst_15 = arith.constant dense<0.000000e+00> : vector<1x24xf32>
    %15 = tpu.matmul %11, %3, %cst_15 {dimension_numbers = #tpu.dot_dimension_numbers<[1], [0], [0], [1], [0, 0, 1, 1], [], []>} : vector<1x864xf32>, vector<864x24xf32>, vector<1x24xf32> -> vector<1x24xf32>
    %cst_16 = arith.constant dense<0.000000e+00> : vector<1x24xf32>
    %16 = tpu.matmul %14, %3, %cst_16 {dimension_numbers = #tpu.dot_dimension_numbers<[1], [0], [0], [1], [0, 0, 1, 1], [], []>} : vector<1x864xf32>, vector<864x24xf32>, vector<1x24xf32> -> vector<1x24xf32>
    %cst_17 = arith.constant 7.200000e+01 : f32
    %17 = vector.broadcast %cst_17 : f32 to vector<1x24xf32>
    %18 = arith.divf %15, %17 : vector<1x24xf32>
    %cst_18 = arith.constant 7.200000e+01 : f32
    %19 = vector.broadcast %cst_18 : f32 to vector<1x24xf32>
    %20 = arith.divf %16, %19 : vector<1x24xf32>
    %21 = arith.mulf %18, %18 : vector<1x24xf32>
    %22 = arith.subf %20, %21 : vector<1x24xf32>
    %cst_19 = arith.constant 9.99999974E-6 : f32
    %23 = vector.broadcast %cst_19 : f32 to vector<1x24xf32>
    %24 = arith.addf %22, %23 : vector<1x24xf32>
    %25 = math.rsqrt %24 : vector<1x24xf32>
    %26 = arith.mulf %5, %25 : vector<1x24xf32>
    %27 = arith.mulf %18, %26 : vector<1x24xf32>
    %28 = arith.subf %6, %27 : vector<1x24xf32>
    %cst_20 = arith.constant dense<0.000000e+00> : vector<1x864xf32>
    %29 = tpu.matmul %26, %4, %cst_20 {dimension_numbers = #tpu.dot_dimension_numbers<[1], [0], [0], [1], [0, 0, 1, 1], [], []>} : vector<1x24xf32>, vector<24x864xf32>, vector<1x864xf32> -> vector<1x864xf32>
    %cst_21 = arith.constant dense<0.000000e+00> : vector<1x864xf32>
    %30 = tpu.matmul %28, %4, %cst_21 {dimension_numbers = #tpu.dot_dimension_numbers<[1], [0], [0], [1], [0, 0, 1, 1], [], []>} : vector<1x24xf32>, vector<24x864xf32>, vector<1x864xf32> -> vector<1x864xf32>
    %31 = vector.broadcast %29 : vector<1x864xf32> to vector<2x864xf32>
    %32 = arith.mulf %9, %31 : vector<2x864xf32>
    %33 = vector.broadcast %30 : vector<1x864xf32> to vector<2x864xf32>
    %34 = arith.addf %32, %33 : vector<2x864xf32>
    %cst_22 = arith.constant 0.000000e+00 : f32
    %35 = vector.broadcast %cst_22 : f32 to vector<2x864xf32>
    %36 = arith.maximumf %34, %35 : vector<2x864xf32>
    %37 = arith.truncf %36 : vector<2x864xf32> to vector<2x864xbf16>
    %c0_23 = arith.constant 0 : index
    %c0_24 = arith.constant 0 : index
    %38 = vector.load %arg13[%c0_23, %c0_24] : memref<2x864xbf16, #tpu.memory_space<vmem>>, vector<2x864xbf16>
    tpu.vector_store %arg13[%c0_23, %c0_24], %37 {strides = array<i32>} : memref<2x864xbf16, #tpu.memory_space<vmem>>, vector<2x864xbf16>,
    %c0_25 = arith.constant 0 : index
    %c0_26 = arith.constant 0 : index
    %39 = vector.load %arg7[%c0_25, %c0_26] : memref<2x16xbf16, #tpu.memory_space<vmem>>, vector<2x16xbf16>
    %c0_27 = arith.constant 0 : index
    %c0_28 = arith.constant 0 : index
    %40 = vector.load %arg8[%c0_27, %c0_28] : memref<16x576xbf16, #tpu.memory_space<vmem>>, vector<16x576xbf16>
    %c0_29 = arith.constant 0 : index
    %c0_30 = arith.constant 0 : index
    %41 = vector.load %arg9[%c0_29, %c0_30] : memref<576x16xf32, #tpu.memory_space<vmem>>, vector<576x16xf32>
    %c0_31 = arith.constant 0 : index
    %c0_32 = arith.constant 0 : index
    %42 = vector.load %arg10[%c0_31, %c0_32] : memref<16x576xf32, #tpu.memory_space<vmem>>, vector<16x576xf32>
    %c0_33 = arith.constant 0 : index
    %c0_34 = arith.constant 0 : index
    %43 = vector.load %arg11[%c0_33, %c0_34] : memref<1x16xf32, #tpu.memory_space<vmem>>, vector<1x16xf32>
    %c0_35 = arith.constant 0 : index
    %c0_36 = arith.constant 0 : index
    %44 = vector.load %arg12[%c0_35, %c0_36] : memref<1x16xf32, #tpu.memory_space<vmem>>, vector<1x16xf32>
    %cst_37 = arith.constant dense<0.000000e+00> : vector<2x576xf32>
    %45 = tpu.matmul %39, %40, %cst_37 {dimension_numbers = #tpu.dot_dimension_numbers<[1], [0], [0], [1], [0, 0, 1, 1], [], []>} : vector<2x16xbf16>, vector<16x576xbf16>, vector<2x576xf32> -> vector<2x576xf32>
    %cst_38 = arith.constant dense<0.000000e+00> : vector<576xf32>
    %46 = vector.multi_reduction <add>, %45, %cst_38 [0] : vector<2x576xf32> to vector<576xf32>
    %47 = vector.shape_cast %46 : vector<576xf32> to vector<1x576xf32>
    %48 = arith.mulf %45, %45 : vector<2x576xf32>
    %cst_39 = arith.constant dense<0.000000e+00> : vector<576xf32>
    %49 = vector.multi_reduction <add>, %48, %cst_39 [0] : vector<2x576xf32> to vector<576xf32>
    %50 = vector.shape_cast %49 : vector<576xf32> to vector<1x576xf32>
    %cst_40 = arith.constant dense<0.000000e+00> : vector<1x16xf32>
    %51 = tpu.matmul %47, %41, %cst_40 {dimension_numbers = #tpu.dot_dimension_numbers<[1], [0], [0], [1], [0, 0, 1, 1], [], []>} : vector<1x576xf32>, vector<576x16xf32>, vector<1x16xf32> -> vector<1x16xf32>
    %cst_41 = arith.constant dense<0.000000e+00> : vector<1x16xf32>
    %52 = tpu.matmul %50, %41, %cst_41 {dimension_numbers = #tpu.dot_dimension_numbers<[1], [0], [0], [1], [0, 0, 1, 1], [], []>} : vector<1x576xf32>, vector<576x16xf32>, vector<1x16xf32> -> vector<1x16xf32>
    %cst_42 = arith.constant 7.200000e+01 : f32
    %53 = vector.broadcast %cst_42 : f32 to vector<1x16xf32>
    %54 = arith.divf %51, %53 : vector<1x16xf32>
    %cst_43 = arith.constant 7.200000e+01 : f32
    %55 = vector.broadcast %cst_43 : f32 to vector<1x16xf32>
    %56 = arith.divf %52, %55 : vector<1x16xf32>
    %57 = arith.mulf %54, %54 : vector<1x16xf32>
    %58 = arith.subf %56, %57 : vector<1x16xf32>
    %cst_44 = arith.constant 9.99999974E-6 : f32
    %59 = vector.broadcast %cst_44 : f32 to vector<1x16xf32>
    %60 = arith.addf %58, %59 : vector<1x16xf32>
    %61 = math.rsqrt %60 : vector<1x16xf32>
    %62 = arith.mulf %43, %61 : vector<1x16xf32>
    %63 = arith.mulf %54, %62 : vector<1x16xf32>
    %64 = arith.subf %44, %63 : vector<1x16xf32>
    %cst_45 = arith.constant dense<0.000000e+00> : vector<1x576xf32>
    %65 = tpu.matmul %62, %42, %cst_45 {dimension_numbers = #tpu.dot_dimension_numbers<[1], [0], [0], [1], [0, 0, 1, 1], [], []>} : vector<1x16xf32>, vector<16x576xf32>, vector<1x576xf32> -> vector<1x576xf32>
    %cst_46 = arith.constant dense<0.000000e+00> : vector<1x576xf32>
    %66 = tpu.matmul %64, %42, %cst_46 {dimension_numbers = #tpu.dot_dimension_numbers<[1], [0], [0], [1], [0, 0, 1, 1], [], []>} : vector<1x16xf32>, vector<16x576xf32>, vector<1x576xf32> -> vector<1x576xf32>
    %67 = vector.broadcast %65 : vector<1x576xf32> to vector<2x576xf32>
    %68 = arith.mulf %45, %67 : vector<2x576xf32>
    %69 = vector.broadcast %66 : vector<1x576xf32> to vector<2x576xf32>
    %70 = arith.addf %68, %69 : vector<2x576xf32>
    %cst_47 = arith.constant 0.000000e+00 : f32
    %71 = vector.broadcast %cst_47 : f32 to vector<2x576xf32>
    %72 = arith.maximumf %70, %71 : vector<2x576xf32>
    %73 = arith.truncf %72 : vector<2x576xf32> to vector<2x576xbf16>
    %c0_48 = arith.constant 0 : index
    %c0_49 = arith.constant 0 : index
    %74 = vector.load %arg14[%c0_48, %c0_49] : memref<2x576xbf16, #tpu.memory_space<vmem>>, vector<2x576xbf16>
    tpu.vector_store %arg14[%c0_48, %c0_49], %73 {strides = array<i32>} : memref<2x576xbf16, #tpu.memory_space<vmem>>, vector<2x576xbf16>,
    return
  }
}

module attributes {stable_mosaic.version = 11 : i64} {
  func.func @_stage2_kernel(%arg0: memref<144x128xbf16, #tpu.memory_space<vmem>>, %arg1: memref<32x144xbf16, #tpu.memory_space<vmem>>, %arg2: memref<217x128xbf16, #tpu.memory_space<vmem>>, %arg3: memref<16x217xbf16, #tpu.memory_space<vmem>>, %arg4: memref<48x1xf32, #tpu.memory_space<vmem>>, %arg5: memref<48x1xf32, #tpu.memory_space<vmem>>, %arg6: memref<48x128xbf16, #tpu.memory_space<vmem>>) attributes {dimension_semantics = [], scalar_prefetch = 0 : i64, scratch_operands = 0 : i64, tpu.core_type = #tpu.core_type<tc>} {
    %c0 = arith.constant 0 : index
    %c0_0 = arith.constant 0 : index
    %0 = vector.load %arg1[%c0, %c0_0] : memref<32x144xbf16, #tpu.memory_space<vmem>>, vector<32x144xbf16>
    %c0_1 = arith.constant 0 : index
    %c0_2 = arith.constant 0 : index
    %1 = vector.load %arg0[%c0_1, %c0_2] : memref<144x128xbf16, #tpu.memory_space<vmem>>, vector<144x128xbf16>
    %cst = arith.constant dense<0.000000e+00> : vector<32x128xf32>
    %2 = tpu.matmul %0, %1, %cst {dimension_numbers = #tpu.dot_dimension_numbers<[1], [0], [0], [1], [0, 0, 1, 1], [], []>} : vector<32x144xbf16>, vector<144x128xbf16>, vector<32x128xf32> -> vector<32x128xf32>
    %c0_3 = arith.constant 0 : index
    %c0_4 = arith.constant 0 : index
    %3 = vector.load %arg3[%c0_3, %c0_4] : memref<16x217xbf16, #tpu.memory_space<vmem>>, vector<16x217xbf16>
    %c0_5 = arith.constant 0 : index
    %c0_6 = arith.constant 0 : index
    %4 = vector.load %arg2[%c0_5, %c0_6] : memref<217x128xbf16, #tpu.memory_space<vmem>>, vector<217x128xbf16>
    %cst_7 = arith.constant dense<0.000000e+00> : vector<16x128xf32>
    %5 = tpu.matmul %3, %4, %cst_7 {dimension_numbers = #tpu.dot_dimension_numbers<[1], [0], [0], [1], [0, 0, 1, 1], [], []>} : vector<16x217xbf16>, vector<217x128xbf16>, vector<16x128xf32> -> vector<16x128xf32>
    %c0_8 = arith.constant 0 : index
    %c0_9 = arith.constant 0 : index
    %6 = vector.load %arg4[%c0_8, %c0_9] : memref<48x1xf32, #tpu.memory_space<vmem>>, vector<32x1xf32>
    %c0_10 = arith.constant 0 : index
    %c0_11 = arith.constant 0 : index
    %7 = vector.load %arg5[%c0_10, %c0_11] : memref<48x1xf32, #tpu.memory_space<vmem>>, vector<32x1xf32>
    %cst_12 = arith.constant dense<0.000000e+00> : vector<32xf32>
    %8 = vector.multi_reduction <add>, %2, %cst_12 [1] : vector<32x128xf32> to vector<32xf32>
    %9 = vector.shape_cast %8 : vector<32xf32> to vector<32x1xf32>
    %10 = arith.mulf %2, %2 : vector<32x128xf32>
    %cst_13 = arith.constant dense<0.000000e+00> : vector<32xf32>
    %11 = vector.multi_reduction <add>, %10, %cst_13 [1] : vector<32x128xf32> to vector<32xf32>
    %12 = vector.shape_cast %11 : vector<32xf32> to vector<32x1xf32>
    %cst_14 = arith.constant 7.200000e+01 : f32
    %13 = vector.broadcast %cst_14 : f32 to vector<32x1xf32>
    %14 = arith.divf %9, %13 : vector<32x1xf32>
    %cst_15 = arith.constant 7.200000e+01 : f32
    %15 = vector.broadcast %cst_15 : f32 to vector<32x1xf32>
    %16 = arith.divf %12, %15 : vector<32x1xf32>
    %17 = arith.mulf %14, %14 : vector<32x1xf32>
    %18 = arith.subf %16, %17 : vector<32x1xf32>
    %cst_16 = arith.constant 9.99999974E-6 : f32
    %19 = vector.broadcast %cst_16 : f32 to vector<32x1xf32>
    %20 = arith.addf %18, %19 : vector<32x1xf32>
    %21 = math.rsqrt %20 : vector<32x1xf32>
    %22 = arith.mulf %6, %21 : vector<32x1xf32>
    %23 = arith.mulf %14, %22 : vector<32x1xf32>
    %24 = arith.subf %7, %23 : vector<32x1xf32>
    %25 = vector.broadcast %22 : vector<32x1xf32> to vector<32x128xf32>
    %26 = arith.mulf %2, %25 : vector<32x128xf32>
    %27 = vector.broadcast %24 : vector<32x1xf32> to vector<32x128xf32>
    %28 = arith.addf %26, %27 : vector<32x128xf32>
    %cst_17 = arith.constant 0.000000e+00 : f32
    %29 = vector.broadcast %cst_17 : f32 to vector<32x128xf32>
    %30 = arith.maximumf %28, %29 : vector<32x128xf32>
    %31 = arith.truncf %30 : vector<32x128xf32> to vector<32x128xbf16>
    %c0_18 = arith.constant 0 : index
    %c0_19 = arith.constant 0 : index
    %32 = vector.load %arg6[%c0_18, %c0_19] : memref<48x128xbf16, #tpu.memory_space<vmem>>, vector<32x128xbf16>
    tpu.vector_store %arg6[%c0_18, %c0_19], %31 {strides = array<i32>} : memref<48x128xbf16, #tpu.memory_space<vmem>>, vector<32x128xbf16>,
    %c32 = arith.constant 32 : index
    %c0_20 = arith.constant 0 : index
    %33 = vector.load %arg4[%c32, %c0_20] : memref<48x1xf32, #tpu.memory_space<vmem>>, vector<16x1xf32>
    %c32_21 = arith.constant 32 : index
    %c0_22 = arith.constant 0 : index
    %34 = vector.load %arg5[%c32_21, %c0_22] : memref<48x1xf32, #tpu.memory_space<vmem>>, vector<16x1xf32>
    %cst_23 = arith.constant dense<0.000000e+00> : vector<16xf32>
    %35 = vector.multi_reduction <add>, %5, %cst_23 [1] : vector<16x128xf32> to vector<16xf32>
    %36 = vector.shape_cast %35 : vector<16xf32> to vector<16x1xf32>
    %37 = arith.mulf %5, %5 : vector<16x128xf32>
    %cst_24 = arith.constant dense<0.000000e+00> : vector<16xf32>
    %38 = vector.multi_reduction <add>, %37, %cst_24 [1] : vector<16x128xf32> to vector<16xf32>
    %39 = vector.shape_cast %38 : vector<16xf32> to vector<16x1xf32>
    %cst_25 = arith.constant 7.200000e+01 : f32
    %40 = vector.broadcast %cst_25 : f32 to vector<16x1xf32>
    %41 = arith.divf %36, %40 : vector<16x1xf32>
    %cst_26 = arith.constant 7.200000e+01 : f32
    %42 = vector.broadcast %cst_26 : f32 to vector<16x1xf32>
    %43 = arith.divf %39, %42 : vector<16x1xf32>
    %44 = arith.mulf %41, %41 : vector<16x1xf32>
    %45 = arith.subf %43, %44 : vector<16x1xf32>
    %cst_27 = arith.constant 9.99999974E-6 : f32
    %46 = vector.broadcast %cst_27 : f32 to vector<16x1xf32>
    %47 = arith.addf %45, %46 : vector<16x1xf32>
    %48 = math.rsqrt %47 : vector<16x1xf32>
    %49 = arith.mulf %33, %48 : vector<16x1xf32>
    %50 = arith.mulf %41, %49 : vector<16x1xf32>
    %51 = arith.subf %34, %50 : vector<16x1xf32>
    %52 = vector.broadcast %49 : vector<16x1xf32> to vector<16x128xf32>
    %53 = arith.mulf %5, %52 : vector<16x128xf32>
    %54 = vector.broadcast %51 : vector<16x1xf32> to vector<16x128xf32>
    %55 = arith.addf %53, %54 : vector<16x128xf32>
    %cst_28 = arith.constant 0.000000e+00 : f32
    %56 = vector.broadcast %cst_28 : f32 to vector<16x128xf32>
    %57 = arith.maximumf %55, %56 : vector<16x128xf32>
    %58 = arith.truncf %57 : vector<16x128xf32> to vector<16x128xbf16>
    %c32_29 = arith.constant 32 : index
    %c0_30 = arith.constant 0 : index
    %59 = vector.load %arg6[%c32_29, %c0_30] : memref<48x128xbf16, #tpu.memory_space<vmem>>, vector<16x128xbf16>
    tpu.vector_store %arg6[%c32_29, %c0_30], %58 {strides = array<i32>} : memref<48x128xbf16, #tpu.memory_space<vmem>>, vector<16x128xbf16>,
    return
  }
}

module attributes {stable_mosaic.version = 11 : i64} {
  func.func @_deconv4_bn_relu_kernel(%arg0: memref<396x128xbf16, #tpu.memory_space<vmem>>, %arg1: memref<16x396xbf16, #tpu.memory_space<vmem>>, %arg2: memref<264x128xbf16, #tpu.memory_space<vmem>>, %arg3: memref<16x264xbf16, #tpu.memory_space<vmem>>, %arg4: memref<264x128xbf16, #tpu.memory_space<vmem>>, %arg5: memref<16x264xbf16, #tpu.memory_space<vmem>>, %arg6: memref<176x128xbf16, #tpu.memory_space<vmem>>, %arg7: memref<16x176xbf16, #tpu.memory_space<vmem>>, %arg8: memref<16x1xf32, #tpu.memory_space<vmem>>, %arg9: memref<16x1xf32, #tpu.memory_space<vmem>>, %arg10: memref<16x128xbf16, #tpu.memory_space<vmem>>, %arg11: memref<16x128xbf16, #tpu.memory_space<vmem>>, %arg12: memref<16x128xbf16, #tpu.memory_space<vmem>>, %arg13: memref<16x128xbf16, #tpu.memory_space<vmem>>) attributes {dimension_semantics = [], scalar_prefetch = 0 : i64, scratch_operands = 0 : i64, tpu.core_type = #tpu.core_type<tc>} {
    %c0 = arith.constant 0 : index
    %c0_0 = arith.constant 0 : index
    %0 = vector.load %arg1[%c0, %c0_0] : memref<16x396xbf16, #tpu.memory_space<vmem>>, vector<16x396xbf16>
    %c0_1 = arith.constant 0 : index
    %c0_2 = arith.constant 0 : index
    %1 = vector.load %arg0[%c0_1, %c0_2] : memref<396x128xbf16, #tpu.memory_space<vmem>>, vector<396x128xbf16>
    %cst = arith.constant dense<0.000000e+00> : vector<16x128xf32>
    %2 = tpu.matmul %0, %1, %cst {dimension_numbers = #tpu.dot_dimension_numbers<[1], [0], [0], [1], [0, 0, 1, 1], [], []>} : vector<16x396xbf16>, vector<396x128xbf16>, vector<16x128xf32> -> vector<16x128xf32>
    %cst_3 = arith.constant dense<0.000000e+00> : vector<16xf32>
    %3 = vector.multi_reduction <add>, %2, %cst_3 [1] : vector<16x128xf32> to vector<16xf32>
    %4 = vector.shape_cast %3 : vector<16xf32> to vector<16x1xf32>
    %5 = arith.mulf %2, %2 : vector<16x128xf32>
    %cst_4 = arith.constant dense<0.000000e+00> : vector<16xf32>
    %6 = vector.multi_reduction <add>, %5, %cst_4 [1] : vector<16x128xf32> to vector<16xf32>
    %7 = vector.shape_cast %6 : vector<16xf32> to vector<16x1xf32>
    %c0_5 = arith.constant 0 : index
    %c0_6 = arith.constant 0 : index
    %8 = vector.load %arg3[%c0_5, %c0_6] : memref<16x264xbf16, #tpu.memory_space<vmem>>, vector<16x264xbf16>
    %c0_7 = arith.constant 0 : index
    %c0_8 = arith.constant 0 : index
    %9 = vector.load %arg2[%c0_7, %c0_8] : memref<264x128xbf16, #tpu.memory_space<vmem>>, vector<264x128xbf16>
    %cst_9 = arith.constant dense<0.000000e+00> : vector<16x128xf32>
    %10 = tpu.matmul %8, %9, %cst_9 {dimension_numbers = #tpu.dot_dimension_numbers<[1], [0], [0], [1], [0, 0, 1, 1], [], []>} : vector<16x264xbf16>, vector<264x128xbf16>, vector<16x128xf32> -> vector<16x128xf32>
    %cst_10 = arith.constant dense<0.000000e+00> : vector<16xf32>
    %11 = vector.multi_reduction <add>, %10, %cst_10 [1] : vector<16x128xf32> to vector<16xf32>
    %12 = vector.shape_cast %11 : vector<16xf32> to vector<16x1xf32>
    %13 = arith.mulf %10, %10 : vector<16x128xf32>
    %cst_11 = arith.constant dense<0.000000e+00> : vector<16xf32>
    %14 = vector.multi_reduction <add>, %13, %cst_11 [1] : vector<16x128xf32> to vector<16xf32>
    %15 = vector.shape_cast %14 : vector<16xf32> to vector<16x1xf32>
    %16 = arith.addf %4, %12 : vector<16x1xf32>
    %17 = arith.addf %7, %15 : vector<16x1xf32>
    %c0_12 = arith.constant 0 : index
    %c0_13 = arith.constant 0 : index
    %18 = vector.load %arg5[%c0_12, %c0_13] : memref<16x264xbf16, #tpu.memory_space<vmem>>, vector<16x264xbf16>
    %c0_14 = arith.constant 0 : index
    %c0_15 = arith.constant 0 : index
    %19 = vector.load %arg4[%c0_14, %c0_15] : memref<264x128xbf16, #tpu.memory_space<vmem>>, vector<264x128xbf16>
    %cst_16 = arith.constant dense<0.000000e+00> : vector<16x128xf32>
    %20 = tpu.matmul %18, %19, %cst_16 {dimension_numbers = #tpu.dot_dimension_numbers<[1], [0], [0], [1], [0, 0, 1, 1], [], []>} : vector<16x264xbf16>, vector<264x128xbf16>, vector<16x128xf32> -> vector<16x128xf32>
    %cst_17 = arith.constant dense<0.000000e+00> : vector<16xf32>
    %21 = vector.multi_reduction <add>, %20, %cst_17 [1] : vector<16x128xf32> to vector<16xf32>
    %22 = vector.shape_cast %21 : vector<16xf32> to vector<16x1xf32>
    %23 = arith.mulf %20, %20 : vector<16x128xf32>
    %cst_18 = arith.constant dense<0.000000e+00> : vector<16xf32>
    %24 = vector.multi_reduction <add>, %23, %cst_18 [1] : vector<16x128xf32> to vector<16xf32>
    %25 = vector.shape_cast %24 : vector<16xf32> to vector<16x1xf32>
    %26 = arith.addf %16, %22 : vector<16x1xf32>
    %27 = arith.addf %17, %25 : vector<16x1xf32>
    %c0_19 = arith.constant 0 : index
    %c0_20 = arith.constant 0 : index
    %28 = vector.load %arg7[%c0_19, %c0_20] : memref<16x176xbf16, #tpu.memory_space<vmem>>, vector<16x176xbf16>
    %c0_21 = arith.constant 0 : index
    %c0_22 = arith.constant 0 : index
    %29 = vector.load %arg6[%c0_21, %c0_22] : memref<176x128xbf16, #tpu.memory_space<vmem>>, vector<176x128xbf16>
    %cst_23 = arith.constant dense<0.000000e+00> : vector<16x128xf32>
    %30 = tpu.matmul %28, %29, %cst_23 {dimension_numbers = #tpu.dot_dimension_numbers<[1], [0], [0], [1], [0, 0, 1, 1], [], []>} : vector<16x176xbf16>, vector<176x128xbf16>, vector<16x128xf32> -> vector<16x128xf32>
    %cst_24 = arith.constant dense<0.000000e+00> : vector<16xf32>
    %31 = vector.multi_reduction <add>, %30, %cst_24 [1] : vector<16x128xf32> to vector<16xf32>
    %32 = vector.shape_cast %31 : vector<16xf32> to vector<16x1xf32>
    %33 = arith.mulf %30, %30 : vector<16x128xf32>
    %cst_25 = arith.constant dense<0.000000e+00> : vector<16xf32>
    %34 = vector.multi_reduction <add>, %33, %cst_25 [1] : vector<16x128xf32> to vector<16xf32>
    %35 = vector.shape_cast %34 : vector<16xf32> to vector<16x1xf32>
    %36 = arith.addf %26, %32 : vector<16x1xf32>
    %37 = arith.addf %27, %35 : vector<16x1xf32>
    %cst_26 = arith.constant 4.500000e+02 : f32
    %38 = vector.broadcast %cst_26 : f32 to vector<16x1xf32>
    %39 = arith.divf %36, %38 : vector<16x1xf32>
    %cst_27 = arith.constant 4.500000e+02 : f32
    %40 = vector.broadcast %cst_27 : f32 to vector<16x1xf32>
    %41 = arith.divf %37, %40 : vector<16x1xf32>
    %42 = arith.mulf %39, %39 : vector<16x1xf32>
    %43 = arith.subf %41, %42 : vector<16x1xf32>
    %c0_28 = arith.constant 0 : index
    %c0_29 = arith.constant 0 : index
    %44 = vector.load %arg8[%c0_28, %c0_29] : memref<16x1xf32, #tpu.memory_space<vmem>>, vector<16x1xf32>
    %cst_30 = arith.constant 9.99999974E-6 : f32
    %45 = vector.broadcast %cst_30 : f32 to vector<16x1xf32>
    %46 = arith.addf %43, %45 : vector<16x1xf32>
    %47 = math.rsqrt %46 : vector<16x1xf32>
    %48 = arith.mulf %44, %47 : vector<16x1xf32>
    %c0_31 = arith.constant 0 : index
    %c0_32 = arith.constant 0 : index
    %49 = vector.load %arg9[%c0_31, %c0_32] : memref<16x1xf32, #tpu.memory_space<vmem>>, vector<16x1xf32>
    %50 = arith.mulf %39, %48 : vector<16x1xf32>
    %51 = arith.subf %49, %50 : vector<16x1xf32>
    %52 = vector.broadcast %48 : vector<16x1xf32> to vector<16x128xf32>
    %53 = arith.mulf %2, %52 : vector<16x128xf32>
    %54 = vector.broadcast %51 : vector<16x1xf32> to vector<16x128xf32>
    %55 = arith.addf %53, %54 : vector<16x128xf32>
    %cst_33 = arith.constant 0.000000e+00 : f32
    %56 = vector.broadcast %cst_33 : f32 to vector<16x128xf32>
    %57 = arith.maximumf %55, %56 : vector<16x128xf32>
    %58 = arith.truncf %57 : vector<16x128xf32> to vector<16x128xbf16>
    %c0_34 = arith.constant 0 : index
    %c0_35 = arith.constant 0 : index
    %59 = vector.load %arg10[%c0_34, %c0_35] : memref<16x128xbf16, #tpu.memory_space<vmem>>, vector<16x128xbf16>
    tpu.vector_store %arg10[%c0_34, %c0_35], %58 {strides = array<i32>} : memref<16x128xbf16, #tpu.memory_space<vmem>>, vector<16x128xbf16>,
    %60 = vector.broadcast %48 : vector<16x1xf32> to vector<16x128xf32>
    %61 = arith.mulf %10, %60 : vector<16x128xf32>
    %62 = vector.broadcast %51 : vector<16x1xf32> to vector<16x128xf32>
    %63 = arith.addf %61, %62 : vector<16x128xf32>
    %cst_36 = arith.constant 0.000000e+00 : f32
    %64 = vector.broadcast %cst_36 : f32 to vector<16x128xf32>
    %65 = arith.maximumf %63, %64 : vector<16x128xf32>
    %66 = arith.truncf %65 : vector<16x128xf32> to vector<16x128xbf16>
    %c0_37 = arith.constant 0 : index
    %c0_38 = arith.constant 0 : index
    %67 = vector.load %arg11[%c0_37, %c0_38] : memref<16x128xbf16, #tpu.memory_space<vmem>>, vector<16x128xbf16>
    tpu.vector_store %arg11[%c0_37, %c0_38], %66 {strides = array<i32>} : memref<16x128xbf16, #tpu.memory_space<vmem>>, vector<16x128xbf16>,
    %68 = vector.broadcast %48 : vector<16x1xf32> to vector<16x128xf32>
    %69 = arith.mulf %20, %68 : vector<16x128xf32>
    %70 = vector.broadcast %51 : vector<16x1xf32> to vector<16x128xf32>
    %71 = arith.addf %69, %70 : vector<16x128xf32>
    %cst_39 = arith.constant 0.000000e+00 : f32
    %72 = vector.broadcast %cst_39 : f32 to vector<16x128xf32>
    %73 = arith.maximumf %71, %72 : vector<16x128xf32>
    %74 = arith.truncf %73 : vector<16x128xf32> to vector<16x128xbf16>
    %c0_40 = arith.constant 0 : index
    %c0_41 = arith.constant 0 : index
    %75 = vector.load %arg12[%c0_40, %c0_41] : memref<16x128xbf16, #tpu.memory_space<vmem>>, vector<16x128xbf16>
    tpu.vector_store %arg12[%c0_40, %c0_41], %74 {strides = array<i32>} : memref<16x128xbf16, #tpu.memory_space<vmem>>, vector<16x128xbf16>,
    %76 = vector.broadcast %48 : vector<16x1xf32> to vector<16x128xf32>
    %77 = arith.mulf %30, %76 : vector<16x128xf32>
    %78 = vector.broadcast %51 : vector<16x1xf32> to vector<16x128xf32>
    %79 = arith.addf %77, %78 : vector<16x128xf32>
    %cst_42 = arith.constant 0.000000e+00 : f32
    %80 = vector.broadcast %cst_42 : f32 to vector<16x128xf32>
    %81 = arith.maximumf %79, %80 : vector<16x128xf32>
    %82 = arith.truncf %81 : vector<16x128xf32> to vector<16x128xbf16>
    %c0_43 = arith.constant 0 : index
    %c0_44 = arith.constant 0 : index
    %83 = vector.load %arg13[%c0_43, %c0_44] : memref<16x128xbf16, #tpu.memory_space<vmem>>, vector<16x128xbf16>
    tpu.vector_store %arg13[%c0_43, %c0_44], %82 {strides = array<i32>} : memref<16x128xbf16, #tpu.memory_space<vmem>>, vector<16x128xbf16>,
    return
  }
}

module attributes {stable_mosaic.version = 11 : i64} {
  func.func @_deconv4_bn_relu_kernel(%arg0: memref<64x512xbf16, #tpu.memory_space<vmem>>, %arg1: memref<8x64xbf16, #tpu.memory_space<vmem>>, %arg2: memref<32x512xbf16, #tpu.memory_space<vmem>>, %arg3: memref<8x32xbf16, #tpu.memory_space<vmem>>, %arg4: memref<32x512xbf16, #tpu.memory_space<vmem>>, %arg5: memref<8x32xbf16, #tpu.memory_space<vmem>>, %arg6: memref<16x512xbf16, #tpu.memory_space<vmem>>, %arg7: memref<8x16xbf16, #tpu.memory_space<vmem>>, %arg8: memref<8x1xf32, #tpu.memory_space<vmem>>, %arg9: memref<8x1xf32, #tpu.memory_space<vmem>>, %arg10: memref<8x512xbf16, #tpu.memory_space<vmem>>, %arg11: memref<8x512xbf16, #tpu.memory_space<vmem>>, %arg12: memref<8x512xbf16, #tpu.memory_space<vmem>>, %arg13: memref<8x512xbf16, #tpu.memory_space<vmem>>) attributes {dimension_semantics = [], scalar_prefetch = 0 : i64, scratch_operands = 0 : i64, tpu.core_type = #tpu.core_type<tc>} {
    %c0 = arith.constant 0 : index
    %c0_0 = arith.constant 0 : index
    %0 = vector.load %arg1[%c0, %c0_0] : memref<8x64xbf16, #tpu.memory_space<vmem>>, vector<8x64xbf16>
    %c0_1 = arith.constant 0 : index
    %c0_2 = arith.constant 0 : index
    %1 = vector.load %arg0[%c0_1, %c0_2] : memref<64x512xbf16, #tpu.memory_space<vmem>>, vector<64x512xbf16>
    %cst = arith.constant dense<0.000000e+00> : vector<8x512xf32>
    %2 = tpu.matmul %0, %1, %cst {dimension_numbers = #tpu.dot_dimension_numbers<[1], [0], [0], [1], [0, 0, 1, 1], [], []>} : vector<8x64xbf16>, vector<64x512xbf16>, vector<8x512xf32> -> vector<8x512xf32>
    %cst_3 = arith.constant dense<0.000000e+00> : vector<8xf32>
    %3 = vector.multi_reduction <add>, %2, %cst_3 [1] : vector<8x512xf32> to vector<8xf32>
    %4 = vector.shape_cast %3 : vector<8xf32> to vector<8x1xf32>
    %5 = arith.mulf %2, %2 : vector<8x512xf32>
    %cst_4 = arith.constant dense<0.000000e+00> : vector<8xf32>
    %6 = vector.multi_reduction <add>, %5, %cst_4 [1] : vector<8x512xf32> to vector<8xf32>
    %7 = vector.shape_cast %6 : vector<8xf32> to vector<8x1xf32>
    %c0_5 = arith.constant 0 : index
    %c0_6 = arith.constant 0 : index
    %8 = vector.load %arg3[%c0_5, %c0_6] : memref<8x32xbf16, #tpu.memory_space<vmem>>, vector<8x32xbf16>
    %c0_7 = arith.constant 0 : index
    %c0_8 = arith.constant 0 : index
    %9 = vector.load %arg2[%c0_7, %c0_8] : memref<32x512xbf16, #tpu.memory_space<vmem>>, vector<32x512xbf16>
    %cst_9 = arith.constant dense<0.000000e+00> : vector<8x512xf32>
    %10 = tpu.matmul %8, %9, %cst_9 {dimension_numbers = #tpu.dot_dimension_numbers<[1], [0], [0], [1], [0, 0, 1, 1], [], []>} : vector<8x32xbf16>, vector<32x512xbf16>, vector<8x512xf32> -> vector<8x512xf32>
    %cst_10 = arith.constant dense<0.000000e+00> : vector<8xf32>
    %11 = vector.multi_reduction <add>, %10, %cst_10 [1] : vector<8x512xf32> to vector<8xf32>
    %12 = vector.shape_cast %11 : vector<8xf32> to vector<8x1xf32>
    %13 = arith.mulf %10, %10 : vector<8x512xf32>
    %cst_11 = arith.constant dense<0.000000e+00> : vector<8xf32>
    %14 = vector.multi_reduction <add>, %13, %cst_11 [1] : vector<8x512xf32> to vector<8xf32>
    %15 = vector.shape_cast %14 : vector<8xf32> to vector<8x1xf32>
    %16 = arith.addf %4, %12 : vector<8x1xf32>
    %17 = arith.addf %7, %15 : vector<8x1xf32>
    %c0_12 = arith.constant 0 : index
    %c0_13 = arith.constant 0 : index
    %18 = vector.load %arg5[%c0_12, %c0_13] : memref<8x32xbf16, #tpu.memory_space<vmem>>, vector<8x32xbf16>
    %c0_14 = arith.constant 0 : index
    %c0_15 = arith.constant 0 : index
    %19 = vector.load %arg4[%c0_14, %c0_15] : memref<32x512xbf16, #tpu.memory_space<vmem>>, vector<32x512xbf16>
    %cst_16 = arith.constant dense<0.000000e+00> : vector<8x512xf32>
    %20 = tpu.matmul %18, %19, %cst_16 {dimension_numbers = #tpu.dot_dimension_numbers<[1], [0], [0], [1], [0, 0, 1, 1], [], []>} : vector<8x32xbf16>, vector<32x512xbf16>, vector<8x512xf32> -> vector<8x512xf32>
    %cst_17 = arith.constant dense<0.000000e+00> : vector<8xf32>
    %21 = vector.multi_reduction <add>, %20, %cst_17 [1] : vector<8x512xf32> to vector<8xf32>
    %22 = vector.shape_cast %21 : vector<8xf32> to vector<8x1xf32>
    %23 = arith.mulf %20, %20 : vector<8x512xf32>
    %cst_18 = arith.constant dense<0.000000e+00> : vector<8xf32>
    %24 = vector.multi_reduction <add>, %23, %cst_18 [1] : vector<8x512xf32> to vector<8xf32>
    %25 = vector.shape_cast %24 : vector<8xf32> to vector<8x1xf32>
    %26 = arith.addf %16, %22 : vector<8x1xf32>
    %27 = arith.addf %17, %25 : vector<8x1xf32>
    %c0_19 = arith.constant 0 : index
    %c0_20 = arith.constant 0 : index
    %28 = vector.load %arg7[%c0_19, %c0_20] : memref<8x16xbf16, #tpu.memory_space<vmem>>, vector<8x16xbf16>
    %c0_21 = arith.constant 0 : index
    %c0_22 = arith.constant 0 : index
    %29 = vector.load %arg6[%c0_21, %c0_22] : memref<16x512xbf16, #tpu.memory_space<vmem>>, vector<16x512xbf16>
    %cst_23 = arith.constant dense<0.000000e+00> : vector<8x512xf32>
    %30 = tpu.matmul %28, %29, %cst_23 {dimension_numbers = #tpu.dot_dimension_numbers<[1], [0], [0], [1], [0, 0, 1, 1], [], []>} : vector<8x16xbf16>, vector<16x512xbf16>, vector<8x512xf32> -> vector<8x512xf32>
    %cst_24 = arith.constant dense<0.000000e+00> : vector<8xf32>
    %31 = vector.multi_reduction <add>, %30, %cst_24 [1] : vector<8x512xf32> to vector<8xf32>
    %32 = vector.shape_cast %31 : vector<8xf32> to vector<8x1xf32>
    %33 = arith.mulf %30, %30 : vector<8x512xf32>
    %cst_25 = arith.constant dense<0.000000e+00> : vector<8xf32>
    %34 = vector.multi_reduction <add>, %33, %cst_25 [1] : vector<8x512xf32> to vector<8xf32>
    %35 = vector.shape_cast %34 : vector<8xf32> to vector<8x1xf32>
    %36 = arith.addf %26, %32 : vector<8x1xf32>
    %37 = arith.addf %27, %35 : vector<8x1xf32>
    %cst_26 = arith.constant 1.682000e+03 : f32
    %38 = vector.broadcast %cst_26 : f32 to vector<8x1xf32>
    %39 = arith.divf %36, %38 : vector<8x1xf32>
    %cst_27 = arith.constant 1.682000e+03 : f32
    %40 = vector.broadcast %cst_27 : f32 to vector<8x1xf32>
    %41 = arith.divf %37, %40 : vector<8x1xf32>
    %42 = arith.mulf %39, %39 : vector<8x1xf32>
    %43 = arith.subf %41, %42 : vector<8x1xf32>
    %c0_28 = arith.constant 0 : index
    %c0_29 = arith.constant 0 : index
    %44 = vector.load %arg8[%c0_28, %c0_29] : memref<8x1xf32, #tpu.memory_space<vmem>>, vector<8x1xf32>
    %cst_30 = arith.constant 9.99999974E-6 : f32
    %45 = vector.broadcast %cst_30 : f32 to vector<8x1xf32>
    %46 = arith.addf %43, %45 : vector<8x1xf32>
    %47 = math.rsqrt %46 : vector<8x1xf32>
    %48 = arith.mulf %44, %47 : vector<8x1xf32>
    %c0_31 = arith.constant 0 : index
    %c0_32 = arith.constant 0 : index
    %49 = vector.load %arg9[%c0_31, %c0_32] : memref<8x1xf32, #tpu.memory_space<vmem>>, vector<8x1xf32>
    %50 = arith.mulf %39, %48 : vector<8x1xf32>
    %51 = arith.subf %49, %50 : vector<8x1xf32>
    %52 = vector.broadcast %48 : vector<8x1xf32> to vector<8x512xf32>
    %53 = arith.mulf %2, %52 : vector<8x512xf32>
    %54 = vector.broadcast %51 : vector<8x1xf32> to vector<8x512xf32>
    %55 = arith.addf %53, %54 : vector<8x512xf32>
    %cst_33 = arith.constant 0.000000e+00 : f32
    %56 = vector.broadcast %cst_33 : f32 to vector<8x512xf32>
    %57 = arith.maximumf %55, %56 : vector<8x512xf32>
    %58 = arith.truncf %57 : vector<8x512xf32> to vector<8x512xbf16>
    %c0_34 = arith.constant 0 : index
    %c0_35 = arith.constant 0 : index
    %59 = vector.load %arg10[%c0_34, %c0_35] : memref<8x512xbf16, #tpu.memory_space<vmem>>, vector<8x512xbf16>
    tpu.vector_store %arg10[%c0_34, %c0_35], %58 {strides = array<i32>} : memref<8x512xbf16, #tpu.memory_space<vmem>>, vector<8x512xbf16>,
    %60 = vector.broadcast %48 : vector<8x1xf32> to vector<8x512xf32>
    %61 = arith.mulf %10, %60 : vector<8x512xf32>
    %62 = vector.broadcast %51 : vector<8x1xf32> to vector<8x512xf32>
    %63 = arith.addf %61, %62 : vector<8x512xf32>
    %cst_36 = arith.constant 0.000000e+00 : f32
    %64 = vector.broadcast %cst_36 : f32 to vector<8x512xf32>
    %65 = arith.maximumf %63, %64 : vector<8x512xf32>
    %66 = arith.truncf %65 : vector<8x512xf32> to vector<8x512xbf16>
    %c0_37 = arith.constant 0 : index
    %c0_38 = arith.constant 0 : index
    %67 = vector.load %arg11[%c0_37, %c0_38] : memref<8x512xbf16, #tpu.memory_space<vmem>>, vector<8x512xbf16>
    tpu.vector_store %arg11[%c0_37, %c0_38], %66 {strides = array<i32>} : memref<8x512xbf16, #tpu.memory_space<vmem>>, vector<8x512xbf16>,
    %68 = vector.broadcast %48 : vector<8x1xf32> to vector<8x512xf32>
    %69 = arith.mulf %20, %68 : vector<8x512xf32>
    %70 = vector.broadcast %51 : vector<8x1xf32> to vector<8x512xf32>
    %71 = arith.addf %69, %70 : vector<8x512xf32>
    %cst_39 = arith.constant 0.000000e+00 : f32
    %72 = vector.broadcast %cst_39 : f32 to vector<8x512xf32>
    %73 = arith.maximumf %71, %72 : vector<8x512xf32>
    %74 = arith.truncf %73 : vector<8x512xf32> to vector<8x512xbf16>
    %c0_40 = arith.constant 0 : index
    %c0_41 = arith.constant 0 : index
    %75 = vector.load %arg12[%c0_40, %c0_41] : memref<8x512xbf16, #tpu.memory_space<vmem>>, vector<8x512xbf16>
    tpu.vector_store %arg12[%c0_40, %c0_41], %74 {strides = array<i32>} : memref<8x512xbf16, #tpu.memory_space<vmem>>, vector<8x512xbf16>,
    %76 = vector.broadcast %48 : vector<8x1xf32> to vector<8x512xf32>
    %77 = arith.mulf %30, %76 : vector<8x512xf32>
    %78 = vector.broadcast %51 : vector<8x1xf32> to vector<8x512xf32>
    %79 = arith.addf %77, %78 : vector<8x512xf32>
    %cst_42 = arith.constant 0.000000e+00 : f32
    %80 = vector.broadcast %cst_42 : f32 to vector<8x512xf32>
    %81 = arith.maximumf %79, %80 : vector<8x512xf32>
    %82 = arith.truncf %81 : vector<8x512xf32> to vector<8x512xbf16>
    %c0_43 = arith.constant 0 : index
    %c0_44 = arith.constant 0 : index
    %83 = vector.load %arg13[%c0_43, %c0_44] : memref<8x512xbf16, #tpu.memory_space<vmem>>, vector<8x512xbf16>
    tpu.vector_store %arg13[%c0_43, %c0_44], %82 {strides = array<i32>} : memref<8x512xbf16, #tpu.memory_space<vmem>>, vector<8x512xbf16>,
    return
  }
}

module attributes {stable_mosaic.version = 11 : i64} {
  func.func @_out_kernel(%arg0: i32, %arg1: memref<129x896xbf16, #tpu.memory_space<vmem>>, %arg2: memref<3x129xbf16, #tpu.memory_space<vmem>>, %arg3: memref<3x896xf32, #tpu.memory_space<vmem>>) attributes {dimension_semantics = [#tpu.dimension_semantics<parallel>], iteration_bounds = array<i64: 2>, scalar_prefetch = 0 : i64, scratch_operands = 0 : i64, tpu.core_type = #tpu.core_type<tc>, window_params = [{transform_indices = @transform_0, window_bounds = array<i64: 129, 896>}, {pipeline_mode = #tpu.pipeline_mode<synchronous>, transform_indices = @transform_1, window_bounds = array<i64: 3, 129>}, {transform_indices = @transform_2, window_bounds = array<i64: 3, 896>}]} {
    %c0 = arith.constant 0 : index
    %c0_0 = arith.constant 0 : index
    %0 = vector.load %arg2[%c0, %c0_0] : memref<3x129xbf16, #tpu.memory_space<vmem>>, vector<3x129xbf16>
    %c0_1 = arith.constant 0 : index
    %c0_2 = arith.constant 0 : index
    %1 = vector.load %arg1[%c0_1, %c0_2] : memref<129x896xbf16, #tpu.memory_space<vmem>>, vector<129x896xbf16>
    %cst = arith.constant dense<0.000000e+00> : vector<3x896xf32>
    %2 = tpu.matmul %0, %1, %cst {dimension_numbers = #tpu.dot_dimension_numbers<[1], [0], [0], [1], [0, 0, 1, 1], [], []>} : vector<3x129xbf16>, vector<129x896xbf16>, vector<3x896xf32> -> vector<3x896xf32>
    %cst_3 = arith.constant 5.000000e-01 : f32
    %3 = vector.broadcast %cst_3 : f32 to vector<3x896xf32>
    %4 = arith.mulf %3, %2 : vector<3x896xf32>
    %5 = math.tanh %4 : vector<3x896xf32>
    %cst_4 = arith.constant 1.000000e+00 : f32
    %6 = vector.broadcast %cst_4 : f32 to vector<3x896xf32>
    %7 = arith.addf %5, %6 : vector<3x896xf32>
    %cst_5 = arith.constant 5.000000e-01 : f32
    %8 = vector.broadcast %cst_5 : f32 to vector<3x896xf32>
    %9 = arith.mulf %8, %7 : vector<3x896xf32>
    %c0_6 = arith.constant 0 : index
    %c0_7 = arith.constant 0 : index
    %10 = vector.load %arg3[%c0_6, %c0_7] : memref<3x896xf32, #tpu.memory_space<vmem>>, vector<3x896xf32>
    tpu.vector_store %arg3[%c0_6, %c0_7], %9 {strides = array<i32>} : memref<3x896xf32, #tpu.memory_space<vmem>>, vector<3x896xf32>,
    return
  }
  func.func @transform_0(%arg0: i32) -> (i32, i32) {
    %c0_i32 = arith.constant 0 : i32
    %c0_i32_0 = arith.constant 0 : i32
    return %c0_i32, %arg0 : i32, i32
  }
  func.func @transform_1(%arg0: i32) -> (i32, i32) {
    %c0_i32 = arith.constant 0 : i32
    %c0_i32_0 = arith.constant 0 : i32
    %c0_i32_1 = arith.constant 0 : i32
    return %c0_i32, %c0_i32_0 : i32, i32
  }
  func.func @transform_2(%arg0: i32) -> (i32, i32) {
    %c0_i32 = arith.constant 0 : i32
    %c0_i32_0 = arith.constant 0 : i32
    return %c0_i32, %arg0 : i32, i32
  }
}

</mosaic_0001>

<bundles_post_ra>
// kernel: decoder_forward.5
= control target key start
LH: loop header
LB: loop body
LE: loop exit
PB: predicated region body
PF: predicated region fallthrough
CT: control target
= control target key end

     0   :  { %20 = vsyncpa [#allocation3], 0  ;;  %s3924_s0 = inlined_call_operand.vmem [shape: bf16[2,10], index: 0, kind: input, shape index: {}]   ;;  %s3925_s1 = inlined_call_operand.vmem [shape: bf16[10,864], index: 1, kind: input, shape index: {}]   ;;  %s3926_s2 = inlined_call_operand.vmem [shape: f32[1,864], index: 2, kind: input, shape index: {}]   ;;  %s3927_s3 = inlined_call_operand.vmem [shape: f32[864,24], index: 3, kind: input, shape index: {}]   ;;  %s3928_s4 = inlined_call_operand.vmem [shape: f32[24,864], index: 4, kind: input, shape index: {}]   ;;  %s3929_s5 = inlined_call_operand.hbm [shape: f32[1,24], index: 5, kind: input, shape index: {}]   ;;  %s3930_s6 = inlined_call_operand.hbm [shape: f32[1,24], index: 6, kind: input, shape index: {}]   ;;  %s3931_s7 = inlined_call_operand.vmem [shape: bf16[2,16], index: 7, kind: input, shape index: {}]   ;;  %s3932_s8 = inlined_call_operand.vmem [shape: bf16[16,576], index: 8, kind: input, shape index: {}]   ;;  %s3933_s9 = inlined_call_operand.vmem [shape: f32[576,16], index: 9, kind: input, shape index: {}]   ;;  %s3934_s10 = inlined_call_operand.vmem [shape: f32[16,576], index: 10, kind: input, shape index: {}]   ;;  %s3935_s11 = inlined_call_operand.hbm [shape: f32[1,16], index: 11, kind: input, shape index: {}]   ;;  %s3936_s12 = inlined_call_operand.hbm [shape: f32[1,16], index: 12, kind: input, shape index: {}]   ;;  %s3937_s13 = inlined_call_operand.vmem [shape: bf16[2,864], index: 13, kind: output, shape index: {0}]   ;;  %s3938_s14 = inlined_call_operand.vmem [shape: bf16[2,576], index: 14, kind: output, shape index: {1}]  }
   0x1   :  { %21 = vsyncpa [#allocation5], 0  ;;  %s49_s15 = sshll.u32 %s3930_s6, 4  ;;  %s50_s15 = int_to_ptr.hbm [resolvable:$true] %s49_s15 }
   0x2   :  { %22 = vsyncpa [#allocation8], 0  ;;  %s2163_s16 = smov [#allocation4]   ;;  %s38_s20 = sshll.u32 %s3929_s5, 4  ;;  %s39_s20 = int_to_ptr.hbm [resolvable:$true] %s38_s20 }
   0x3   :  { %s51_s17 = sshll.u32 %s2163_s16, 4  ;;  %s2164_s21 = smov [#allocation2]   ;;  %s52_s17 = int_to_ptr.vmem [resolvable:$true] %s51_s17 }
   0x4   :  { %54 = dma.hbm_to_vmem [thread:$0]  %s50_s15, 16, %s52_s17, [#allocation5]  }
   0x5   :  { %s40_s22 = sshll.u32 %s2164_s21, 4  ;;  %s68_s25 = sshll.u32 %s3935_s11, 4  ;;  %s41_s22 = int_to_ptr.vmem [resolvable:$true] %s40_s22  ;;  %s69_s25 = int_to_ptr.hbm [resolvable:$true] %s68_s25 }
   0x6   :  { %43 = dma.hbm_to_vmem [thread:$0]  %s39_s20, 16, %s41_s22, [#allocation3]  }
   0x7   :  { %s79_s27 = sshll.u32 %s3936_s12, 4  ;;  %s2165_s28 = smov [#allocation6]   ;;  %s80_s27 = int_to_ptr.hbm [resolvable:$true] %s79_s27 }
   0x8   :  { %s70_s29 = sshll.u32 %s2165_s28, 4  ;;  %s2166_s5 = smov [#allocation7]   ;;  %s71_s29 = int_to_ptr.vmem [resolvable:$true] %s70_s29 }
   0x9   :  { %73 = dma.hbm_to_vmem [thread:$0]  %s69_s25, 16, %s71_s29, [#allocation5]  }
   0xa   :  { %s81_s30 = sshll.u32 %s2166_s5, 4  ;;  %s82_s30 = int_to_ptr.vmem [resolvable:$true] %s81_s30 }
   0xb   :  { %84 = dma.hbm_to_vmem [thread:$0]  %s80_s27, 16, %s82_s30, [#allocation8]  }
   0xc   :  { %2157 = dma.done.wait [#allocation3], 16  }
   0xd   :  { %2158 = vsyncadd [#allocation3], 4294967280 }
   0xe   :  { %2159 = dma.done.wait [#allocation5], 32  }
   0xf   :  { %2160 = vsyncadd [#allocation5], 4294967264 }
  0x10   :  { %2161 = dma.done.wait [#allocation8], 16  }
  0x11   :  { %2162 = vsyncadd [#allocation8], 4294967280  ;;  %vm291_vm0 = vcmask 1044480   ;;  %vm287_vm1 = vcmask 80896   ;;  %v1952_v0 = vld [vmem:[%s3925_s1] sm:$0xf] }
  0x12   :  { %v2041_v1 = vld [vmem:[%s3925_s1 + $0x18] sm:$0x10]  ;;  %v2038_v2 = vld [vmem:[%s3925_s1 + $0x4] sm:$0xf]  ;;  %v1954_v4 = vld [vmem:[%s3925_s1 + $0x1c] sm:$0x10] }
  0x13   :  { %v1953_v3 = vor.u32 %v2041_v1, %v1952_v0  ;;  %v1960_v5 = vld [vmem:[%s3925_s1 + $0x8] sm:$0xf]  ;;  %v2042_v6 = vld [vmem:[%s3925_s1 + $0x20] sm:$0x10]  ;;  %v1957_v7 = vor.u32 %v2038_v2, %v1954_v4  ;;  %v2039_v9 = vld [vmem:[%s3925_s1 + $0xc] sm:$0xf] }
  0x14   :  { %v1961_v8 = vor.u32 %v2042_v6, %v1960_v5  ;;  %v1962_v10 = vld [vmem:[%s3925_s1 + $0x24] sm:$0x10]  ;;  %v2282_v11 = vld [vmem:[%s3924_s0] sm:$0x1]  ;;  %v1968_v14 = vld [vmem:[%s3925_s1 + $0x10] sm:$0xf] }
  0x15   :  { %v293_v12 = vsel %vm291_vm0, %v1953_v3, 0  ;;  %v1965_v13 = vor.u32 %v2039_v9, %v1962_v10  ;;  %v2043_v15 = vld [vmem:[%s3925_s1 + $0x28] sm:$0x10]  ;;  %v2294_v16 = vld [vmem:[%s3927_s3 + $0x78] sm:$0xff]  ;;  %v296_v17 = vsel %vm291_vm0, %v1957_v7, 0  ;;  %v2329_v31 = vld [vmem:[%s3927_s3 + $0x70] sm:$0xff] }
  0x16   :  { %320 = vmatpush.bf16.msra.mxu0 %v293_v12  ;;  %v299_v18 = vsel %vm291_vm0, %v1961_v8, 0  ;;  %v1969_v19 = vor.u32 %v2043_v15, %v1968_v14  ;;  %v1976_v20 = vld [vmem:[%s3925_s1 + $0x18] sm:$0xf]  ;;  %v2044_v21 = vld [vmem:[%s3925_s1 + $0x30] sm:$0x10]  ;;  %333 = vmatpush.bf16.msra.mxu1 %v296_v17  ;;  %v2346_v34 = vld [vmem:[%s3927_s3 + $0x68] sm:$0xff] }
  0x17   :  { %346 = vmatpush.bf16.msra.mxu2 %v299_v18  ;;  %v302_v22 = vsel %vm291_vm0, %v1965_v13, 0  ;;  %v1977_v23 = vor.u32 %v2044_v21, %v1976_v20  ;;  %v2040_v24 = vld [vmem:[%s3925_s1 + $0x14] sm:$0xf]  ;;  %v1970_v25 = vld [vmem:[%s3925_s1 + $0x2c] sm:$0x10]  ;;  %v2324_v30 = vld [vmem:[%s3927_s3 + $0xf8] sm:$0xff] }
  0x18   :  { %359 = vmatpush.bf16.msra.mxu3 %v302_v22  ;;  %v305_v26 = vsel %vm291_vm0, %v1969_v19, 0  ;;  %v1973_v27 = vor.u32 %v2040_v24, %v1970_v25  ;;  %v2336_v32 = vld [vmem:[%s3927_s3 + $0x1f8] sm:$0xff]  ;;  %v2341_v33 = vld [vmem:[%s3927_s3 + $0xf0] sm:$0xff]  ;;  %v2358_v36 = vld [vmem:[%s3927_s3 + $0xe8] sm:$0xff]  ;;  %vm404_vm2 = vcmask 1041408   ;;  %vm447_vm3 = vcmask 779264  }
  0x19   :  { %1978 = vmatmul.msk.bf16.vlgmr.msra.gmra.mxu0 %vm287_vm1, %v2282_v11  ;;  %v311_v28 = vsel %vm291_vm0, %v1977_v23, 0  ;;  %1979 = vmatmul.msk.bf16.vlgmr.msra.gmra.mxu1 %vm287_vm1, %v2282_v11  ;;  %v2353_v35 = vld [vmem:[%s3927_s3 + $0x1f0] sm:$0xff]  ;;  %v2363_v37 = vld [vmem:[%s3927_s3 + $0x60] sm:$0xff]  ;;  %v2369_v38 = vld [vmem:[%s3927_s3 + $0x178] sm:$0xff]  ;;  %vm511_vm4 = vcmask 785408   ;;  %vm823_vm9 = vcmask 195584  }
  0x1a   :  { %1980 = vmatmul.msk.bf16.vlgmr.msra.gmra.mxu2 %vm287_vm1, %v2282_v11  ;;  %v308_v29 = vsel %vm291_vm0, %v1973_v27, 0  ;;  %372 = vmatpush.bf16.msrb.mxu0 %v305_v26  ;;  %v2376_v39 = vld [vmem:[%s3927_s3 + $0x1e8] sm:$0xff]  ;;  %v2381_v40 = vld [vmem:[%s3927_s3 + $0x170] sm:$0xff]  ;;  %v2386_v41 = vld [vmem:[%s3927_s3 + $0xe0] sm:$0xff]  ;;  %vm1310_vm10 = vcmask 130048   ;;  %vm1160_vm11 = vcmask 1040384  }
  0x1b   :  { %1981 = vmatmul.msk.bf16.vlgmr.msra.gmra.mxu3 %vm287_vm1, %v2282_v11  ;;  %398 = vmatpush.bf16.msrb.mxu2 %v311_v28  ;;  %v2391_v42 = vld [vmem:[%s3927_s3 + $0x58] sm:$0xff]  ;;  %v2400_v43 = vld [vmem:[%s3927_s3 + $0x1e0] sm:$0xff]  ;;  %v2405_v44 = vld [vmem:[%s3927_s3 + $0x168] sm:$0xff]  ;;  %vm1182_vm12 = vcmask 1041409   ;;  %vm1164_vm13 = vcmask 1042434   ;;  %vm1169_vm15 = vcmask 1044484  }
  0x1c   :  { %515 = vmatpush.msrb.mxu3 %v2294_v16  ;;  %385 = vmatpush.bf16.msrb.mxu1 %v308_v29  ;;  %v2410_v45 = vld [vmem:[%s3927_s3 + $0xd8] sm:$0xff]  ;;  %v2415_v46 = vld [vmem:[%s3927_s3 + $0x50] sm:$0xff]  ;;  %v2429_v48 = vld [vmem:[%s3927_s3 + $0x160] sm:$0xff]  ;;  %vm1173_vm0 = vcmask 1046534  }
  0x1d   :  { %v2424_v47 = vld [vmem:[%s3927_s3 + $0x1d8] sm:$0xff]  ;;  %v2434_v49 = vld [vmem:[%s3927_s3 + $0xd0] sm:$0xff]  ;;  %v2439_v50 = vld [vmem:[%s3927_s3 + $0x48] sm:$0xff] }
  0x1e   :  { %535 = vmatpush.msra.mxu0 %v2324_v30  ;;  %516 = vmatpush.msrb.mxu3 %v2329_v31  ;;  %v2448_v51 = vld [vmem:[%s3927_s3 + $0x1d0] sm:$0xff]  ;;  %v2453_v52 = vld [vmem:[%s3927_s3 + $0x158] sm:$0xff]  ;;  %v2458_v53 = vld [vmem:[%s3927_s3 + $0x40] sm:$0xff] }
  0x1f   :  { %575 = vmatpush.msra.mxu2 %v2336_v32  ;;  %v2467_v54 = vld [vmem:[%s3927_s3 + $0xc8] sm:$0xff]  ;;  %v2472_v55 = vld [vmem:[%s3927_s3 + $0x38] sm:$0xff]  ;;  %v2487_v57 = vld [vmem:[%s3927_s3 + $0x150] sm:$0xff] }
  0x20   :  { %536 = vmatpush.msra.mxu0 %v2341_v33  ;;  %517 = vmatpush.msrb.mxu3 %v2346_v34  ;;  %v2482_v56 = vld [vmem:[%s3927_s3 + $0x1c8] sm:$0xff]  ;;  %v2496_v58 = vld [vmem:[%s3927_s3 + $0xc0] sm:$0xff]  ;;  %v2501_v59 = vld [vmem:[%s3927_s3 + $0x30] sm:$0xff] }
  0x21   :  { %576 = vmatpush.msra.mxu2 %v2353_v35  ;;  %555 = vmatpush.msra.mxu1 %v2369_v38  ;;  %v2508_v60 = vld [vmem:[%s3927_s3 + $0x1c0] sm:$0xff]  ;;  %v2513_v61 = vld [vmem:[%s3927_s3 + $0x148] sm:$0xff]  ;;  %v2518_v62 = vld [vmem:[%s3927_s3 + $0xb8] sm:$0xff] }
  0x22   :  { %537 = vmatpush.msra.mxu0 %v2358_v36  ;;  %518 = vmatpush.msrb.mxu3 %v2363_v37  ;;  %v2524_v63 = vld [vmem:[%s3927_s3 + $0x28] sm:$0xff]  ;;  %v2532_v0 = vld [vmem:[%s3927_s3 + $0x1b8] sm:$0xff]  ;;  %v2537_v1 = vld [vmem:[%s3927_s3 + $0x140] sm:$0xff] }
  0x23   :  { %577 = vmatpush.msra.mxu2 %v2376_v39  ;;  %556 = vmatpush.msra.mxu1 %v2381_v40  ;;  %v2542_v2 = vld [vmem:[%s3927_s3 + $0xb0] sm:$0xff]  ;;  %v2548_v3 = vld [vmem:[%s3927_s3 + $0x20] sm:$0xff]  ;;  %v2561_v5 = vld [vmem:[%s3927_s3 + $0x138] sm:$0xff] }
  0x24   :  { %538 = vmatpush.msra.mxu0 %v2386_v41  ;;  %519 = vmatpush.msrb.mxu3 %v2391_v42  ;;  %v2556_v4 = vld [vmem:[%s3927_s3 + $0x1b0] sm:$0xff]  ;;  %4000 = vst [vmem:[#allocation12_spill] sm:$0xff] %v2561_v5  ;;  %v2566_v6 = vld [vmem:[%s3927_s3 + $0xa8] sm:$0xff]  ;;  %v2572_v7 = vld [vmem:[%s3927_s3 + $0x18] sm:$0xff] }
  0x25   :  { %578 = vmatpush.msra.mxu2 %v2400_v43  ;;  %557 = vmatpush.msra.mxu1 %v2405_v44  ;;  %v2580_v8 = vld [vmem:[%s3927_s3 + $0x1a8] sm:$0xff]  ;;  %v2585_v9 = vld [vmem:[%s3927_s3 + $0x130] sm:$0xff]  ;;  %v2590_v10 = vld [vmem:[%s3927_s3 + $0xa0] sm:$0xff] }
  0x26   :  { %539 = vmatpush.msra.mxu0 %v2410_v45  ;;  %520 = vmatpush.msrb.mxu3 %v2415_v46  ;;  %4001 = vst [vmem:[#allocation13_spill] sm:$0xff] %v2580_v8  ;;  %v2604_v12 = vld [vmem:[%s3927_s3 + $0x1a0] sm:$0xff]  ;;  %v2609_v13 = vld [vmem:[%s3927_s3 + $0x128] sm:$0xff]  ;;  %v2614_v14 = vld [vmem:[%s3927_s3 + $0x98] sm:$0xff] }
  0x27   :  { %579 = vmatpush.msra.mxu2 %v2424_v47  ;;  %558 = vmatpush.msra.mxu1 %v2429_v48  ;;  %4002 = vst [vmem:[#allocation14_spill] sm:$0xff] %v2585_v9  ;;  %v2620_v15 = vld [vmem:[%s3927_s3 + $0x8] sm:$0xff]  ;;  %v2628_v17 = vld [vmem:[%s3927_s3 + $0x198] sm:$0xff]  ;;  %v2633_v18 = vld [vmem:[%s3927_s3 + $0x120] sm:$0xff] }
  0x28   :  { %540 = vmatpush.msra.mxu0 %v2434_v49  ;;  %521 = vmatpush.msrb.mxu3 %v2439_v50  ;;  %4003 = vst [vmem:[#allocation15_spill] sm:$0xff] %v2590_v10  ;;  %v2638_v19 = vld [vmem:[%s3927_s3 + $0x90] sm:$0xff]  ;;  %v2644_v20 = vld [vmem:[%s3927_s3] sm:$0xff]  ;;  %v2652_v21 = vld [vmem:[%s3927_s3 + $0x278] sm:$0xff] }
  0x29   :  { %580 = vmatpush.msra.mxu2 %v2448_v51  ;;  %559 = vmatpush.msra.mxu1 %v2453_v52  ;;  %4004 = vst [vmem:[#allocation16_spill] sm:$0xff] %v2604_v12  ;;  %v2657_v22 = vld [vmem:[%s3927_s3 + $0x190] sm:$0xff]  ;;  %v2662_v23 = vld [vmem:[%s3927_s3 + $0x88] sm:$0xff]  ;;  %v2669_v24 = vld [vmem:[%s3927_s3 + $0x118] sm:$0xff] }
  0x2a   :  { %1982 = vmatmul.msk.bf16.vlgmr.msrb.gmra.mxu0 %vm287_vm1, %v2282_v11  ;;  %522 = vmatpush.msrb.mxu3 %v2458_v53  ;;  %4005 = vst [vmem:[#allocation17_spill] sm:$0xff] %v2609_v13  ;;  %v2676_v25 = vld [vmem:[%s3927_s3 + $0x270] sm:$0xff]  ;;  %v2681_v26 = vld [vmem:[%s3927_s3 + $0x188] sm:$0xff]  ;;  %v2686_v27 = vld [vmem:[%s3927_s3 + $0x80] sm:$0xff] }
  0x2b   :  { %1984 = vmatmul.msk.bf16.vlgmr.msrb.gmra.mxu2 %vm287_vm1, %v2282_v11  ;;  %1983 = vmatmul.msk.bf16.vlgmr.msrb.gmra.mxu1 %vm287_vm1, %v2282_v11  ;;  %v2596_v11 = vld [vmem:[%s3927_s3 + $0x10] sm:$0xff]  ;;  %4006 = vst [vmem:[#allocation18_spill] sm:$0xff] %v2614_v14  ;;  %v2699_v29 = vld [vmem:[%s3927_s3 + $0x2f8] sm:$0xff]  ;;  %vm3775_vm14 = vmor %vm1182_vm12, %vm1160_vm11 }
  0x2c   :  { %541 = vmatpush.msra.mxu0 %v2467_v54  ;;  %523 = vmatpush.msrb.mxu3 %v2472_v55  ;;  %4007 = vst [vmem:[#allocation19_spill] sm:$0xff] %v2628_v17  ;;  %v2693_v28 = vld [vmem:[%s3927_s3 + $0x110] sm:$0xff]  ;;  %vm3788_vm1 = vmor %vm1164_vm13, %vm3775_vm14 }
  0x2d   :  { %581 = vmatpush.msra.mxu2 %v2482_v56  ;;  %560 = vmatpush.msra.mxu1 %v2487_v57  ;;  %4008 = vst [vmem:[#allocation20_spill] sm:$0xff] %v2633_v18 }
  0x2e   :  { %542 = vmatpush.msra.mxu0 %v2496_v58  ;;  %524 = vmatpush.msrb.mxu3 %v2501_v59  ;;  %4009 = vst [vmem:[#allocation21_spill] sm:$0xff] %v2638_v19 }
  0x2f   :  { %582 = vmatpush.msra.mxu2 %v2508_v60  ;;  %561 = vmatpush.msra.mxu1 %v2513_v61  ;;  %4010 = vst [vmem:[#allocation22_spill] sm:$0xff] %v2657_v22 }
  0x30   :  { %543 = vmatpush.msra.mxu0 %v2518_v62  ;;  %525 = vmatpush.msrb.mxu3 %v2524_v63  ;;  %4011 = vst [vmem:[#allocation23_spill] sm:$0xff] %v2662_v23 }
  0x31   :  { %583 = vmatpush.msra.mxu2 %v2532_v0  ;;  %562 = vmatpush.msra.mxu1 %v2537_v1  ;;  %4012 = vst [vmem:[#allocation24_spill] sm:$0xff] %v2669_v24 }
  0x32   :  { %544 = vmatpush.msra.mxu0 %v2542_v2  ;;  %526 = vmatpush.msrb.mxu3 %v2548_v3  ;;  %4013 = vst [vmem:[#allocation25_spill] sm:$0xff] %v2681_v26 }
  0x33   :  { %584 = vmatpush.msra.mxu2 %v2556_v4  ;;  %563 = vmatpush.msra.mxu1 %v2561_v5  ;;  %4014 = vst [vmem:[#allocation26_spill] sm:$0xff] %v2686_v27 }
  0x34   :  { %545 = vmatpush.msra.mxu0 %v2566_v6  ;;  %527 = vmatpush.msrb.mxu3 %v2572_v7  ;;  %4015 = vst [vmem:[#allocation27_spill] sm:$0xff] %v2693_v28 }
  0x35   :  { %585 = vmatpush.msra.mxu2 %v2580_v8  ;;  %564 = vmatpush.msra.mxu1 %v2585_v9  ;;  %4016 = vst [vmem:[#allocation28_spill] sm:$0xff] %v2699_v29 }
  0x36   :  { %546 = vmatpush.msra.mxu0 %v2590_v10  ;;  %528 = vmatpush.msrb.mxu3 %v2596_v11 }
  0x37   :  { %586 = vmatpush.msra.mxu2 %v2604_v12  ;;  %565 = vmatpush.msra.mxu1 %v2609_v13  ;;  %v2741_v13 = vld [vmem:[%s3927_s3 + $0x2e8] sm:$0xff] }
  0x38   :  { %547 = vmatpush.msra.mxu0 %v2614_v14  ;;  %529 = vmatpush.msrb.mxu3 %v2620_v15  ;;  %4021 = vst [vmem:[#allocation33_spill] sm:$0xff] %v2741_v13 }
  0x39   :  { %587 = vmatpush.msra.mxu2 %v2628_v17  ;;  %566 = vmatpush.msra.mxu1 %v2633_v18  ;;  %v2704_v18 = vld [vmem:[%s3927_s3 + $0x268] sm:$0xff] }
  0x3a   :  { %548 = vmatpush.msra.mxu0 %v2638_v19  ;;  %530 = vmatpush.msrb.mxu3 %v2644_v20 }
  0x3b   :  { %588 = vmatpush.msra.mxu2 %v2657_v22  ;;  %567 = vmatpush.msra.mxu1 %v2669_v24  ;;  %v2717_v22 = vld [vmem:[%s3927_s3 + $0x108] sm:$0xff]  ;;  %v2723_v24 = vld [vmem:[%s3927_s3 + $0x2f0] sm:$0xff] }
  0x3c   :  { %595 = vmatpush.msra.mxu3 %v2652_v21  ;;  %549 = vmatpush.msra.mxu0 %v2662_v23  ;;  %v2712_v23 = vld [vmem:[%s3927_s3 + $0x180] sm:$0xff]  ;;  %4018 = vst [vmem:[#allocation30_spill] sm:$0xff] %v2717_v22 }
  0x3d   :  { %589 = vmatpush.msra.mxu2 %v2681_v26  ;;  %4017 = vst [vmem:[#allocation29_spill] sm:$0xff] %v2712_v23  ;;  %v2728_v26 = vld [vmem:[%s3927_s3 + $0x260] sm:$0xff]  ;;  %568 = vmatpush.msra.mxu1 %v2693_v28  ;;  %v2747_v28 = vld [vmem:[%s3927_s3 + $0x258] sm:$0xff] }
  0x3e   :  { %596 = vmatpush.msra.mxu3 %v2676_v25  ;;  %550 = vmatpush.msra.mxu0 %v2686_v27  ;;  %4019 = vst [vmem:[#allocation31_spill] sm:$0xff] %v2723_v24  ;;  %v2736_v27 = vld [vmem:[%s3927_s3 + $0x100] sm:$0xff] }
  0x3f   :  { %4020 = vst [vmem:[#allocation32_spill] sm:$0xff] %v2736_v27  ;;  %590 = vmatpush.msra.mxu2 %v2712_v23  ;;  %569 = vmatpush.msra.mxu1 %v2717_v22  ;;  %v2760_v23 = vld [vmem:[%s3927_s3 + $0x2e0] sm:$0xff]  ;;  %v2766_v22 = vld [vmem:[%s3927_s3 + $0x250] sm:$0xff] }
  0x40   :  { %615 = vmatpush.msrb.mxu0 %v2699_v29  ;;  %597 = vmatpush.msra.mxu3 %v2704_v18  ;;  %v2755_v29 = vld [vmem:[%s3927_s3 + $0x358] sm:$0xff]  ;;  %4023 = vst [vmem:[#allocation35_spill] sm:$0xff] %v2760_v23 }
  0x41   :  { %4022 = vst [vmem:[#allocation34_spill] sm:$0xff] %v2755_v29  ;;  %658 = vmatpush.msrb.mxu2 %v2294_v16  ;;  %570 = vmatpush.msra.mxu1 %v2736_v27  ;;  %v2780_v16 = vld [vmem:[%s3927_s3 + $0x248] sm:$0xff]  ;;  %v2788_v27 = vld [vmem:[%s3927_s3 + $0x2d0] sm:$0xff] }
  0x42   :  { %616 = vmatpush.msrb.mxu0 %v2723_v24  ;;  %598 = vmatpush.msra.mxu3 %v2728_v26  ;;  %v2774_v24 = vld [vmem:[%s3927_s3 + $0x2d8] sm:$0xff]  ;;  %4025 = vst [vmem:[#allocation37_spill] sm:$0xff] %v2788_v27 }
  0x43   :  { %4024 = vst [vmem:[#allocation36_spill] sm:$0xff] %v2774_v24  ;;  %659 = vmatpush.msrb.mxu2 %v2329_v31  ;;  %639 = vmatpush.msrb.mxu1 %v2755_v29  ;;  %v2794_v31 = vld [vmem:[%s3927_s3 + $0x240] sm:$0xff]  ;;  %v2801_v29 = vld [vmem:[%s3927_s3 + $0x2c8] sm:$0xff] }
  0x44   :  { %617 = vmatpush.msrb.mxu0 %v2741_v13  ;;  %599 = vmatpush.msra.mxu3 %v2747_v28  ;;  %4026 = vst [vmem:[#allocation38_spill] sm:$0xff] %v2794_v31 }
  0x45   :  { %660 = vmatpush.msrb.mxu2 %v2346_v34  ;;  %4027 = vst [vmem:[#allocation39_spill] sm:$0xff] %v2801_v29  ;;  %v2809_v34 = vld [vmem:[%s3927_s3 + $0x2c0] sm:$0xff] }
  0x46   :  { %618 = vmatpush.msrb.mxu0 %v2760_v23  ;;  %600 = vmatpush.msra.mxu3 %v2766_v22  ;;  %4028 = vst [vmem:[#allocation40_spill] sm:$0xff] %v2809_v34 }
  0x47   :  { %661 = vmatpush.msrb.mxu2 %v2363_v37  ;;  %v2828_v37 = vld [vmem:[%s3927_s3 + $0x238] sm:$0xff] }
  0x48   :  { %619 = vmatpush.msrb.mxu0 %v2774_v24  ;;  %601 = vmatpush.msra.mxu3 %v2780_v16  ;;  %4029 = vst [vmem:[#allocation41_spill] sm:$0xff] %v2828_v37 }
  0x49   :  { %662 = vmatpush.msrb.mxu2 %v2391_v42  ;;  %v2833_v42 = vld [vmem:[%s3927_s3 + $0x2b8] sm:$0xff] }
  0x4a   :  { %620 = vmatpush.msrb.mxu0 %v2788_v27  ;;  %602 = vmatpush.msra.mxu3 %v2794_v31  ;;  %4030 = vst [vmem:[#allocation42_spill] sm:$0xff] %v2833_v42 }
  0x4b   :  { %663 = vmatpush.msrb.mxu2 %v2415_v46  ;;  %v2838_v46 = vld [vmem:[%s3927_s3 + $0x350] sm:$0xff] }
  0x4c   :  { %621 = vmatpush.msrb.mxu0 %v2801_v29  ;;  %4031 = vst [vmem:[#allocation43_spill] sm:$0xff] %v2838_v46  ;;  %603 = vmatpush.msra.mxu3 %v2828_v37 }
  0x4d   :  { %664 = vmatpush.msrb.mxu2 %v2439_v50  ;;  %640 = vmatpush.msrb.mxu1 %v2838_v46  ;;  %v2846_v50 = vld [vmem:[%s3927_s3 + $0x230] sm:$0xff] }
  0x4e   :  { %622 = vmatpush.msrb.mxu0 %v2809_v34  ;;  %4032 = vst [vmem:[#allocation44_spill] sm:$0xff] %v2846_v50  ;;  %604 = vmatpush.msra.mxu3 %v2846_v50  ;;  %v2946_v34 = vld [vmem:[%s3927_s3 + $0x320] sm:$0xff] }
  0x4f   :  { %665 = vmatpush.msrb.mxu2 %v2458_v53  ;;  %v2851_v53 = vld [vmem:[%s3927_s3 + $0x2b0] sm:$0xff]  ;;  %4049 = vst [vmem:[#allocation61_spill] sm:$0xff] %v2946_v34 }
  0x50   :  { %623 = vmatpush.msrb.mxu0 %v2833_v42  ;;  %4033 = vst [vmem:[#allocation45_spill] sm:$0xff] %v2851_v53  ;;  %v2923_v42 = vld [vmem:[%s3927_s3 + $0x290] sm:$0xff] }
  0x51   :  { %666 = vmatpush.msrb.mxu2 %v2472_v55  ;;  %v2856_v55 = vld [vmem:[%s3927_s3 + $0x348] sm:$0xff]  ;;  %4045 = vst [vmem:[#allocation57_spill] sm:$0xff] %v2923_v42 }
  0x52   :  { %4034 = vst [vmem:[#allocation46_spill] sm:$0xff] %v2856_v55  ;;  %624 = vmatpush.msrb.mxu0 %v2851_v53  ;;  %641 = vmatpush.msrb.mxu1 %v2856_v55  ;;  %v2910_v53 = vld [vmem:[%s3927_s3 + $0x330] sm:$0xff] }
  0x53   :  { %667 = vmatpush.msrb.mxu2 %v2501_v59  ;;  %v2864_v59 = vld [vmem:[%s3927_s3 + $0x228] sm:$0xff]  ;;  %4043 = vst [vmem:[#allocation55_spill] sm:$0xff] %v2910_v53 }
  0x54   :  { %4035 = vst [vmem:[#allocation47_spill] sm:$0xff] %v2864_v59  ;;  %605 = vmatpush.msra.mxu3 %v2864_v59 }
  0x55   :  { %668 = vmatpush.msrb.mxu2 %v2524_v63  ;;  %v2869_v63 = vld [vmem:[%s3927_s3 + $0x2a8] sm:$0xff] }
  0x56   :  { %4036 = vst [vmem:[#allocation48_spill] sm:$0xff] %v2869_v63  ;;  %625 = vmatpush.msrb.mxu0 %v2869_v63  ;;  %v2905_v63 = vld [vmem:[%s3927_s3 + $0x298] sm:$0xff] }
  0x57   :  { %669 = vmatpush.msrb.mxu2 %v2548_v3  ;;  %v2874_v3 = vld [vmem:[%s3927_s3 + $0x340] sm:$0xff]  ;;  %4042 = vst [vmem:[#allocation54_spill] sm:$0xff] %v2905_v63 }
  0x58   :  { %4037 = vst [vmem:[#allocation49_spill] sm:$0xff] %v2874_v3  ;;  %642 = vmatpush.msrb.mxu1 %v2874_v3  ;;  %v2964_v3 = vld [vmem:[%s3927_s3 + $0x318] sm:$0xff] }
  0x59   :  { %670 = vmatpush.msrb.mxu2 %v2572_v7  ;;  %v2882_v7 = vld [vmem:[%s3927_s3 + $0x220] sm:$0xff]  ;;  %4052 = vst [vmem:[#allocation64_spill] sm:$0xff] %v2964_v3 }
  0x5a   :  { %4038 = vst [vmem:[#allocation50_spill] sm:$0xff] %v2882_v7  ;;  %606 = vmatpush.msra.mxu3 %v2882_v7 }
  0x5b   :  { %671 = vmatpush.msrb.mxu2 %v2596_v11  ;;  %v2887_v11 = vld [vmem:[%s3927_s3 + $0x2a0] sm:$0xff] }
  0x5c   :  { %4039 = vst [vmem:[#allocation51_spill] sm:$0xff] %v2887_v11  ;;  %626 = vmatpush.msrb.mxu0 %v2887_v11  ;;  %v2918_v11 = vld [vmem:[%s3927_s3 + $0x210] sm:$0xff] }
  0x5d   :  { %672 = vmatpush.msrb.mxu2 %v2620_v15  ;;  %v2892_v15 = vld [vmem:[%s3927_s3 + $0x338] sm:$0xff]  ;;  %4044 = vst [vmem:[#allocation56_spill] sm:$0xff] %v2918_v11 }
  0x5e   :  { %4040 = vst [vmem:[#allocation52_spill] sm:$0xff] %v2892_v15  ;;  %643 = vmatpush.msrb.mxu1 %v2892_v15  ;;  %627 = vmatpush.msrb.mxu0 %v2905_v63  ;;  %v2928_v15 = vld [vmem:[%s3927_s3 + $0x328] sm:$0xff] }
  0x5f   :  { %673 = vmatpush.msrb.mxu2 %v2644_v20  ;;  %v2900_v20 = vld [vmem:[%s3927_s3 + $0x218] sm:$0xff]  ;;  %4046 = vst [vmem:[#allocation58_spill] sm:$0xff] %v2928_v15  ;;  %v2936_v63 = vld [vmem:[%s3927_s3 + $0x208] sm:$0xff] }
  0x60   :  { %4041 = vst [vmem:[#allocation53_spill] sm:$0xff] %v2900_v20  ;;  %607 = vmatpush.msra.mxu3 %v2900_v20  ;;  %644 = vmatpush.msrb.mxu1 %v2910_v53  ;;  %v2941_v53 = vld [vmem:[%s3927_s3 + $0x288] sm:$0xff] }
  0x61   :  { %628 = vmatpush.msrb.mxu0 %v2923_v42  ;;  %4047 = vst [vmem:[#allocation59_spill] sm:$0xff] %v2936_v63  ;;  %v2954_v42 = vld [vmem:[%s3927_s3 + $0x200] sm:$0xff] }
  0x62   :  { %608 = vmatpush.msra.mxu3 %v2918_v11  ;;  %645 = vmatpush.msrb.mxu1 %v2928_v15  ;;  %4048 = vst [vmem:[#allocation60_spill] sm:$0xff] %v2941_v53  ;;  %v2959_v15 = vld [vmem:[%s3927_s3 + $0x280] sm:$0xff] }
  0x63   :  { %629 = vmatpush.msrb.mxu0 %v2941_v53  ;;  %4050 = vst [vmem:[#allocation62_spill] sm:$0xff] %v2954_v42  ;;  %v2972_v53 = vld [vmem:[%s3927_s3 + $0x310] sm:$0xff] }
  0x64   :  { %609 = vmatpush.msra.mxu3 %v2936_v63  ;;  %646 = vmatpush.msrb.mxu1 %v2946_v34  ;;  %4051 = vst [vmem:[#allocation63_spill] sm:$0xff] %v2959_v15  ;;  %v2978_v34 = vld [vmem:[%s3927_s3 + $0x308] sm:$0xff] }
  0x65   :  { %630 = vmatpush.msrb.mxu0 %v2959_v15  ;;  %4053 = vst [vmem:[#allocation65_spill] sm:$0xff] %v2972_v53  ;;  %v2984_v15 = vld [vmem:[%s3927_s3 + $0x300] sm:$0xff] }
  0x66   :  { %610 = vmatpush.msra.mxu3 %v2954_v42  ;;  %647 = vmatpush.msrb.mxu1 %v2964_v3  ;;  %4054 = vst [vmem:[#allocation66_spill] sm:$0xff] %v2978_v34  ;;  %v2990_v3 = vld [vmem:[%s3926_s2] sm:$0x7f] }
  0x67   :  { %4055 = vst [vmem:[#allocation67_spill] sm:$0xff] %v2984_v15  ;;  %v245_v29 = vperm.slane %v2990_v3, 1  ;;  %v246_v13 = vperm.slane %v2990_v3, 2  ;;  %v247_v11 = vperm.slane %v2990_v3, 3 }
  0x68   :  { %648 = vmatpush.msrb.mxu1 %v2972_v53  ;;  %v244_v53 = vperm.slane %v2990_v3, 0 }
  0x6a   :  { %649 = vmatpush.msrb.mxu1 %v2978_v34 }
  0x6c   :  { %650 = vmatpush.msrb.mxu1 %v2984_v15 }
  0x96   :  { %v322_v55 = vpop.f32.mrf.mxu0  ;;  %v335_v34 = vpop.f32.mrf.mxu1 }
  0x97   :  { %v2994_v27 = vadd.f32 %v322_v55, %v244_v53  ;;  %v2996_v46 = vadd.f32 %v335_v34, %v245_v29 }
  0x99   :  { %4056 = vst [vmem:[#allocation68_spill] sm:$0xff] %v2994_v27  ;;  %v405_v24 = vsel %vm404_vm2, %v2994_v27, 0.0  ;;  %v455_v15 = vmul.f32 %v2994_v27, %v2994_v27  ;;  %v412_v42 = vsel %vm404_vm2, %v2996_v46, 0.0 }
  0x9a   :  { %v406_v23 = vrot.slane %v405_v24, 4  ;;  %v413_v63 = vrot.slane %v412_v42, 4 }
  0x9b   :  { %v462_v55 = vsel %vm404_vm2, %v455_v15, 0.0 }
  0x9c   :  { %v407_v53 = vadd.f32 %v406_v23, %v405_v24  ;;  %v414_v29 = vadd.f32 %v413_v63, %v412_v42  ;;  %v463_v9 = vrot.slane %v462_v55, 4 }
  0x9d   :  { %v348_v34 = vpop.f32.mrf.mxu2 }
  0x9e   :  { %v3007_v20 = vadd.f32 %v348_v34, %v246_v13  ;;  %v361_v7 = vpop.f32.mrf.mxu3  ;;  %v324_v59 = vpop.f32.mrf.mxu0  ;;  %v408_v19 = vrot.slane %v407_v53, 2  ;;  %v415_v27 = vrot.slane %v414_v29, 2  ;;  %v464_v34 = vadd.f32 %v463_v9, %v462_v55 }
  0x9f   :  { %v3009_v50 = vadd.f32 %v361_v7, %v247_v11  ;;  %v337_v17 = vpop.f32.mrf.mxu1  ;;  %v248_v59 = vperm.slane %v2990_v3, 4 }
  0xa0   :  { %v419_v14 = vsel %vm404_vm2, %v3007_v20, 0.0  ;;  %v409_v37 = vadd.f32 %v408_v19, %v407_v53  ;;  %v416_v12 = vadd.f32 %v415_v27, %v414_v29  ;;  %v249_v17 = vperm.slane %v2990_v3, 5 }
  0xa1   :  { %v420_v23 = vrot.slane %v419_v14, 4  ;;  %v426_v24 = vsel %vm404_vm2, %v3009_v50, 0.0 }
  0xa2   :  { %v427_v42 = vrot.slane %v426_v24, 4  ;;  %v410_v13 = vrot.slane %v409_v37, 1  ;;  %v417_v15 = vrot.slane %v416_v12, 1 }
  0xa3   :  { %v421_v63 = vadd.f32 %v420_v23, %v419_v14  ;;  %v465_v23 = vrot.slane %v464_v34, 2 }
  0xa4   :  { %v428_v7 = vadd.f32 %v427_v42, %v426_v24  ;;  %v411_v11 = vadd.f32 %v410_v13, %v409_v37  ;;  %v418_v31 = vadd.f32 %v417_v15, %v416_v12  ;;  %v456_v42 = vmul.f32 %v2996_v46, %v2996_v46 }
  0xa5   :  { %v422_v5 = vrot.slane %v421_v63, 2  ;;  %v350_v10 = vpop.f32.mrf.mxu2 }
  0xa6   :  { %v429_v19 = vrot.slane %v428_v7, 2  ;;  %531 = vmatmul.f32.vlgmr.msrb.gmra.mxu3 %v411_v11  ;;  %v363_v53 = vpop.f32.mrf.mxu3  ;;  %551 = vmatmul.f32.vlgmr.msra.gmra.mxu0 %v418_v31  ;;  %v250_v31 = vperm.slane %v2990_v3, 6 }
  0xa7   :  { %v374_v27 = vpop.f32.mrf.mxu0  ;;  %v423_v29 = vadd.f32 %v422_v5, %v421_v63  ;;  %678 = vmatpush.msrb.mxu3 %v2324_v30  ;;  %718 = vmatpush.msra.mxu0 %v2336_v32  ;;  %v466_v63 = vadd.f32 %v465_v23, %v464_v34  ;;  %v469_v34 = vsel %vm404_vm2, %v456_v42, 0.0  ;;  %v4068_v42 = vld [vmem:[#allocation17_spill] sm:$0xff] }
  0xa8   :  { %v3017_v8 = vadd.f32 %v374_v27, %v248_v59  ;;  %v387_v14 = vpop.f32.mrf.mxu1  ;;  %v430_v9 = vadd.f32 %v429_v19, %v428_v7 }
  0xa9   :  { %v3021_v37 = vadd.f32 %v387_v14, %v249_v17  ;;  %679 = vmatpush.msrb.mxu3 %v2341_v33  ;;  %v424_v12 = vrot.slane %v423_v29, 1  ;;  %719 = vmatpush.msra.mxu0 %v2353_v35  ;;  %v458_v35 = vmul.f32 %v3009_v50, %v3009_v50  ;;  %v467_v17 = vrot.slane %v466_v63, 1 }
  0xaa   :  { %v433_v10 = vsel %vm404_vm2, %v3017_v8, 0.0  ;;  %v431_v5 = vrot.slane %v430_v9, 1 }
  0xab   :  { %v434_v55 = vrot.slane %v433_v10, 4  ;;  %v440_v30 = vsel %vm404_vm2, %v3021_v37, 0.0  ;;  %680 = vmatpush.msrb.mxu3 %v2358_v36  ;;  %v425_v32 = vadd.f32 %v424_v12, %v423_v29  ;;  %720 = vmatpush.msra.mxu0 %v2376_v39  ;;  %v4061_v12 = vld [vmem:[#allocation16_spill] sm:$0xff] }
  0xac   :  { %v441_v24 = vrot.slane %v440_v30, 4  ;;  %v432_v33 = vadd.f32 %v431_v5, %v430_v9  ;;  %v4064_v5 = vld [vmem:[#allocation14_spill] sm:$0xff] }
  0xad   :  { %v435_v13 = vadd.f32 %v434_v55, %v433_v10  ;;  %571 = vmatmul.f32.vlgmr.msra.gmra.mxu1 %v425_v32  ;;  %681 = vmatpush.msrb.mxu3 %v2386_v41  ;;  %v4059_v10 = vld [vmem:[#allocation15_spill] sm:$0xff]  ;;  %v4066_v32 = vld [vmem:[#allocation44_spill] sm:$0xff] }
  0xae   :  { %v442_v59 = vadd.f32 %v441_v24, %v440_v30  ;;  %v400_v3 = vpop.f32.mrf.mxu2  ;;  %591 = vmatmul.f32.vlgmr.msra.gmra.mxu2 %v432_v33  ;;  %698 = vmatpush.msra.mxu1 %v2369_v38  ;;  %v483_v38 = vsel %vm404_vm2, %v458_v35, 0.0  ;;  %v4065_v30 = vld [vmem:[#allocation19_spill] sm:$0xff]  ;;  %v4067_v24 = vld [vmem:[#allocation21_spill] sm:$0xff] }
  0xaf   :  { %v436_v36 = vrot.slane %v435_v13, 2  ;;  %v3038_v15 = vadd.f32 %v400_v3, %v250_v31  ;;  %v376_v7 = vpop.f32.mrf.mxu0  ;;  %721 = vmatpush.msra.mxu0 %v2400_v43  ;;  %738 = vmatpush.msra.mxu2 %v2652_v21  ;;  %v484_v53 = vrot.slane %v483_v38, 4  ;;  %v4070_v35 = vld [vmem:[#allocation47_spill] sm:$0xff]  ;;  %v4072_v3 = vld [vmem:[#allocation20_spill] sm:$0xff] }
  0xb0   :  { %v389_v39 = vpop.f32.mrf.mxu1  ;;  %682 = vmatpush.msrb.mxu3 %v2410_v45  ;;  %699 = vmatpush.msra.mxu1 %v2381_v40  ;;  %v443_v19 = vrot.slane %v442_v59, 2  ;;  %v470_v45 = vrot.slane %v469_v34, 4  ;;  %v457_v40 = vmul.f32 %v3007_v20, %v3007_v20  ;;  %v4073_v7 = vld [vmem:[#allocation25_spill] sm:$0xff] }
  0xb1   :  { %v437_v11 = vadd.f32 %v436_v36, %v435_v13  ;;  %v448_v41 = vsel %vm447_vm3, %v3038_v15, 0.0  ;;  %722 = vmatpush.msra.mxu0 %v2424_v47  ;;  %739 = vmatpush.msra.mxu2 %v2676_v25  ;;  %v459_v47 = vmul.f32 %v3017_v8, %v3017_v8  ;;  %v4074_v39 = vld [vmem:[#allocation50_spill] sm:$0xff] }
  0xb2   :  { %v449_v43 = vrot.slane %v448_v41, 4  ;;  %683 = vmatpush.msrb.mxu3 %v2434_v49  ;;  %700 = vmatpush.msra.mxu1 %v2405_v44  ;;  %v468_v49 = vadd.f32 %v467_v17, %v466_v63  ;;  %v444_v25 = vadd.f32 %v443_v19, %v442_v59  ;;  %v4069_v63 = vld [vmem:[#allocation22_spill] sm:$0xff]  ;;  %v4071_v59 = vld [vmem:[#allocation23_spill] sm:$0xff]  ;;  %v4077_v19 = vld [vmem:[#allocation29_spill] sm:$0xff] }
  0xb3   :  { %v438_v21 = vrot.slane %v437_v11, 1  ;;  %723 = vmatpush.msra.mxu0 %v2448_v51  ;;  %740 = vmatpush.msra.mxu2 %v2704_v18  ;;  %v476_v51 = vsel %vm404_vm2, %v457_v40, 0.0  ;;  %v490_v23 = vsel %vm404_vm2, %v459_v47, 0.0  ;;  %v4080_v40 = vld [vmem:[#allocation27_spill] sm:$0xff]  ;;  %v4081_v47 = vld [vmem:[#allocation56_spill] sm:$0xff] }
  0xb4   :  { %v450_v27 = vadd.f32 %v449_v43, %v448_v41  ;;  %684 = vmatpush.msrb.mxu3 %v2467_v54  ;;  %701 = vmatpush.msra.mxu1 %v2429_v48  ;;  %v471_v48 = vadd.f32 %v470_v45, %v469_v34  ;;  %v485_v54 = vadd.f32 %v484_v53, %v483_v38  ;;  %v4076_v41 = vld [vmem:[#allocation24_spill] sm:$0xff]  ;;  %v4078_v43 = vld [vmem:[#allocation53_spill] sm:$0xff] }
  0xb5   :  { %v439_v44 = vadd.f32 %v438_v21, %v437_v11  ;;  %724 = vmatpush.msra.mxu0 %v2482_v56  ;;  %741 = vmatpush.msra.mxu2 %v2728_v26  ;;  %v445_v56 = vrot.slane %v444_v25, 1  ;;  %v4075_v11 = vld [vmem:[#allocation26_spill] sm:$0xff]  ;;  %v4079_v45 = vld [vmem:[#allocation28_spill] sm:$0xff]  ;;  %v461_v53 = vmul.f32 %v3038_v15, %v3038_v15 }
  0xb6   :  { %v451_v29 = vrot.slane %v450_v27, 2  ;;  %v402_v14 = vpop.f32.mrf.mxu2  ;;  %674 = vmatmul.f32.vlgmr.msrb.gmra.mxu2 %v468_v49  ;;  %685 = vmatpush.msrb.mxu3 %v2496_v58  ;;  %v477_v58 = vrot.slane %v476_v51, 4  ;;  %v486_v9 = vrot.slane %v485_v54, 2  ;;  %v460_v49 = vmul.f32 %v3021_v37, %v3021_v37 }
  0xb7   :  { %702 = vmatpush.msra.mxu1 %v2453_v52  ;;  %725 = vmatpush.msra.mxu0 %v2508_v60  ;;  %v491_v52 = vrot.slane %v490_v23, 4  ;;  %v472_v60 = vrot.slane %v471_v48, 2 }
  0xb8   :  { %v452_v18 = vadd.f32 %v451_v29, %v450_v27  ;;  %742 = vmatpush.msra.mxu2 %v2747_v28  ;;  %611 = vmatmul.f32.vlgmr.msra.gmra.mxu3 %v439_v44  ;;  %v4082_v44 = vld [vmem:[#allocation31_spill] sm:$0xff] }
  0xb9   :  { %686 = vmatpush.msrb.mxu3 %v2518_v62  ;;  %703 = vmatpush.msra.mxu1 %v2487_v57  ;;  %v446_v57 = vadd.f32 %v445_v56, %v444_v25  ;;  %v478_v62 = vadd.f32 %v477_v58, %v476_v51  ;;  %v492_v28 = vadd.f32 %v491_v52, %v490_v23  ;;  %v4083_v25 = vld [vmem:[#allocation30_spill] sm:$0xff]  ;;  %v4084_v29 = vld [vmem:[#allocation59_spill] sm:$0xff]  ;;  %v4085_v51 = vld [vmem:[#allocation33_spill] sm:$0xff]  ;;  %v497_v56 = vsel %vm404_vm2, %v460_v49, 0.0 }
  0xba   :  { %726 = vmatpush.msra.mxu0 %v2532_v0  ;;  %743 = vmatpush.msra.mxu2 %v2766_v22  ;;  %v453_v26 = vrot.slane %v452_v18, 1  ;;  %v4057_v0 = vld [vmem:[#allocation13_spill] sm:$0xff]  ;;  %v4058_v22 = vld [vmem:[#allocation38_spill] sm:$0xff]  ;;  %v4088_v58 = vld [vmem:[#allocation35_spill] sm:$0xff] }
  0xbb   :  { %687 = vmatpush.msrb.mxu3 %v2542_v2  ;;  %704 = vmatpush.msra.mxu1 %v2513_v61  ;;  %v4060_v61 = vld [vmem:[#allocation12_spill] sm:$0xff]  ;;  %v479_v55 = vrot.slane %v478_v62, 2  ;;  %v493_v31 = vrot.slane %v492_v28, 2  ;;  %v4087_v23 = vld [vmem:[#allocation62_spill] sm:$0xff] }
  0xbc   :  { %727 = vmatpush.msra.mxu0 %v2556_v4  ;;  %744 = vmatpush.msra.mxu2 %v2780_v16  ;;  %v454_v2 = vadd.f32 %v453_v26, %v452_v18  ;;  %v4062_v4 = vld [vmem:[#allocation41_spill] sm:$0xff]  ;;  %v487_v16 = vadd.f32 %v486_v9, %v485_v54  ;;  %v4086_v18 = vld [vmem:[#allocation32_spill] sm:$0xff]  ;;  %v504_v54 = vsel %vm447_vm3, %v461_v53, 0.0  ;;  %v4089_v52 = vld [vmem:[#allocation34_spill] sm:$0xff]  ;;  %v498_v9 = vrot.slane %v497_v56, 4 }
  0xbd   :  { %688 = vmatpush.msrb.mxu3 %v2566_v6  ;;  %705 = vmatpush.msra.mxu1 %v2537_v1  ;;  %v473_v6 = vadd.f32 %v472_v60, %v471_v48  ;;  %v4063_v1 = vld [vmem:[#allocation18_spill] sm:$0xff]  ;;  %v480_v36 = vadd.f32 %v479_v55, %v478_v62  ;;  %v494_v34 = vadd.f32 %v493_v31, %v492_v28  ;;  %v505_v26 = vrot.slane %v504_v54, 4  ;;  %v4090_v60 = vld [vmem:[#allocation36_spill] sm:$0xff]  ;;  %v4092_v62 = vld [vmem:[#allocation37_spill] sm:$0xff] }
  0xbe   :  { %728 = vmatpush.msra.mxu0 %v4057_v0  ;;  %745 = vmatpush.msra.mxu2 %v4058_v22  ;;  %v488_v33 = vrot.slane %v487_v16, 1  ;;  %v4093_v0 = vld [vmem:[#allocation46_spill] sm:$0xff]  ;;  %v4094_v28 = vld [vmem:[#allocation39_spill] sm:$0xff]  ;;  %v4100_v55 = vld [vmem:[#allocation45_spill] sm:$0xff]  ;;  %vm1185_vm3 = vcmask 1043459  }
  0xbf   :  { %689 = vmatpush.msrb.mxu3 %v4059_v10  ;;  %706 = vmatpush.msra.mxu1 %v4060_v61  ;;  %v474_v13 = vrot.slane %v473_v6, 1  ;;  %v481_v21 = vrot.slane %v480_v36, 1  ;;  %v495_v27 = vrot.slane %v494_v34, 1  ;;  %v506_v22 = vadd.f32 %v505_v26, %v504_v54  ;;  %v4095_v10 = vld [vmem:[#allocation49_spill] sm:$0xff]  ;;  %v4096_v61 = vld [vmem:[#allocation40_spill] sm:$0xff] }
  0xc0   :  { %729 = vmatpush.msra.mxu0 %v4061_v12  ;;  %746 = vmatpush.msra.mxu2 %v4062_v4  ;;  %v489_v38 = vadd.f32 %v488_v33, %v487_v16  ;;  %v4097_v12 = vld [vmem:[#allocation52_spill] sm:$0xff] }
  0xc1   :  { %631 = vmatmul.f32.vlgmr.msrb.gmra.mxu0 %v446_v57  ;;  %690 = vmatpush.msrb.mxu3 %v4063_v1  ;;  %v475_v17 = vadd.f32 %v474_v13, %v473_v6  ;;  %v482_v14 = vadd.f32 %v481_v21, %v480_v36  ;;  %v496_v48 = vadd.f32 %v495_v27, %v494_v34  ;;  %v4091_v57 = vld [vmem:[#allocation43_spill] sm:$0xff]  ;;  %v507_v4 = vrot.slane %v506_v22, 2  ;;  %v4098_v6 = vld [vmem:[#allocation42_spill] sm:$0xff]  ;;  %v4102_v31 = vld [vmem:[#allocation48_spill] sm:$0xff] }
  0xc2   :  { %707 = vmatpush.msra.mxu1 %v4064_v5  ;;  %730 = vmatpush.msra.mxu0 %v4065_v30  ;;  %v4099_v1 = vld [vmem:[#allocation55_spill] sm:$0xff]  ;;  %v4101_v5 = vld [vmem:[#allocation58_spill] sm:$0xff]  ;;  %v4105_v13 = vld [vmem:[#allocation64_spill] sm:$0xff] }
  0xc3   :  { %747 = vmatpush.msra.mxu2 %v4066_v32  ;;  %1985 = vmatmul.msk.f32.vlgmr.msrb.gmra.mxu1 %vm511_vm4, %v454_v2  ;;  %v499_v2 = vadd.f32 %v498_v9, %v497_v56  ;;  %v508_v30 = vadd.f32 %v507_v4, %v506_v22  ;;  %v4103_v32 = vld [vmem:[#allocation61_spill] sm:$0xff]  ;;  %v4109_v36 = vld [vmem:[#allocation66_spill] sm:$0xff]  ;;  %v4111_v34 = vld [vmem:[#allocation67_spill] sm:$0xff] }
  0xc4   :  { %691 = vmatpush.msrb.mxu3 %v4067_v24  ;;  %708 = vmatpush.msra.mxu1 %v4068_v42  ;;  %v4104_v42 = vld [vmem:[#allocation51_spill] sm:$0xff]  ;;  %v234_v9 = vld [vmem:[%s3928_s4 + $0x70] sm:$0xff]  ;;  %v3182_v4 = vld [vmem:[%s3928_s4 + $0x28] sm:$0xff] }
  0xc5   :  { %731 = vmatpush.msra.mxu0 %v4069_v63  ;;  %748 = vmatpush.msra.mxu2 %v4070_v35  ;;  %v500_v16 = vrot.slane %v499_v2, 2  ;;  %v509_v33 = vrot.slane %v508_v30, 1  ;;  %v4106_v63 = vld [vmem:[#allocation54_spill] sm:$0xff]  ;;  %v4107_v35 = vld [vmem:[#allocation65_spill] sm:$0xff]  ;;  %v3159_v22 = vld [vmem:[%s3928_s4 + $0x40] sm:$0xff] }
  0xc6   :  { %692 = vmatpush.msrb.mxu3 %v4071_v59  ;;  %709 = vmatpush.msra.mxu1 %v4072_v3  ;;  %v4108_v3 = vld [vmem:[#allocation57_spill] sm:$0xff] }
  0xc7   :  { %732 = vmatpush.msra.mxu0 %v4073_v7  ;;  %749 = vmatpush.msra.mxu2 %v4074_v39  ;;  %v501_v24 = vadd.f32 %v500_v16, %v499_v2  ;;  %v4110_v7 = vld [vmem:[#allocation60_spill] sm:$0xff]  ;;  %v510_v39 = vadd.f32 %v509_v33, %v508_v30  ;;  %v3168_v2 = vld [vmem:[%s3928_s4 + $0x60] sm:$0xff]  ;;  %v3202_v30 = vld [vmem:[%s3928_s4 + $0x50] sm:$0xff] }
  0xc8   :  { %693 = vmatpush.msrb.mxu3 %v4075_v11  ;;  %710 = vmatpush.msra.mxu1 %v4076_v41  ;;  %v4112_v41 = vld [vmem:[#allocation63_spill] sm:$0xff]  ;;  %v3212_v33 = vld [vmem:[%s3928_s4 + $0x18] sm:$0xff] }
  0xc9   :  { %733 = vmatpush.msra.mxu0 %v4077_v19  ;;  %750 = vmatpush.msra.mxu2 %v4078_v43  ;;  %v502_v59 = vrot.slane %v501_v24, 1 }
  0xca   :  { %694 = vmatmul.f32.vlgmr.msrb.gmra.mxu3 %v475_v17  ;;  %734 = vmatmul.f32.vlgmr.msra.gmra.mxu0 %v489_v38  ;;  %v2167_v38 = vmov 72.0  }
  0xcb   :  { %758 = vmatpush.msra.mxu3 %v4079_v45  ;;  %711 = vmatpush.msra.mxu1 %v4080_v40  ;;  %v503_v11 = vadd.f32 %v502_v59, %v501_v24  ;;  %2055 = vrcp.f32 %v2167_v38 }
  0xcc   :  { %751 = vmatpush.msra.mxu2 %v4081_v47  ;;  %840 = vmatpush.msrb.mxu0 %v234_v9 }
  0xcd   :  { %759 = vmatpush.msra.mxu3 %v4082_v44  ;;  %712 = vmatpush.msra.mxu1 %v4083_v25 }
  0xce   :  { %752 = vmatpush.msra.mxu2 %v4084_v29 }
  0xcf   :  { %760 = vmatpush.msra.mxu3 %v4085_v51  ;;  %713 = vmatpush.msra.mxu1 %v4086_v18 }
  0xd0   :  { %753 = vmatpush.msra.mxu2 %v4087_v23  ;;  %714 = vmatmul.f32.vlgmr.msra.gmra.mxu1 %v482_v14 }
  0xd1   :  { %754 = vmatmul.f32.vlgmr.msra.gmra.mxu2 %v496_v48  ;;  %761 = vmatpush.msra.mxu3 %v4088_v58  ;;  %v2056_v40 = vpop.eup %2055 }
  0xd2   :  { %782 = vmatpush.msrb.mxu1 %v4089_v52  ;;  %v799_v47 = vmul.f32 72.0, %v2056_v40  ;;  %vm803_vm5 = vweird.f32 %v2056_v40 }
  0xd3   :  { %762 = vmatpush.msra.mxu3 %v4090_v60  ;;  %v3145_v60 = vld [vmem:[%s3928_s4 + $0x78] sm:$0xff] }
  0xd4   :  { %783 = vmatpush.msrb.mxu1 %v4091_v57  ;;  %v800_v14 = vsub.f32 1.0, %v799_v47  ;;  %v3153_v57 = vld [vmem:[%s3928_s4 + $0x98] sm:$0xff]  ;;  %860 = vmatpush.msrb.mxu2 %v3145_v60  ;;  %v2045_v47 = vld [vmem:[%s3932_s8 + $0x4] sm:$0xf] }
  0xd5   :  { %763 = vmatpush.msra.mxu3 %v4092_v62 }
  0xd6   :  { %784 = vmatpush.msrb.mxu1 %v4093_v0  ;;  %v801_v54 = vmul.f32 %v2056_v40, %v800_v14  ;;  %861 = vmatpush.msrb.mxu2 %v3159_v22  ;;  %v226_v14 = vld [vmem:[%s3928_s4 + $0x30] sm:$0xff] }
  0xd7   :  { %764 = vmatpush.msra.mxu3 %v4094_v28  ;;  %v227_v28 = vld [vmem:[%s3928_s4 + $0x38] sm:$0xff] }
  0xd8   :  { %785 = vmatpush.msrb.mxu1 %v4095_v10  ;;  %v802_v52 = vadd.f32 %v2056_v40, %v801_v54  ;;  %841 = vmatpush.msrb.mxu0 %v227_v28 }
  0xd9   :  { %765 = vmatpush.msra.mxu3 %v4096_v61  ;;  %v3174_v61 = vld [vmem:[%s3928_s4 + $0x8] sm:$0xff] }
  0xda   :  { %786 = vmatpush.msrb.mxu1 %v4097_v12  ;;  %v220_v12 = vld [vmem:[%s3928_s4] sm:$0xff]  ;;  %862 = vmatpush.msrb.mxu2 %v3174_v61 }
  0xdb   :  { %766 = vmatpush.msra.mxu3 %v4098_v6  ;;  %v3185_v6 = vsel %vm803_vm5, %v2056_v40, %v802_v52  ;;  %842 = vmatpush.msrb.mxu0 %v220_v12  ;;  %v1193_v52 = vld [vmem:[%s3931_s7] sm:$0x1]  ;;  %vm1179_vm5 = vcmask 1043456  }
  0xdc   :  { %787 = vmatpush.msrb.mxu1 %v4099_v1  ;;  %4113 = vst [vmem:[#allocation13_spill] sm:$0xff] %v3185_v6  ;;  %v3192_v1 = vld [vmem:[%s3928_s4 + $0x88] sm:$0xff] }
  0xdd   :  { %767 = vmatpush.msra.mxu3 %v4100_v55  ;;  %900 = vmatpush.msra.mxu2 %v3192_v1 }
  0xde   :  { %788 = vmatpush.msrb.mxu1 %v4101_v5  ;;  %v236_v5 = vld [vmem:[%s3928_s4 + $0x80] sm:$0xff] }
  0xdf   :  { %768 = vmatpush.msra.mxu3 %v4102_v31  ;;  %880 = vmatpush.msra.mxu0 %v236_v5 }
  0xe0   :  { %789 = vmatpush.msrb.mxu1 %v4103_v32  ;;  %901 = vmatpush.msra.mxu2 %v3202_v30 }
  0xe1   :  { %769 = vmatpush.msra.mxu3 %v4104_v42 }
  0xe2   :  { %790 = vmatpush.msrb.mxu1 %v4105_v13  ;;  %v229_v13 = vld [vmem:[%s3928_s4 + $0x48] sm:$0xff]  ;;  %902 = vmatpush.msra.mxu2 %v3212_v33 }
  0xe3   :  { %770 = vmatpush.msra.mxu3 %v4106_v63  ;;  %v222_v63 = vld [vmem:[%s3928_s4 + $0x10] sm:$0xff]  ;;  %881 = vmatpush.msra.mxu0 %v229_v13 }
  0xe4   :  { %791 = vmatpush.msrb.mxu1 %v4107_v35  ;;  %v238_v35 = vld [vmem:[%s3928_s4 + $0x90] sm:$0xff] }
  0xe5   :  { %771 = vmatpush.msra.mxu3 %v4108_v3  ;;  %882 = vmatpush.msra.mxu0 %v222_v63 }
  0xe6   :  { %792 = vmatpush.msrb.mxu1 %v4109_v36 }
  0xe7   :  { %772 = vmatpush.msra.mxu3 %v4110_v7  ;;  %v231_v7 = vld [vmem:[%s3928_s4 + $0x58] sm:$0xff] }
  0xe8   :  { %793 = vmatpush.msrb.mxu1 %v4111_v34 }
  0xe9   :  { %1986 = vmatmul.msk.f32.vlgmr.msrb.gmra.mxu1 %vm511_vm4, %v510_v39  ;;  %773 = vmatpush.msra.mxu3 %v4112_v41  ;;  %v224_v39 = vld [vmem:[%s3928_s4 + $0x20] sm:$0xff]  ;;  %vm1177_vm4 = vcmask 1045508  }
  0xea   :  { %774 = vmatmul.f32.vlgmr.msra.gmra.mxu3 %v503_v11  ;;  %940 = vmatpush.msra.mxu1 %v3153_v57 }
  0xeb   :  { %983 = vmatpush.msrb.mxu3 %v234_v9  ;;  %v2019_v9 = vld [vmem:[%s3932_s8 + $0x10] sm:$0xf] }
  0xec   :  { %941 = vmatpush.msra.mxu1 %v3168_v2 }
  0xed   :  { %984 = vmatpush.msrb.mxu3 %v227_v28  ;;  %v3302_v28 = vld [vmem:[%s3933_s9 + $0x1f8] sm:$0xff] }
  0xee   :  { %942 = vmatpush.msra.mxu1 %v3182_v4 }
  0xef   :  { %985 = vmatpush.msrb.mxu3 %v220_v12  ;;  %v3328_v12 = vld [vmem:[%s3933_s9 + $0xe0] sm:$0xff] }
  0xf0   :  { %1023 = vmatpush.msrb.mxu1 %v236_v5  ;;  %v3360_v5 = vld [vmem:[%s3933_s9 + $0x170] sm:$0xff] }
  0xf1   :  { %1063 = vmatpush.msra.mxu3 %v238_v35 }
  0xf2   :  { %1024 = vmatpush.msrb.mxu1 %v229_v13  ;;  %v3396_v13 = vld [vmem:[%s3933_s9 + $0xc0] sm:$0xff] }
  0xf3   :  { %1064 = vmatpush.msra.mxu3 %v231_v7 }
  0xf4   :  { %1025 = vmatpush.msrb.mxu1 %v222_v63  ;;  %v3408_v63 = vld [vmem:[%s3933_s9 + $0x1d0] sm:$0xff] }
  0xf5   :  { %1065 = vmatpush.msra.mxu3 %v224_v39 }
 0x123   :  { %v552_v43 = vpop.f32.mrf.mxu0 }
 0x129   :  { %v532_v17 = vpop.f32.mrf.mxu3 }
 0x12a   :  { %v572_v19 = vpop.f32.mrf.mxu1  ;;  %v553_v27 = vadd.f32 %v552_v43, %v532_v17  ;;  %v241_v43 = vld [vmem:[#allocation2] sm:$0x1] }
 0x12c   :  { %v573_v25 = vadd.f32 %v572_v19, %v553_v27  ;;  %v240_v27 = vld [vmem:[%s3928_s4 + $0xa0] sm:$0xff] }
 0x131   :  { %v592_v21 = vpop.f32.mrf.mxu2 }
 0x132   :  { %v593_v51 = vadd.f32 %v592_v21, %v573_v25  ;;  %v233_v25 = vld [vmem:[%s3928_s4 + $0x68] sm:$0xff] }
 0x139   :  { %v675_v29 = vpop.f32.mrf.mxu2 }
 0x13b   :  { %v612_v45 = vpop.f32.mrf.mxu3 }
 0x13c   :  { %v613_v48 = vadd.f32 %v612_v45, %v593_v51 }
 0x13e   :  { %v632_v49 = vpop.f32.mrf.mxu0 }
 0x13f   :  { %v633_v58 = vadd.f32 %v632_v49, %v613_v48  ;;  %v2005_v49 = vld [vmem:[%s3932_s8 + $0x14] sm:$0xf0]  ;;  %v2013_v48 = vld [vmem:[%s3932_s8 + $0x1c] sm:$0xf0] }
 0x140   :  { %v652_v53 = vpop.f32.mrf.mxu1  ;;  %v2008_v51 = vor.u32 %v2045_v47, %v2005_v49  ;;  %v3521_v47 = vld [vmem:[%s3933_s9 + $0x138] sm:$0xff]  ;;  %v3528_v49 = vld [vmem:[%s3933_s9 + $0x1a8] sm:$0xff] }
 0x141   :  { %v653_v10 = vadd.f32 %v652_v53, %v633_v58  ;;  %v242_v53 = vld [vmem:[#allocation4] sm:$0x1] }
 0x143   :  { %v805_v31 = vmul.f32 %v3185_v6, %v653_v10  ;;  %v3314_v10 = vld [vmem:[%s3933_s9 + $0x1f0] sm:$0xff] }
 0x145   :  { %v807_v59 = vmul.f32 %v805_v31, %v805_v31 }
 0x147   :  { %v735_v26 = vpop.f32.mrf.mxu0 }
 0x14d   :  { %v695_v44 = vpop.f32.mrf.mxu3  ;;  %v715_v23 = vpop.f32.mrf.mxu1 }
 0x14e   :  { %v696_v18 = vadd.f32 %v695_v44, %v675_v29 }
 0x150   :  { %v716_v56 = vadd.f32 %v715_v23, %v696_v18  ;;  %v2046_v18 = vld [vmem:[%s3932_s8 + $0xc] sm:$0xf]  ;;  %v2003_v23 = vld [vmem:[%s3932_s8] sm:$0xf] }
 0x151   :  { %v2016_v54 = vor.u32 %v2046_v18, %v2013_v48  ;;  %v3559_v18 = vld [vmem:[%s3933_s9 + $0x88] sm:$0xff] }
 0x152   :  { %v736_v62 = vadd.f32 %v735_v26, %v716_v56  ;;  %v2047_v56 = vld [vmem:[%s3932_s8 + $0x10] sm:$0xf0]  ;;  %v2011_v26 = vld [vmem:[%s3932_s8 + $0x8] sm:$0xf] }
 0x153   :  { %v2004_v58 = vor.u32 %v2047_v56, %v2003_v23  ;;  %v3564_v48 = vld [vmem:[%s3933_s9 + $0x128] sm:$0xff]  ;;  %v1207_v23 = vld [vmem:[%s3933_s9 + $0x38] sm:$0xff]  ;;  %v3580_v56 = vld [vmem:[%s3933_s9 + $0x80] sm:$0xff] }
 0x154   :  { %v755_v0 = vpop.f32.mrf.mxu2 }
 0x155   :  { %v756_v16 = vadd.f32 %v755_v0, %v736_v62  ;;  %v2049_v62 = vld [vmem:[%s3932_s8 + $0x20] sm:$0xf0] }
 0x156   :  { %v2020_v0 = vor.u32 %v2049_v62, %v2019_v9  ;;  %v3606_v9 = vld [vmem:[%s3933_s9 + $0x188] sm:$0xff] }
 0x157   :  { %4114 = vst [vmem:[#allocation38_spill] sm:$0xff] %v3606_v9  ;;  %v1205_v62 = vld [vmem:[%s3933_s9 + $0x28] sm:$0xff] }
 0x166   :  { %v795_v24 = vpop.f32.mrf.mxu1 }
 0x16d   :  { %v775_v55 = vpop.f32.mrf.mxu3 }
 0x16e   :  { %v776_v32 = vadd.f32 %v775_v55, %v756_v16  ;;  %v3342_v16 = vld [vmem:[%s3933_s9 + $0x178] sm:$0xff]  ;;  %v3355_v55 = vld [vmem:[%s3933_s9 + $0xd0] sm:$0xff] }
 0x170   :  { %v796_v42 = vadd.f32 %v795_v24, %v776_v32  ;;  %v3378_v32 = vld [vmem:[%s3933_s9 + $0x168] sm:$0xff]  ;;  %v3383_v24 = vld [vmem:[%s3933_s9 + $0x1d8] sm:$0xff] }
 0x172   :  { %v806_v3 = vmul.f32 %v3185_v6, %v796_v42  ;;  %v3391_v42 = vld [vmem:[%s3933_s9 + $0x78] sm:$0xff]  ;;  %v3633_v6 = vld [vmem:[%s3933_s9 + $0x108] sm:$0xff] }
 0x174   :  { %v808_v36 = vsub.f32 %v806_v3, %v807_v59  ;;  %v3420_v59 = vld [vmem:[%s3933_s9 + $0xb8] sm:$0xff] }
 0x175   :  { %v3425_v3 = vld [vmem:[%s3933_s9 + $0x158] sm:$0xff] }
 0x176   :  { %v809_v34 = vadd.f32 1e-05, %v808_v36  ;;  %v3432_v36 = vld [vmem:[%s3933_s9 + $0x1c8] sm:$0xff] }
 0x178   :  { %2057 = vrsqrt.f32 %v809_v34  ;;  %vm816_vm7 = vweird.f32 %v809_v34 }
 0x17e   :  { %v2058_v11 = vpop.eup %2057 }
 0x17f   :  { %v811_v41 = vmul.f32 %v2058_v11, %v809_v34  ;;  %vm817_vm6 = vweird.f32 %v2058_v11  ;;  %v3449_v34 = vld [vmem:[%s3933_s9 + $0x150] sm:$0xff] }
 0x180   :  { %vm818_vm8 = vmor %vm816_vm7, %vm817_vm6  ;;  %vm1188_vm7 = vcmask 1045509  }
 0x181   :  { %v812_v17 = vmul.f32 %v2058_v11, %v811_v41  ;;  %v3463_v41 = vld [vmem:[%s3933_s9 + $0x60] sm:$0xff]  ;;  %vm3796_vm6 = vmor %vm1185_vm3, %vm3788_vm1 }
 0x183   :  { %v813_v38 = vmul.f32 0.5, %v812_v17  ;;  %v3468_v17 = vld [vmem:[%s3933_s9 + $0xa8] sm:$0xff] }
 0x185   :  { %v814_v19 = vsub.f32 1.5, %v813_v38  ;;  %v3473_v38 = vld [vmem:[%s3933_s9 + $0x148] sm:$0xff] }
 0x187   :  { %v815_v21 = vmul.f32 %v2058_v11, %v814_v19  ;;  %v3480_v19 = vld [vmem:[%s3933_s9 + $0x1b8] sm:$0xff] }
 0x189   :  { %v819_v45 = vsel %vm818_vm8, %v2058_v11, %v815_v21  ;;  %v3456_v11 = vld [vmem:[%s3933_s9 + $0x1c0] sm:$0xff]  ;;  %vm3805_vm8 = vmor %vm1169_vm15, %vm3796_vm6 }
 0x18a   :  { %v820_v40 = vmul.f32 %v819_v45, %v241_v43  ;;  %v3487_v43 = vld [vmem:[%s3933_s9 + $0x58] sm:$0xff]  ;;  %v3492_v21 = vld [vmem:[%s3933_s9 + $0xa0] sm:$0xff]  ;;  %vm1189_vm12 = vmor %vm1188_vm7, %vm3805_vm8  ;;  %vm1933_vm7 = vcmask 1042432  }
 0x18b   :  { %v3497_v45 = vld [vmem:[%s3933_s9 + $0x140] sm:$0xff] }
 0x18c   :  { %1987 = vmatmul.msk.f32.vlgmr.msrb.gmra.mxu0 %vm823_vm9, %v820_v40  ;;  %1988 = vmatmul.msk.f32.vlgmr.msrb.gmra.mxu2 %vm823_vm9, %v820_v40  ;;  %v821_v44 = vmul.f32 %v820_v40, %v805_v31  ;;  %v3373_v31 = vld [vmem:[%s3933_s9 + $0xc8] sm:$0xff] }
 0x18d   :  { %1992 = vmatmul.msk.f32.vlgmr.msra.gmra.mxu1 %vm823_vm9, %v820_v40  ;;  %960 = vmatpush.msrb.mxu2 %v240_v27 }
 0x18e   :  { %v822_v29 = vsub.f32 %v242_v53, %v821_v44  ;;  %920 = vmatpush.msrb.mxu0 %v238_v35  ;;  %1103 = vmatpush.msra.mxu1 %v240_v27  ;;  %v3415_v35 = vld [vmem:[%s3933_s9 + $0x70] sm:$0xff]  ;;  %v3516_v53 = vld [vmem:[%s3933_s9 + $0x98] sm:$0xff]  ;;  %v1209_v44 = vld [vmem:[%s3933_s9 + $0x48] sm:$0xff] }
 0x18f   :  { %961 = vmatpush.msrb.mxu2 %v233_v25  ;;  %v3511_v27 = vld [vmem:[%s3933_s9 + $0x50] sm:$0xff] }
 0x190   :  { %1994 = vmatmul.msk.f32.vlgmr.msrb.gmra.mxu3 %vm823_vm9, %v822_v29  ;;  %921 = vmatpush.msrb.mxu0 %v231_v7  ;;  %v3439_v7 = vld [vmem:[%s3933_s9 + $0x68] sm:$0xff] }
 0x191   :  { %1104 = vmatpush.msra.mxu1 %v233_v25  ;;  %962 = vmatpush.msrb.mxu2 %v226_v14  ;;  %v3538_v25 = vld [vmem:[%s3933_s9 + $0x90] sm:$0xff] }
 0x192   :  { %922 = vmatpush.msrb.mxu0 %v224_v39  ;;  %1334 = vmatpush.bf16.msrb.mxu3 %v2008_v51  ;;  %v3444_v39 = vld [vmem:[%s3933_s9 + $0xb0] sm:$0xff]  ;;  %v1208_v51 = vld [vmem:[%s3933_s9 + $0x40] sm:$0xff] }
 0x193   :  { %1105 = vmatpush.msra.mxu1 %v226_v14  ;;  %v3549_v14 = vld [vmem:[%s3933_s9 + $0x1a0] sm:$0xff] }
 0x194   :  { %1989 = vmatmul.msk.f32.vlgmr.msra.gmra.mxu0 %vm823_vm9, %v820_v40  ;;  %1990 = vmatmul.msk.f32.vlgmr.msra.gmra.mxu2 %vm823_vm9, %v820_v40 }
 0x195   :  { %1996 = vmatmul.msk.f32.vlgmr.msrb.gmra.mxu1 %vm823_vm9, %v822_v29  ;;  %1043 = vmatpush.msra.mxu2 %v3192_v1  ;;  %v3347_v1 = vld [vmem:[%s3933_s9 + $0x1e8] sm:$0xff] }
 0x196   :  { %1003 = vmatpush.msra.mxu0 %v3145_v60  ;;  %1360 = vmatpush.bf16.msrb.mxu1 %v2016_v54  ;;  %v2048_v60 = vld [vmem:[%s3932_s8 + $0x18] sm:$0xf0] }
 0x197   :  { %1044 = vmatpush.msra.mxu2 %v3202_v30  ;;  %v3365_v30 = vld [vmem:[%s3933_s9 + $0x1e0] sm:$0xff]  ;;  %v3570_v54 = vld [vmem:[%s3933_s9 + $0x198] sm:$0xff] }
 0x198   :  { %1998 = vmatmul.msk.f32.vlgmr.msra.gmra.mxu3 %vm823_vm9, %v822_v29  ;;  %1004 = vmatpush.msra.mxu0 %v3159_v22  ;;  %v3297_v22 = vld [vmem:[%s3933_s9 + $0xf8] sm:$0xff] }
 0x199   :  { %1045 = vmatpush.msra.mxu2 %v3212_v33  ;;  %v3401_v33 = vld [vmem:[%s3933_s9 + $0x160] sm:$0xff]  ;;  %1459 = vmatpush.msra.mxu3 %v3391_v42 }
 0x19a   :  { %1005 = vmatpush.msra.mxu0 %v3174_v61  ;;  %v3321_v61 = vld [vmem:[%s3933_s9 + $0xe8] sm:$0xff] }
 0x19b   :  { %1460 = vmatpush.msra.mxu3 %v3415_v35 }
 0x19c   :  { %1991 = vmatmul.msk.f32.vlgmr.msrb.gmra.mxu0 %vm823_vm9, %v820_v40  ;;  %1993 = vmatmul.msk.f32.vlgmr.msrb.gmra.mxu2 %vm823_vm9, %v820_v40  ;;  %v3504_v40 = vld [vmem:[%s3933_s9 + $0x1b0] sm:$0xff] }
 0x19d   :  { %2000 = vmatmul.msk.f32.vlgmr.msra.gmra.mxu1 %vm823_vm9, %v822_v29  ;;  %1321 = vmatpush.bf16.msrb.mxu2 %v2004_v58  ;;  %v3585_v58 = vld [vmem:[%s3933_s9 + $0x120] sm:$0xff] }
 0x19e   :  { %1083 = vmatpush.msrb.mxu0 %v3153_v57  ;;  %v2012_v57 = vor.u32 %v2048_v60, %v2011_v26  ;;  %1499 = vmatpush.msra.mxu1 %v3342_v16  ;;  %v1206_v26 = vld [vmem:[%s3933_s9 + $0x30] sm:$0xff]  ;;  %v3601_v60 = vld [vmem:[%s3933_s9 + $0x118] sm:$0xff] }
 0x19f   :  { %1461 = vmatpush.msra.mxu3 %v3439_v7 }
 0x1a0   :  { %2022 = vmatmul.msk.bf16.vlgmr.msrb.gmra.mxu3 %vm1310_vm10, %v1193_v52  ;;  %1084 = vmatpush.msrb.mxu0 %v3168_v2  ;;  %v3309_v2 = vld [vmem:[%s3933_s9 + $0xf0] sm:$0xff] }
 0x1a1   :  { %1500 = vmatpush.msra.mxu1 %v3360_v5  ;;  %1462 = vmatpush.msra.mxu3 %v3463_v41 }
 0x1a2   :  { %1085 = vmatpush.msrb.mxu0 %v3182_v4  ;;  %v3337_v4 = vld [vmem:[%s3933_s9 + $0xd8] sm:$0xff] }
 0x1a3   :  { %1501 = vmatpush.msra.mxu1 %v3378_v32  ;;  %1463 = vmatpush.msra.mxu3 %v3487_v43 }
 0x1a4   :  { %1995 = vmatmul.msk.f32.vlgmr.msra.gmra.mxu0 %vm823_vm9, %v822_v29  ;;  %1997 = vmatmul.msk.f32.vlgmr.msra.gmra.mxu2 %vm823_vm9, %v822_v29 }
 0x1a5   :  { %2024 = vmatmul.msk.bf16.vlgmr.msrb.gmra.mxu1 %vm1310_vm10, %v1193_v52  ;;  %1347 = vmatpush.bf16.msra.mxu0 %v2012_v57  ;;  %v3617_v57 = vld [vmem:[%s3933_s9 + $0x110] sm:$0xff] }
 0x1a6   :  { %1373 = vmatpush.bf16.msra.mxu2 %v2020_v0  ;;  %1502 = vmatpush.msra.mxu1 %v3401_v33  ;;  %v3622_v0 = vld [vmem:[%s3933_s9 + $0x180] sm:$0xff] }
 0x1a7   :  { %1464 = vmatpush.msra.mxu3 %v3511_v27  ;;  %4115 = vst [vmem:[#allocation15_spill] sm:$0xff] %v3622_v0 }
 0x1a8   :  { %1503 = vmatpush.msra.mxu1 %v3425_v3 }
 0x1a9   :  { %1465 = vmatpush.msra.mxu3 %v1209_v44 }
 0x1aa   :  { %1504 = vmatpush.msra.mxu1 %v3449_v34 }
 0x1ab   :  { %1466 = vmatpush.msra.mxu3 %v1208_v51 }
 0x1ac   :  { %1999 = vmatmul.msk.f32.vlgmr.msrb.gmra.mxu0 %vm823_vm9, %v822_v29  ;;  %2021 = vmatmul.msk.bf16.vlgmr.msrb.gmra.mxu2 %vm1310_vm10, %v1193_v52  ;;  %v3543_v29 = vld [vmem:[%s3933_s9 + $0x130] sm:$0xff]  ;;  %vm1190_vm9 = vcmask 784390  }
 0x1ad   :  { %1479 = vmatpush.msrb.mxu0 %v3297_v22  ;;  %1519 = vmatpush.msrb.mxu2 %v3302_v28  ;;  %vm1191_vm14 = vmor %vm1190_vm9, %vm1189_vm12 }
 0x1ae   :  { %1505 = vmatpush.msra.mxu1 %v3473_v38  ;;  %1467 = vmatpush.msra.mxu3 %v1207_v23 }
 0x1af   :  { %1480 = vmatpush.msrb.mxu0 %v3309_v2  ;;  %1520 = vmatpush.msrb.mxu2 %v3314_v10 }
 0x1b0   :  { %1506 = vmatpush.msra.mxu1 %v3497_v45  ;;  %1468 = vmatpush.msra.mxu3 %v1206_v26 }
 0x1b1   :  { %1481 = vmatpush.msrb.mxu0 %v3321_v61  ;;  %1521 = vmatpush.msrb.mxu2 %v3347_v1 }
 0x1b2   :  { %1507 = vmatpush.msra.mxu1 %v3521_v47  ;;  %1469 = vmatpush.msra.mxu3 %v1205_v62 }
 0x1b3   :  { %1482 = vmatpush.msrb.mxu0 %v3328_v12  ;;  %1522 = vmatpush.msrb.mxu2 %v3365_v30 }
 0x1b4   :  { %2023 = vmatmul.msk.bf16.vlgmr.msra.gmra.mxu0 %vm1310_vm10, %v1193_v52  ;;  %1508 = vmatpush.msra.mxu1 %v3543_v29 }
 0x1b5   :  { %1483 = vmatpush.msrb.mxu0 %v3337_v4  ;;  %1523 = vmatpush.msrb.mxu2 %v3383_v24 }
 0x1b6   :  { %1509 = vmatpush.msra.mxu1 %v3564_v48 }
 0x1b7   :  { %1484 = vmatpush.msrb.mxu0 %v3355_v55  ;;  %1524 = vmatpush.msrb.mxu2 %v3408_v63 }
 0x1b8   :  { %1510 = vmatpush.msra.mxu1 %v3585_v58 }
 0x1b9   :  { %1485 = vmatpush.msrb.mxu0 %v3373_v31  ;;  %1525 = vmatpush.msrb.mxu2 %v3432_v36 }
 0x1ba   :  { %1511 = vmatpush.msra.mxu1 %v3601_v60 }
 0x1bb   :  { %1486 = vmatpush.msrb.mxu0 %v3396_v13  ;;  %1526 = vmatpush.msrb.mxu2 %v3456_v11 }
 0x1bc   :  { %2025 = vmatmul.msk.bf16.vlgmr.msra.gmra.mxu2 %vm1310_vm10, %v1193_v52  ;;  %v3591_v52 = vld [vmem:[%s3933_s9 + $0x190] sm:$0xff]  ;;  %1512 = vmatpush.msra.mxu1 %v3617_v57 }
 0x1bd   :  { %1487 = vmatpush.msrb.mxu0 %v3420_v59  ;;  %1527 = vmatpush.msrb.mxu2 %v3480_v19 }
 0x1be   :  { %1513 = vmatpush.msra.mxu1 %v3633_v6 }
 0x1bf   :  { %1488 = vmatpush.msrb.mxu0 %v3444_v39  ;;  %1528 = vmatpush.msrb.mxu2 %v3504_v40 }
 0x1c1   :  { %1489 = vmatpush.msrb.mxu0 %v3468_v17  ;;  %1529 = vmatpush.msrb.mxu2 %v3528_v49 }
 0x1c3   :  { %1490 = vmatpush.msrb.mxu0 %v3492_v21  ;;  %1530 = vmatpush.msrb.mxu2 %v3549_v14 }
 0x1c5   :  { %1491 = vmatpush.msrb.mxu0 %v3516_v53  ;;  %1531 = vmatpush.msrb.mxu2 %v3570_v54 }
 0x1c7   :  { %1492 = vmatpush.msrb.mxu0 %v3538_v25  ;;  %1532 = vmatpush.msrb.mxu2 %v3591_v52 }
 0x1c9   :  { %1493 = vmatpush.msrb.mxu0 %v3559_v18  ;;  %1533 = vmatpush.msrb.mxu2 %v3606_v9 }
 0x1cb   :  { %1494 = vmatpush.msrb.mxu0 %v3580_v56  ;;  %1534 = vmatpush.msrb.mxu2 %v3622_v0  ;;  %v3644_v0 = vld [vmem:[%s3933_s9 + $0x100] sm:$0xff] }
 0x1cc   :  { %1514 = vmatpush.msra.mxu1 %v3644_v0 }
 0x1cd   :  { %1562 = vmatpush.msra.mxu0 %v3391_v42  ;;  %v1204_v42 = vld [vmem:[%s3933_s9 + $0x20] sm:$0xff]  ;;  %1602 = vmatpush.msra.mxu2 %v3342_v16  ;;  %v1202_v16 = vld [vmem:[%s3933_s9 + $0x10] sm:$0xff] }
 0x1ce   :  { %1470 = vmatpush.msra.mxu3 %v1204_v42  ;;  %1582 = vmatpush.msrb.mxu1 %v3297_v22  ;;  %v3672_v22 = vld [vmem:[%s3933_s9 + $0x238] sm:$0xff] }
 0x1cf   :  { %1563 = vmatpush.msra.mxu0 %v3415_v35  ;;  %v1203_v35 = vld [vmem:[%s3933_s9 + $0x18] sm:$0xff]  ;;  %1603 = vmatpush.msra.mxu2 %v3360_v5  ;;  %v1201_v5 = vld [vmem:[%s3933_s9 + $0x8] sm:$0xff] }
 0x1d0   :  { %1471 = vmatpush.msra.mxu3 %v1203_v35  ;;  %1583 = vmatpush.msrb.mxu1 %v3309_v2  ;;  %v3681_v2 = vld [vmem:[%s3933_s9 + $0x230] sm:$0xff] }
 0x1d1   :  { %1564 = vmatpush.msra.mxu0 %v3439_v7  ;;  %1604 = vmatpush.msra.mxu2 %v3378_v32 }
 0x1d2   :  { %1472 = vmatpush.msra.mxu3 %v1202_v16  ;;  %1584 = vmatpush.msrb.mxu1 %v3321_v61 }
 0x1d3   :  { %1565 = vmatpush.msra.mxu0 %v3463_v41  ;;  %1605 = vmatpush.msra.mxu2 %v3401_v33  ;;  %v1200_v41 = vld [vmem:[%s3933_s9] sm:$0xff] }
 0x1d4   :  { %1473 = vmatpush.msra.mxu3 %v1201_v5  ;;  %1585 = vmatpush.msrb.mxu1 %v3328_v12  ;;  %v3703_v12 = vld [vmem:[%s3933_s9 + $0x220] sm:$0xff] }
 0x1d5   :  { %1566 = vmatpush.msra.mxu0 %v3487_v43  ;;  %1606 = vmatpush.msra.mxu2 %v3425_v3  ;;  %v3693_v3 = vld [vmem:[%s3933_s9 + $0x228] sm:$0xff] }
 0x1d6   :  { %1474 = vmatpush.msra.mxu3 %v1200_v41  ;;  %1586 = vmatpush.msrb.mxu1 %v3337_v4  ;;  %v3711_v4 = vld [vmem:[%s3933_s9 + $0x218] sm:$0xff] }
 0x1d7   :  { %1567 = vmatpush.msra.mxu0 %v3511_v27  ;;  %1607 = vmatpush.msra.mxu2 %v3449_v34 }
 0x1d8   :  { %1547 = vmatpush.msrb.mxu3 %v3672_v22  ;;  %1587 = vmatpush.msrb.mxu1 %v3355_v55  ;;  %v3721_v55 = vld [vmem:[%s3933_s9 + $0x210] sm:$0xff] }
 0x1d9   :  { %1568 = vmatpush.msra.mxu0 %v1209_v44  ;;  %1608 = vmatpush.msra.mxu2 %v3473_v38 }
 0x1da   :  { %1548 = vmatpush.msrb.mxu3 %v3681_v2  ;;  %1588 = vmatpush.msrb.mxu1 %v3373_v31  ;;  %v3729_v31 = vld [vmem:[%s3933_s9 + $0x208] sm:$0xff] }
 0x1db   :  { %1569 = vmatpush.msra.mxu0 %v1208_v51  ;;  %1609 = vmatpush.msra.mxu2 %v3497_v45 }
 0x1dc   :  { %1549 = vmatpush.msrb.mxu3 %v3693_v3  ;;  %1589 = vmatpush.msrb.mxu1 %v3396_v13  ;;  %v3739_v13 = vld [vmem:[%s3933_s9 + $0x200] sm:$0xff] }
 0x1dd   :  { %1570 = vmatpush.msra.mxu0 %v1207_v23  ;;  %1610 = vmatpush.msra.mxu2 %v3521_v47 }
 0x1de   :  { %1550 = vmatpush.msrb.mxu3 %v3703_v12  ;;  %1590 = vmatpush.msrb.mxu1 %v3420_v59 }
 0x1df   :  { %1571 = vmatpush.msra.mxu0 %v1206_v26  ;;  %1611 = vmatpush.msra.mxu2 %v3543_v29 }
 0x1e0   :  { %1551 = vmatpush.msrb.mxu3 %v3711_v4  ;;  %1591 = vmatpush.msrb.mxu1 %v3444_v39 }
 0x1e1   :  { %1572 = vmatpush.msra.mxu0 %v1205_v62  ;;  %1612 = vmatpush.msra.mxu2 %v3564_v48  ;;  %v4116_v48 = vld [vmem:[#allocation68_spill] sm:$0xff] }
 0x1e2   :  { %1552 = vmatpush.msrb.mxu3 %v3721_v55  ;;  %1592 = vmatpush.msrb.mxu1 %v3468_v17 }
 0x1e3   :  { %1573 = vmatpush.msra.mxu0 %v1204_v42  ;;  %1613 = vmatpush.msra.mxu2 %v3585_v58 }
 0x1e4   :  { %1553 = vmatpush.msrb.mxu3 %v3729_v31  ;;  %1593 = vmatpush.msrb.mxu1 %v3492_v21 }
 0x1e5   :  { %1574 = vmatpush.msra.mxu0 %v1203_v35  ;;  %1614 = vmatpush.msra.mxu2 %v3601_v60 }
 0x1e6   :  { %1554 = vmatpush.msrb.mxu3 %v3739_v13  ;;  %1594 = vmatpush.msrb.mxu1 %v3516_v53 }
 0x1e7   :  { %1575 = vmatpush.msra.mxu0 %v1202_v16  ;;  %1615 = vmatpush.msra.mxu2 %v3617_v57 }
 0x1e8   :  { %1595 = vmatpush.msrb.mxu1 %v3538_v25 }
 0x1e9   :  { %1576 = vmatpush.msra.mxu0 %v1201_v5  ;;  %1616 = vmatpush.msra.mxu2 %v3633_v6 }
 0x1ea   :  { %1596 = vmatpush.msrb.mxu1 %v3559_v18 }
 0x1eb   :  { %1577 = vmatpush.msra.mxu0 %v1200_v41  ;;  %1617 = vmatpush.msra.mxu2 %v3644_v0 }
 0x1ec   :  { %1597 = vmatpush.msrb.mxu1 %v3580_v56 }
 0x209   :  { %v3648_v9 = vpop.f32.mrf.mxu0 }
 0x20a   :  { %v3654_v7 = vpop.f32.mrf.mxu1  ;;  %v1110_v47 = vperm.slane %v3648_v9, 0 }
 0x20b   :  { %v1115_v39 = vperm.slane %v3654_v7, 0 }
 0x20c   :  { %v1117_v23 = vmul.f32 %v1110_v47, %v4116_v48 }
 0x20f   :  { %v3674_v32 = vpop.f32.mrf.mxu2 }
 0x210   :  { %v1111_v59 = vperm.slane %v3674_v32, 0 }
 0x211   :  { %v3683_v33 = vpop.f32.mrf.mxu0 }
 0x212   :  { %v3687_v61 = vpop.f32.mrf.mxu1  ;;  %v1112_v29 = vperm.slane %v3683_v33, 0  ;;  %v1118_v35 = vmul.f32 %v1111_v59, %v2996_v46 }
 0x213   :  { %v3695_v43 = vpop.f32.mrf.mxu3  ;;  %v1126_v46 = vperm.slane %v3687_v61, 0  ;;  %v1122_v61 = vmul.f32 %v1115_v39, %v3021_v37 }
 0x214   :  { %v1124_v58 = vperm.slane %v3695_v43, 0  ;;  %v1119_v21 = vmul.f32 %v1112_v29, %v3007_v20 }
 0x216   :  { %v1131_v53 = vadd.f32 %v1124_v58, %v1117_v23 }
 0x217   :  { %v3713_v34 = vpop.f32.mrf.mxu2 }
 0x218   :  { %v1138_v18 = vmax.f32 %v1131_v53, 0.0 }
 0x219   :  { %v924_v38 = vpop.f32.mrf.mxu0 }
 0x21a   :  { %v1107_v45 = vpop.f32.mrf.mxu1  ;;  %v1114_v9 = vperm.slane %v924_v38, 0 }
 0x21b   :  { %v3731_v27 = vpop.f32.mrf.mxu3  ;;  %v1130_v17 = vperm.slane %v1107_v45, 0 }
 0x21c   :  { %v1121_v6 = vmul.f32 %v1114_v9, %v3017_v8  ;;  %v1128_v20 = vperm.slane %v3731_v27, 0  ;;  %v1133_v8 = vadd.f32 %v1126_v46, %v1119_v21 }
 0x21e   :  { %v1135_v48 = vadd.f32 %v1128_v20, %v1121_v6 }
 0x21f   :  { %v964_v44 = vpop.f32.mrf.mxu2 }
 0x220   :  { %v1116_v51 = vperm.slane %v964_v44, 0 }
 0x221   :  { %v1007_v26 = vpop.f32.mrf.mxu0 }
 0x222   :  { %v1123_v60 = vmul.f32 %v1116_v51, %v3038_v15  ;;  %v1125_v62 = vperm.slane %v1007_v26, 0  ;;  %v3755_v42 = vpop.f32.mrf.mxu1  ;;  %v1113_v15 = vperm.slane %v3713_v34, 0 }
 0x223   :  { %v3758_v16 = vpop.f32.mrf.mxu3  ;;  %v1400_v7 = vsel %vm404_vm2, %v3755_v42, 0.0 }
 0x224   :  { %v1137_v57 = vadd.f32 %v1130_v17, %v1123_v60  ;;  %v1386_v5 = vsel %vm404_vm2, %v3758_v16, 0.0  ;;  %v1132_v41 = vadd.f32 %v1125_v62, %v1118_v35  ;;  %v1401_v33 = vrot.slane %v1400_v7, 4 }
 0x225   :  { %v1387_v32 = vrot.slane %v1386_v5, 4  ;;  %v1416_v25 = vmul.f32 %v3758_v16, %v3758_v16  ;;  %v1120_v27 = vmul.f32 %v1113_v15, %v3009_v50  ;;  %v1140_v60 = vmax.f32 %v1133_v8, 0.0 }
 0x226   :  { %v1144_v43 = vmax.f32 %v1137_v57, 0.0  ;;  %v1402_v0 = vadd.f32 %v1401_v33, %v1400_v7  ;;  %v1139_v59 = vmax.f32 %v1132_v41, 0.0 }
 0x227   :  { %v1047_v38 = vpop.f32.mrf.mxu2  ;;  %v1388_v45 = vadd.f32 %v1387_v32, %v1386_v5  ;;  %v1427_v9 = vsel %vm404_vm2, %v1416_v25, 0.0  ;;  %v1142_v5 = vmax.f32 %v1135_v48, 0.0 }
 0x228   :  { %v1127_v47 = vperm.slane %v1047_v38, 0  ;;  %v1403_v51 = vrot.slane %v1402_v0, 2  ;;  %v1148_v50 = vpack.c.bf16 %v1144_v43, %v1144_v43  ;;  %v1145_v7 = vpack.c.bf16 %v1139_v59, %v1138_v18 }
 0x229   :  { %v1087_v44 = vpop.f32.mrf.mxu0  ;;  %v1389_v29 = vrot.slane %v1388_v45, 2  ;;  %v1428_v32 = vrot.slane %v1427_v9, 4 }
 0x22a   :  { %v1134_v23 = vadd.f32 %v1127_v47, %v1120_v27  ;;  %v1364_v39 = vpop.f32.mrf.mxu1  ;;  %v1129_v58 = vperm.slane %v1087_v44, 0  ;;  %v1404_v17 = vadd.f32 %v1403_v51, %v1402_v0  ;;  %v1158_v46 = vrot.slane %v1148_v50, 2 }
 0x22b   :  { %v1390_v26 = vadd.f32 %v1389_v29, %v1388_v45  ;;  %v1338_v56 = vpop.f32.mrf.mxu3  ;;  %v1159_v33 = vrot.slane %v1148_v50, 5  ;;  %v1153_v0 = vrot.slane %v1145_v7, 3  ;;  %v1429_v59 = vadd.f32 %v1428_v32, %v1427_v9 }
 0x22c   :  { %v1141_v62 = vmax.f32 %v1134_v23, 0.0  ;;  %v1136_v21 = vadd.f32 %v1129_v58, %v1122_v61  ;;  %v1405_v57 = vrot.slane %v1404_v17, 1 }
 0x22d   :  { %v1391_v15 = vrot.slane %v1390_v26, 1  ;;  %v1176_v23 = vsel %vm1173_vm0, %v1158_v46, %v1159_v33  ;;  %v1163_v9 = vsel %vm1160_vm11, %v1145_v7, %v1153_v0  ;;  %v1430_v7 = vrot.slane %v1429_v59, 2 }
 0x22e   :  { %v1146_v41 = vpack.c.bf16 %v1141_v62, %v1140_v60  ;;  %v1143_v53 = vmax.f32 %v1136_v21, 0.0  ;;  %v1406_v43 = vadd.f32 %v1405_v57, %v1404_v17 }
 0x22f   :  { %v3800_v6 = vpop.f32.mrf.mxu2  ;;  %v1392_v20 = vadd.f32 %v1391_v15, %v1390_v26 }
 0x230   :  { %v1154_v61 = vrot.slane %v1146_v41, 6  ;;  %v1155_v38 = vrot.slane %v1146_v41, 1  ;;  %v1379_v45 = vsel %vm404_vm2, %v3800_v6, 0.0  ;;  %v1415_v25 = vmul.f32 %v3800_v6, %v3800_v6  ;;  %1535 = vmatmul.f32.vlgmr.msrb.gmra.mxu2 %v1406_v43 }
 0x231   :  { %v1147_v8 = vpack.c.bf16 %v1143_v53, %v1142_v5  ;;  %v1380_v27 = vrot.slane %v1379_v45, 4  ;;  %v3813_v47 = vpop.f32.mrf.mxu0  ;;  %1495 = vmatmul.f32.vlgmr.msrb.gmra.mxu0 %v1392_v20 }
 0x232   :  { %v1420_v44 = vsel %vm404_vm2, %v1415_v25, 0.0  ;;  %v1393_v29 = vsel %vm404_vm2, %v3813_v47, 0.0  ;;  %v1417_v51 = vmul.f32 %v3813_v47, %v3813_v47  ;;  %1650 = vmatpush.msrb.mxu0 %v3672_v22  ;;  %v1167_v37 = vsel %vm1164_vm13, %v1154_v61, %v1155_v38 }
 0x233   :  { %v1156_v18 = vrot.slane %v1147_v8, 4  ;;  %v1157_v48 = vrot.slane %v1147_v8, 7  ;;  %v1381_v50 = vadd.f32 %v1380_v27, %v1379_v45  ;;  %v1421_v39 = vrot.slane %v1420_v44, 4 }
 0x234   :  { %v1394_v58 = vrot.slane %v1393_v29, 4  ;;  %v1434_v26 = vsel %vm404_vm2, %v1417_v51, 0.0  ;;  %1651 = vmatpush.msrb.mxu0 %v3681_v2  ;;  %v1168_v60 = vsel %vm404_vm2, %v1163_v9, %v1167_v37  ;;  %v1431_v38 = vadd.f32 %v1430_v7, %v1429_v59  ;;  %v1280_v7 = vld [vmem:[%s3934_s10 + $0x40] sm:$0xff] }
 0x235   :  { %v1172_v22 = vsel %vm1169_vm15, %v1156_v18, %v1157_v48  ;;  %v1382_v17 = vrot.slane %v1381_v50, 2  ;;  %v1435_v56 = vrot.slane %v1434_v26, 4  ;;  %v1422_v21 = vadd.f32 %v1421_v39, %v1420_v44 }
 0x236   :  { %v1178_v62 = vsel %vm1177_vm4, %v1172_v22, %v1176_v23  ;;  %v1395_v15 = vadd.f32 %v1394_v58, %v1393_v29  ;;  %1652 = vmatpush.msrb.mxu0 %v3693_v3  ;;  %vm1407_vm13 = vcmask 517120   ;;  %v1418_v29 = vmul.f32 %v3755_v42, %v3755_v42 }
 0x237   :  { %v1180_v57 = vsel %vm1179_vm5, %v1168_v60, %v1178_v62  ;;  %v1383_v5 = vadd.f32 %v1382_v17, %v1381_v50  ;;  %v1436_v2 = vadd.f32 %v1435_v56, %v1434_v26  ;;  %v1325_v46 = vpop.f32.mrf.mxu2  ;;  %v1423_v41 = vrot.slane %v1422_v21, 2  ;;  %v4126_v60 = vld [vmem:[#allocation15_spill] sm:$0xff] }
 0x238   :  { %v1396_v32 = vrot.slane %v1395_v15, 2  ;;  %1653 = vmatpush.msrb.mxu0 %v3703_v12  ;;  %1192 = vst.msk [vmem:[%s3937_s13] sm:$0x7f] %vm1191_vm14, %v1180_v57  ;;  %v1441_v48 = vsel %vm404_vm2, %v1418_v29, 0.0  ;;  %vm1455_vm15 = vcmask 523264   ;;  %v1279_v46 = vld [vmem:[%s3934_s10 + $0x38] sm:$0xff] }
 0x239   :  { %v1384_v33 = vrot.slane %v1383_v5, 1  ;;  %v1437_v53 = vrot.slane %v1436_v2, 2  ;;  %v1351_v20 = vpop.f32.mrf.mxu0  ;;  %v1424_v43 = vadd.f32 %v1423_v41, %v1422_v21  ;;  %v1442_v26 = vrot.slane %v1441_v48, 4  ;;  %1737 = vmatpush.msrb.mxu2 %v1279_v46 }
 0x23a   :  { %v1397_v34 = vadd.f32 %v1396_v32, %v1395_v15  ;;  %1654 = vmatpush.msrb.mxu0 %v3711_v4  ;;  %v1281_v32 = vld [vmem:[%s3934_s10 + $0x48] sm:$0xff]  ;;  %v1274_v20 = vld [vmem:[%s3934_s10 + $0x10] sm:$0xff]  ;;  %vm1936_vm5 = vcmask 520196  }
 0x23b   :  { %v1438_v3 = vadd.f32 %v1437_v53, %v1436_v2  ;;  %v1385_v61 = vadd.f32 %v1384_v33, %v1383_v5  ;;  %v1425_v25 = vrot.slane %v1424_v43, 1  ;;  %v1443_v17 = vadd.f32 %v1442_v26, %v1441_v48  ;;  %v1272_v53 = vld [vmem:[%s3934_s10] sm:$0xff]  ;;  %1738 = vmatpush.msrb.mxu2 %v1274_v20  ;;  %vm1937_vm8 = vmor %vm1936_vm5, %vm3796_vm6 }
 0x23c   :  { %v1398_v45 = vrot.slane %v1397_v34, 1  ;;  %1655 = vmatpush.msrb.mxu0 %v3721_v55  ;;  %v1432_v55 = vrot.slane %v1431_v38, 1  ;;  %v1282_v48 = vld [vmem:[#allocation6] sm:$0x1] }
 0x23d   :  { %1475 = vmatmul.f32.vlgmr.msra.gmra.mxu3 %v1385_v61  ;;  %v1439_v12 = vrot.slane %v1438_v3, 1  ;;  %v1426_v8 = vadd.f32 %v1425_v25, %v1424_v43  ;;  %v1275_v43 = vld [vmem:[%s3934_s10 + $0x18] sm:$0xff]  ;;  %v1278_v61 = vld [vmem:[%s3934_s10 + $0x30] sm:$0xff] }
 0x23e   :  { %1622 = vmatpush.msra.mxu3 %v3302_v28  ;;  %v1399_v0 = vadd.f32 %v1398_v45, %v1397_v34  ;;  %1656 = vmatpush.msrb.mxu0 %v3729_v31  ;;  %v1433_v18 = vadd.f32 %v1432_v55, %v1431_v38  ;;  %v1276_v34 = vld [vmem:[%s3934_s10 + $0x20] sm:$0xff]  ;;  %v1273_v45 = vld [vmem:[%s3934_s10 + $0x8] sm:$0xff]  ;;  %v4127_v25 = vld [vmem:[#allocation13_spill] sm:$0xff] }
 0x23f   :  { %v3843_v27 = vpop.f32.mrf.mxu2  ;;  %v1440_v44 = vadd.f32 %v1439_v12, %v1438_v3  ;;  %1578 = vmatmul.f32.vlgmr.msra.gmra.mxu0 %v1426_v8 }
 0x240   :  { %v1408_v4 = vsel %vm1407_vm13, %v3843_v27, 0.0  ;;  %v1419_v59 = vmul.f32 %v3843_v27, %v3843_v27  ;;  %1515 = vmatmul.f32.vlgmr.msra.gmra.mxu1 %v1399_v0  ;;  %1623 = vmatpush.msra.mxu3 %v3314_v10 }
 0x241   :  { %v1409_v28 = vrot.slane %v1408_v4, 4  ;;  %1618 = vmatmul.f32.vlgmr.msra.gmra.mxu2 %v1440_v44  ;;  %1657 = vmatpush.msrb.mxu0 %v3739_v13 }
 0x242   :  { %v1448_v31 = vsel %vm1407_vm13, %v1419_v59, 0.0  ;;  %1624 = vmatpush.msra.mxu3 %v3347_v1  ;;  %1820 = vmatpush.msra.mxu2 %v1278_v61 }
 0x243   :  { %v1410_v51 = vadd.f32 %v1409_v28, %v1408_v4  ;;  %v1449_v37 = vrot.slane %v1448_v31, 4  ;;  %1777 = vmatpush.msra.mxu0 %v1281_v32 }
 0x244   :  { %1625 = vmatpush.msra.mxu3 %v3365_v30  ;;  %v1444_v30 = vrot.slane %v1443_v17, 2  ;;  %1821 = vmatpush.msra.mxu2 %v1273_v45 }
 0x245   :  { %v1411_v50 = vrot.slane %v1410_v51, 2  ;;  %v1450_v23 = vadd.f32 %v1449_v37, %v1448_v31  ;;  %1778 = vmatpush.msra.mxu0 %v1276_v34 }
 0x246   :  { %1626 = vmatpush.msra.mxu3 %v3383_v24  ;;  %v1445_v24 = vadd.f32 %v1444_v30, %v1443_v17 }
 0x247   :  { %v1412_v39 = vadd.f32 %v1411_v50, %v1410_v51  ;;  %v1451_v58 = vrot.slane %v1450_v23, 2  ;;  %v1377_v10 = vpop.f32.mrf.mxu2 }
 0x248   :  { %1598 = vmatmul.f32.vlgmr.msrb.gmra.mxu1 %v1433_v18  ;;  %1627 = vmatpush.msra.mxu3 %v3408_v63  ;;  %v1446_v63 = vrot.slane %v1445_v24, 1  ;;  %v1283_v10 = vld [vmem:[#allocation7] sm:$0x1] }
 0x249   :  { %v1413_v9 = vrot.slane %v1412_v39, 1  ;;  %v1452_v13 = vadd.f32 %v1451_v58, %v1450_v23 }
 0x24a   :  { %1628 = vmatpush.msra.mxu3 %v3432_v36  ;;  %v4125_v36 = vld [vmem:[#allocation38_spill] sm:$0xff] }
 0x24b   :  { %v1414_v22 = vadd.f32 %v1413_v9, %v1412_v39  ;;  %v1453_v1 = vrot.slane %v1452_v13, 1 }
 0x24c   :  { %1629 = vmatpush.msra.mxu3 %v3456_v11  ;;  %v1447_v11 = vadd.f32 %v1446_v63, %v1445_v24 }
 0x24d   :  { %v1454_v56 = vadd.f32 %v1453_v1, %v1452_v13  ;;  %2026 = vmatmul.msk.f32.vlgmr.msrb.gmra.mxu3 %vm1455_vm15, %v1414_v22 }
 0x24e   :  { %1630 = vmatpush.msra.mxu3 %v3480_v19 }
 0x24f   :  { %2027 = vmatmul.msk.f32.vlgmr.msrb.gmra.mxu0 %vm1455_vm15, %v1454_v56 }
 0x250   :  { %1631 = vmatpush.msra.mxu3 %v3504_v40  ;;  %1860 = vmatpush.msrb.mxu0 %v1280_v7 }
 0x252   :  { %1632 = vmatpush.msra.mxu3 %v3528_v49  ;;  %1861 = vmatpush.msrb.mxu0 %v1275_v43 }
 0x254   :  { %1633 = vmatpush.msra.mxu3 %v3549_v14 }
 0x256   :  { %1634 = vmatpush.msra.mxu3 %v3570_v54 }
 0x258   :  { %1635 = vmatpush.msra.mxu3 %v3591_v52  ;;  %v1277_v52 = vld [vmem:[%s3934_s10 + $0x28] sm:$0xff] }
 0x259   :  { %1697 = vmatpush.msra.mxu1 %v1277_v52 }
 0x25a   :  { %1636 = vmatpush.msra.mxu3 %v4125_v36 }
 0x25b   :  { %1698 = vmatpush.msra.mxu1 %v1272_v53 }
 0x25c   :  { %1637 = vmatpush.msra.mxu3 %v4126_v60 }
 0x25d   :  { %1638 = vmatmul.f32.vlgmr.msra.gmra.mxu3 %v1447_v11  ;;  %1717 = vmatpush.msrb.mxu1 %v1278_v61 }
 0x25e   :  { %1757 = vmatpush.msrb.mxu3 %v1280_v7 }
 0x25f   :  { %1718 = vmatpush.msrb.mxu1 %v1273_v45 }
 0x260   :  { %1758 = vmatpush.msrb.mxu3 %v1275_v43 }
 0x262   :  { %1840 = vmatpush.msra.mxu3 %v1279_v46 }
 0x264   :  { %1841 = vmatpush.msra.mxu3 %v1274_v20 }
 0x2ae   :  { %v1496_v62 = vpop.f32.mrf.mxu0 }
 0x2b3   :  { %v1536_v40 = vpop.f32.mrf.mxu2 }
 0x2bc   :  { %v1579_v14 = vpop.f32.mrf.mxu0 }
 0x2bd   :  { %v1516_v19 = vpop.f32.mrf.mxu1 }
 0x2c0   :  { %v1476_v21 = vpop.f32.mrf.mxu3 }
 0x2c1   :  { %v1497_v15 = vadd.f32 %v1496_v62, %v1476_v21 }
 0x2c3   :  { %v1517_v49 = vadd.f32 %v1516_v19, %v1497_v15 }
 0x2c4   :  { %v1619_v41 = vpop.f32.mrf.mxu2 }
 0x2c5   :  { %v1599_v57 = vpop.f32.mrf.mxu1  ;;  %v1537_v54 = vadd.f32 %v1536_v40, %v1517_v49 }
 0x2c6   :  { %v1600_v2 = vadd.f32 %v1599_v57, %v1579_v14 }
 0x2c8   :  { %v1620_v3 = vadd.f32 %v1619_v41, %v1600_v2 }
 0x2cc   :  { %v1659_v8 = vpop.f32.mrf.mxu0 }
 0x2d0   :  { %v1556_v5 = vpop.f32.mrf.mxu3 }
 0x2d1   :  { %v1557_v33 = vadd.f32 %v1556_v5, %v1537_v54 }
 0x2d3   :  { %v1662_v12 = vmul.f32 %v1557_v33, %v4127_v25 }
 0x2d5   :  { %v1664_v4 = vmul.f32 %v1662_v12, %v1662_v12 }
 0x2e0   :  { %v1639_v38 = vpop.f32.mrf.mxu3 }
 0x2e1   :  { %v1640_v0 = vadd.f32 %v1639_v38, %v1620_v3 }
 0x2e3   :  { %v1660_v44 = vadd.f32 %v1659_v8, %v1640_v0 }
 0x2e5   :  { %v1663_v59 = vmul.f32 %v1660_v44, %v4127_v25 }
 0x2e7   :  { %v1665_v55 = vsub.f32 %v1663_v59, %v1664_v4 }
 0x2e9   :  { %v1666_v29 = vadd.f32 1e-05, %v1665_v55 }
 0x2eb   :  { %2059 = vrsqrt.f32 %v1666_v29  ;;  %vm1673_vm1 = vweird.f32 %v1666_v29 }
 0x2f1   :  { %v2060_v28 = vpop.eup %2059 }
 0x2f2   :  { %v1668_v31 = vmul.f32 %v2060_v28, %v1666_v29  ;;  %vm1674_vm0 = vweird.f32 %v2060_v28 }
 0x2f3   :  { %vm1675_vm4 = vmor %vm1673_vm1, %vm1674_vm0 }
 0x2f4   :  { %v1669_v51 = vmul.f32 %v2060_v28, %v1668_v31 }
 0x2f6   :  { %v1670_v37 = vmul.f32 0.5, %v1669_v51 }
 0x2f8   :  { %v1671_v18 = vsub.f32 1.5, %v1670_v37 }
 0x2fa   :  { %v1672_v50 = vmul.f32 %v2060_v28, %v1671_v18 }
 0x2fc   :  { %v1676_v23 = vsel %vm1675_vm4, %v2060_v28, %v1672_v50 }
 0x2fd   :  { %v1677_v39 = vmul.f32 %v1676_v23, %v1282_v48 }
 0x2ff   :  { %2028 = vmatmul.msk.f32.vlgmr.msra.gmra.mxu1 %vm1310_vm10, %v1677_v39  ;;  %2030 = vmatmul.msk.f32.vlgmr.msrb.gmra.mxu2 %vm1310_vm10, %v1677_v39  ;;  %v1678_v58 = vmul.f32 %v1677_v39, %v1662_v12 }
 0x300   :  { %2031 = vmatmul.msk.f32.vlgmr.msrb.gmra.mxu3 %vm1310_vm10, %v1677_v39  ;;  %2032 = vmatmul.msk.f32.vlgmr.msra.gmra.mxu0 %vm1310_vm10, %v1677_v39 }
 0x301   :  { %1800 = vmatpush.msra.mxu1 %v1277_v52  ;;  %v1679_v26 = vsub.f32 %v1283_v10, %v1678_v58 }
 0x303   :  { %1801 = vmatpush.msra.mxu1 %v1272_v53 }
 0x307   :  { %2029 = vmatmul.msk.f32.vlgmr.msrb.gmra.mxu1 %vm1310_vm10, %v1677_v39  ;;  %2034 = vmatmul.msk.f32.vlgmr.msra.gmra.mxu2 %vm1310_vm10, %v1679_v26 }
 0x308   :  { %2035 = vmatmul.msk.f32.vlgmr.msra.gmra.mxu3 %vm1310_vm10, %v1679_v26  ;;  %2036 = vmatmul.msk.f32.vlgmr.msrb.gmra.mxu0 %vm1310_vm10, %v1679_v26 }
 0x309   :  { %1880 = vmatpush.msrb.mxu1 %v1281_v32 }
 0x30b   :  { %1881 = vmatpush.msrb.mxu1 %v1276_v34 }
 0x30f   :  { %2033 = vmatmul.msk.f32.vlgmr.msra.gmra.mxu1 %vm1310_vm10, %v1679_v26 }
 0x317   :  { %2037 = vmatmul.msk.f32.vlgmr.msrb.gmra.mxu1 %vm1310_vm10, %v1679_v26  ;;  %vm1930_vm10 = vcmask 1044483  }
 0x37c   :  { %v1700_v9 = vpop.f32.mrf.mxu1 }
 0x37d   :  { %v1780_v13 = vpop.f32.mrf.mxu0  ;;  %v1886_v56 = vperm.slane %v1700_v9, 0 }
 0x37e   :  { %v1890_v52 = vperm.slane %v1780_v13, 0 }
 0x37f   :  { %v1891_v21 = vmul.f32 %v1886_v56, %v3800_v6 }
 0x380   :  { %v1895_v53 = vmul.f32 %v1890_v52, %v3843_v27 }
 0x382   :  { %v1740_v22 = vpop.f32.mrf.mxu2 }
 0x383   :  { %v1760_v1 = vpop.f32.mrf.mxu3  ;;  %v1888_v24 = vperm.slane %v1740_v22, 0 }
 0x384   :  { %v1720_v17 = vpop.f32.mrf.mxu1  ;;  %v1889_v36 = vperm.slane %v1760_v1, 0 }
 0x385   :  { %v1887_v30 = vperm.slane %v1720_v17, 0  ;;  %v1863_v19 = vpop.f32.mrf.mxu0  ;;  %v1893_v57 = vmul.f32 %v1888_v24, %v3813_v47 }
 0x386   :  { %v1894_v5 = vmul.f32 %v1889_v36, %v3755_v42  ;;  %v1899_v14 = vperm.slane %v1863_v19, 0 }
 0x387   :  { %v1892_v40 = vmul.f32 %v1887_v30, %v3758_v16 }
 0x388   :  { %v1904_v41 = vadd.f32 %v1899_v14, %v1894_v5 }
 0x38a   :  { %v1823_v63 = vpop.f32.mrf.mxu2  ;;  %v1909_v43 = vmax.f32 %v1904_v41, 0.0 }
 0x38b   :  { %v1897_v11 = vperm.slane %v1823_v63, 0  ;;  %v1843_v60 = vpop.f32.mrf.mxu3 }
 0x38c   :  { %v1803_v62 = vpop.f32.mrf.mxu1  ;;  %v1898_v15 = vperm.slane %v1843_v60, 0 }
 0x38d   :  { %v1896_v49 = vperm.slane %v1803_v62, 0  ;;  %v1902_v2 = vadd.f32 %v1897_v11, %v1892_v40 }
 0x38e   :  { %v1903_v46 = vadd.f32 %v1898_v15, %v1893_v57 }
 0x38f   :  { %v1901_v54 = vadd.f32 %v1896_v49, %v1891_v21  ;;  %v1907_v32 = vmax.f32 %v1902_v2, 0.0 }
 0x390   :  { %v1908_v6 = vmax.f32 %v1903_v46, 0.0 }
 0x391   :  { %v1906_v7 = vmax.f32 %v1901_v54, 0.0 }
 0x392   :  { %v1912_v3 = vpack.c.bf16 %v1909_v43, %v1908_v6 }
 0x393   :  { %v1911_v20 = vpack.c.bf16 %v1907_v32, %v1906_v7 }
 0x394   :  { %v1883_v33 = vpop.f32.mrf.mxu1  ;;  %v1919_v38 = vrot.slane %v1912_v3, 1  ;;  %v1918_v0 = vrot.slane %v1912_v3, 6 }
 0x395   :  { %v1900_v16 = vperm.slane %v1883_v33, 0  ;;  %v1917_v47 = vrot.slane %v1911_v20, 3 }
 0x397   :  { %v1905_v34 = vadd.f32 %v1900_v16, %v1895_v53  ;;  %v1924_v45 = vsel %vm1160_vm11, %v1911_v20, %v1917_v47 }
 0x398   :  { %v1926_v8 = vsel %vm404_vm2, %v1924_v45, %v1918_v0 }
 0x399   :  { %v1910_v61 = vmax.f32 %v1905_v34, 0.0 }
 0x39b   :  { %v1913_v42 = vpack.c.bf16 %v1910_v61, %v1910_v61 }
 0x39d   :  { %v1920_v25 = vrot.slane %v1913_v42, 4  ;;  %v1921_v12 = vrot.slane %v1913_v42, 7 }
 0x39f   :  { %v1929_v27 = vsel %vm1185_vm3, %v1919_v38, %v1920_v25 }
 0x3a0   :  { %v1932_v44 = vsel %vm1930_vm10, %v1929_v27, %v1921_v12 }
 0x3a1   :  { %v1934_v4 = vsel %vm1933_vm7, %v1926_v8, %v1932_v44 }
 0x3a2   :  { %1938 = vst.msk [vmem:[%s3938_s14] sm:$0x1f] %vm1937_vm8, %v1934_v4 }
 0x3a3   :  { %1947 = vsyncpa [#allocation3], 1 }
 0x3a4   :  { %1948 = vsyncpa [#allocation5], 1 }
 0x3a5   :  { %1949 = vsyncpa [#allocation8], 1 }

// kernel: decoder_forward.6
= control target key start
LH: loop header
LB: loop body
LE: loop exit
PB: predicated region body
PF: predicated region fallthrough
CT: control target
= control target key end

     0   :  { %vm289_vm0 = vcmask 1043456   ;;  %vm290_vm1 = vcmask 1044480   ;;  %v760_v3 = vmov 65535   ;;  %vm118_vm2 = vcmask 130048   ;;  %s1040_s0 = inlined_call_operand.vmem [shape: bf16[144,128], index: 0, kind: input, shape index: {}]   ;;  %s1041_s2 = inlined_call_operand.vmem [shape: bf16[217,128], index: 2, kind: input, shape index: {}]   ;;  %s1042_s1 = inlined_call_operand.vmem [shape: bf16[32,144], index: 1, kind: input, shape index: {}]   ;;  %s1043_s3 = inlined_call_operand.vmem [shape: bf16[16,217], index: 3, kind: input, shape index: {}]   ;;  %s1044_s4 = inlined_call_operand.vmem [shape: f32[48,1], index: 4, kind: input, shape index: {}]   ;;  %s1045_s5 = inlined_call_operand.vmem [shape: f32[48,1], index: 5, kind: input, shape index: {}]   ;;  %s1046_s6 = inlined_call_operand.vmem [shape: bf16[48,128], index: 6, kind: output, shape index: {}]  }
   0x1   :  { %v705_v0 = vld [vmem:[%s1040_s0 + $0x38] sm:$0xff]  ;;  %v691_v2 = vld [vmem:[%s1041_s2 + $0x68] sm:$0xf]  ;;  %v291_v4 = vsel %vm289_vm0, 4294967295, %v760_v3  ;;  %v722_v5 = vld [vmem:[%s1041_s2 + $0x68] sm:$0x10] }
   0x2   :  { %v716_v1 = vld [vmem:[%s1041_s2 + $0x38] sm:$0xff]  ;;  %v292_v6 = vsel %vm290_vm1, %v291_v4, 0  ;;  %125 = vmatpush.bf16.msra.mxu0 %v705_v0  ;;  %v692_v7 = vor.u32 %v722_v5, %v691_v2  ;;  %v704_v8 = vld [vmem:[%s1040_s0 + $0x30] sm:$0xff]  ;;  %v721_v11 = vld [vmem:[%s1041_s2 + $0x60] sm:$0xff]  ;;  %vm285_vm3 = vcmask 728064  }
   0x3   :  { %296 = vmatpush.bf16.msra.mxu2 %v716_v1  ;;  %v715_v9 = vld [vmem:[%s1041_s2 + $0x30] sm:$0xff]  ;;  %v703_v12 = vld [vmem:[%s1040_s0 + $0x28] sm:$0xff]  ;;  %v706_v14 = vld [vmem:[%s1040_s0 + $0x40] sm:$0xff] }
   0x4   :  { %v294_v10 = vand.u32 %v692_v7, %v292_v6  ;;  %v714_v13 = vld [vmem:[%s1041_s2 + $0x28] sm:$0xff]  ;;  %v694_v15 = vld [vmem:[%s1042_s1 + $0x4] sm:$0xf]  ;;  %151 = vmatpush.bf16.msra.mxu1 %v706_v14  ;;  %v720_v17 = vld [vmem:[%s1041_s2 + $0x58] sm:$0xff]  ;;  %v761_v7 = vmov 72.0  }
   0x5   :  { %v579_v16 = vld [vmem:[%s1042_s1 + $0x8] sm:$0xf0]  ;;  %v702_v18 = vld [vmem:[%s1040_s0 + $0x20] sm:$0xff]  ;;  %v719_v21 = vld [vmem:[%s1041_s2 + $0x50] sm:$0xff]  ;;  %746 = vrcp.f32 %v761_v7 }
   0x6   :  { %312 = vmatpush.bf16.msra.mxu3 %v294_v10  ;;  %126 = vmatpush.bf16.msra.mxu0 %v704_v8  ;;  %v582_v19 = vor.u32 %v694_v15, %v579_v16  ;;  %v713_v20 = vld [vmem:[%s1041_s2 + $0x20] sm:$0xff]  ;;  %v701_v22 = vld [vmem:[%s1040_s0 + $0x18] sm:$0xff]  ;;  %v718_v24 = vld [vmem:[%s1041_s2 + $0x48] sm:$0xff] }
   0x7   :  { %297 = vmatpush.bf16.msra.mxu2 %v715_v9  ;;  %v712_v23 = vld [vmem:[%s1041_s2 + $0x18] sm:$0xff]  ;;  %v700_v25 = vld [vmem:[%s1040_s0 + $0x10] sm:$0xff]  ;;  %v717_v27 = vld [vmem:[%s1041_s2 + $0x40] sm:$0xff] }
   0x8   :  { %627 = vmatmul.msk.bf16.vlgmr.msra.gmra.mxu1 %vm118_vm2, %v582_v19  ;;  %v711_v26 = vld [vmem:[%s1041_s2 + $0x10] sm:$0xff]  ;;  %v587_v29 = vld [vmem:[%s1042_s1 + $0x18] sm:$0xf0]  ;;  %v699_v30 = vld [vmem:[%s1040_s0 + $0x8] sm:$0xff] }
   0x9   :  { %v696_v28 = vld [vmem:[%s1042_s1 + $0x14] sm:$0xf]  ;;  %v707_v31 = vld [vmem:[%s1043_s3 + $0x4] sm:$0xf]  ;;  %v633_v32 = vld [vmem:[%s1043_s3 + $0x8] sm:$0xf0] }
   0xa   :  { %313 = vmatpush.bf16.msra.mxu3 %v721_v11  ;;  %127 = vmatpush.bf16.msra.mxu0 %v703_v12  ;;  %v710_v33 = vld [vmem:[%s1041_s2 + $0x8] sm:$0xff]  ;;  %v590_v34 = vor.u32 %v696_v28, %v587_v29  ;;  %v636_v35 = vor.u32 %v707_v31, %v633_v32  ;;  %v698_v36 = vld [vmem:[%s1040_s0] sm:$0xff]  ;;  %v585_v44 = vld [vmem:[%s1042_s1 + $0x10] sm:$0xf] }
   0xb   :  { %298 = vmatpush.bf16.msra.mxu2 %v714_v13  ;;  %v577_v37 = vld [vmem:[%s1042_s1] sm:$0xf]  ;;  %v695_v38 = vld [vmem:[%s1042_s1 + $0x4] sm:$0xf0]  ;;  %v697_v45 = vld [vmem:[%s1042_s1 + $0x14] sm:$0xf0]  ;;  %v747_v8 = vpop.eup %746 }
   0xc   :  { %v709_v39 = vld [vmem:[%s1041_s2] sm:$0xff]  ;;  %v708_v41 = vld [vmem:[%s1043_s3 + $0x4] sm:$0xf0]  ;;  %v578_v42 = vor.u32 %v695_v38, %v577_v37  ;;  %v586_v46 = vor.u32 %v697_v45, %v585_v44  ;;  %v353_v9 = vmul.f32 72.0, %v747_v8  ;;  %vm357_vm4 = vweird.f32 %v747_v8 }
   0xd   :  { %v631_v40 = vld [vmem:[%s1043_s3] sm:$0xf]  ;;  %v762_v13 = vmov 0  }
   0xe   :  { %314 = vmatpush.bf16.msra.mxu3 %v720_v17  ;;  %128 = vmatpush.bf16.msra.mxu0 %v702_v18  ;;  %v632_v43 = vor.u32 %v708_v41, %v631_v40  ;;  %v354_v10 = vsub.f32 1.0, %v353_v9  ;;  %v324_v41 = vld [vmem:[%s1044_s4] sm:$0xff] }
   0xf   :  { %299 = vmatpush.bf16.msra.mxu2 %v713_v20  ;;  %743 = vset.pattern.permute.xlu0 %v762_v13 }
  0x10   :  { %v355_v11 = vmul.f32 %v747_v8, %v354_v10  ;;  %744 = vset.pattern.permute.xlu1 %v762_v13  ;;  %745 = vset.pattern.permute.xlu2 %v762_v13 }
  0x12   :  { %315 = vmatpush.bf16.msra.mxu3 %v719_v21  ;;  %129 = vmatpush.bf16.msra.mxu0 %v701_v22  ;;  %v356_v12 = vadd.f32 %v747_v8, %v355_v11 }
  0x13   :  { %300 = vmatpush.bf16.msra.mxu2 %v712_v23 }
  0x14   :  { %v938_v14 = vsel %vm357_vm4, %v747_v8, %v356_v12 }
  0x16   :  { %316 = vmatpush.bf16.msra.mxu3 %v718_v24  ;;  %130 = vmatpush.bf16.msra.mxu0 %v700_v25 }
  0x17   :  { %301 = vmatpush.bf16.msra.mxu2 %v711_v26 }
  0x18   :  { %628 = vmatmul.msk.bf16.gmra.mxu1 %vm118_vm2, %v590_v34 }
  0x1a   :  { %317 = vmatpush.bf16.msra.mxu3 %v717_v27  ;;  %131 = vmatpush.bf16.msra.mxu0 %v699_v30 }
  0x1b   :  { %302 = vmatpush.bf16.msra.mxu2 %v710_v33 }
  0x1d   :  { %693 = vmatmul.msk.bf16.vlgmr.msra.gmra.mxu3 %vm285_vm3, %v636_v35 }
  0x1e   :  { %132 = vmatpush.bf16.msra.mxu0 %v698_v36 }
  0x1f   :  { %303 = vmatpush.bf16.msra.mxu2 %v709_v39 }
  0x21   :  { %133 = vmatmul.bf16.vlgmr.msra.gmra.mxu0 %v578_v42 }
  0x22   :  { %304 = vmatmul.bf16.vlgmr.msra.gmra.mxu2 %v632_v43 }
  0x31   :  { %138 = vmatmul.bf16.gmra.mxu0 %v586_v46 }
  0x85   :  { %v153_v47 = vpop.f32.mrf.mxu1 }
  0x8d   :  { %v155_v51 = vpop.f32.mrf.mxu1 }
  0x95   :  { %v158_v58 = vpop.f32.mrf.mxu1 }
  0x9d   :  { %v160_v1 = vpop.f32.mrf.mxu1 }
  0x9e   :  { %v134_v48 = vpop.f32.mrf.mxu0 }
  0x9f   :  { %v908_v49 = vadd.f32 %v153_v47, %v134_v48 }
  0xa0   :  { %v319_v52 = vpop.f32.mrf.mxu3 }
  0xa1   :  { %332 = vadd.xlane.f32.xlu0 %v908_v49  ;;  %v340_v50 = vmul.f32 %v908_v49, %v908_v49 }
  0xa3   :  { %344 = vadd.xlane.f32.xlu2 %v340_v50 }
  0xa5   :  { %v305_v53 = vpop.f32.mrf.mxu2 }
  0xa6   :  { %v136_v54 = vpop.f32.mrf.mxu0  ;;  %v913_v55 = vadd.f32 %v319_v52, %v305_v53 }
  0xa7   :  { %v915_v56 = vadd.f32 %v155_v51, %v136_v54  ;;  %v328_v51 = vld [vmem:[%s1045_s5] sm:$0xff] }
  0xa8   :  { %v321_v59 = vpop.f32.mrf.mxu3  ;;  %v499_v6 = vmul.f32 %v913_v55, %v913_v55 }
  0xa9   :  { %495 = vadd.xlane.f32.xlu0 %v913_v55  ;;  %v341_v57 = vmul.f32 %v915_v56, %v915_v56 }
  0xab   :  { %346 = vadd.xlane.f32.xlu2 %v341_v57 }
  0xad   :  { %v307_v60 = vpop.f32.mrf.mxu2 }
  0xae   :  { %v920_v61 = vadd.f32 %v321_v59, %v307_v60  ;;  %v139_v62 = vpop.f32.mrf.mxu0 }
  0xaf   :  { %v922_v63 = vadd.f32 %v158_v58, %v139_v62 }
  0xb0   :  { %497 = vadd.xlane.f32.xlu1 %v920_v61  ;;  %v500_v4 = vmul.f32 %v920_v61, %v920_v61 }
  0xb1   :  { %334 = vadd.xlane.f32.xlu0 %v915_v56  ;;  %v342_v0 = vmul.f32 %v922_v63, %v922_v63 }
  0xb3   :  { %348 = vadd.xlane.f32.xlu2 %v342_v0 }
  0xb6   :  { %v141_v2 = vpop.f32.mrf.mxu0 }
  0xb7   :  { %v928_v3 = vadd.f32 %v160_v1, %v141_v2 }
  0xb8   :  { %336 = vadd.xlane.f32.xlu1 %v922_v63 }
  0xb9   :  { %v343_v5 = vmul.f32 %v928_v3, %v928_v3 }
  0xbb   :  { %503 = vadd.xlane.f32.xlu2 %v500_v4  ;;  %350 = vadd.xlane.f32.xlu0 %v343_v5 }
  0xc0   :  { %338 = vadd.xlane.f32.xlu1 %v928_v3 }
  0xc8   :  { %501 = vadd.xlane.f32.xlu1 %v499_v6 }
 0x114   :  { %v333_v15 = vpop.xlane.xlu0 %332 }
 0x115   :  { %v359_v16 = vmul.f32 %v938_v14, %v333_v15 }
 0x116   :  { %v345_v17 = vpop.xlane.xlu2 %344 }
 0x117   :  { %v367_v18 = vmul.f32 %v359_v16, %v359_v16  ;;  %v363_v19 = vmul.f32 %v938_v14, %v345_v17  ;;  %v325_v17 = vld [vmem:[%s1044_s4 + $0x8] sm:$0xff] }
 0x119   :  { %v371_v20 = vsub.f32 %v363_v19, %v367_v18 }
 0x11b   :  { %v375_v21 = vadd.f32 1e-05, %v371_v20 }
 0x11c   :  { %v496_v22 = vpop.xlane.xlu0 %495 }
 0x11d   :  { %748 = vrsqrt.f32 %v375_v21  ;;  %vm385_vm5 = vweird.f32 %v375_v21  ;;  %v973_v4 = vmul.f32 %v496_v22, %v938_v14 }
 0x11e   :  { %v347_v23 = vpop.xlane.xlu2 %346 }
 0x11f   :  { %v364_v31 = vmul.f32 %v938_v14, %v347_v23  ;;  %v509_v12 = vmul.f32 %v973_v4, %v973_v4 }
 0x123   :  { %v749_v24 = vpop.eup %748  ;;  %v498_v25 = vpop.xlane.xlu1 %497 }
 0x124   :  { %v380_v26 = vmul.f32 %v749_v24, %v375_v21  ;;  %v335_v27 = vpop.xlane.xlu0 %334  ;;  %vm386_vm6 = vweird.f32 %v749_v24  ;;  %v949_v36 = vmul.f32 %v498_v25, %v938_v14 }
 0x125   :  { %v943_v28 = vmul.f32 %v938_v14, %v335_v27  ;;  %vm387_vm7 = vmor %vm385_vm5, %vm386_vm6 }
 0x126   :  { %v381_v29 = vmul.f32 %v749_v24, %v380_v26  ;;  %v349_v30 = vpop.xlane.xlu2 %348  ;;  %v510_v46 = vmul.f32 %v949_v36, %v949_v36 }
 0x127   :  { %v368_v32 = vmul.f32 %v943_v28, %v943_v28  ;;  %v365_v39 = vmul.f32 %v938_v14, %v349_v30 }
 0x128   :  { %v382_v33 = vmul.f32 0.5, %v381_v29 }
 0x129   :  { %v372_v34 = vsub.f32 %v364_v31, %v368_v32  ;;  %v326_v31 = vld [vmem:[%s1044_s4 + $0x10] sm:$0xff] }
 0x12a   :  { %v383_v35 = vsub.f32 1.5, %v382_v33 }
 0x12b   :  { %v376_v37 = vadd.f32 1e-05, %v372_v34  ;;  %v337_v38 = vpop.xlane.xlu1 %336 }
 0x12c   :  { %v953_v40 = vmul.f32 %v938_v14, %v337_v38  ;;  %v384_v42 = vmul.f32 %v749_v24, %v383_v35 }
 0x12d   :  { %750 = vrsqrt.f32 %v376_v37  ;;  %vm395_vm9 = vweird.f32 %v376_v37 }
 0x12e   :  { %v369_v43 = vmul.f32 %v953_v40, %v953_v40  ;;  %v504_v44 = vpop.xlane.xlu2 %503  ;;  %v388_v45 = vsel %vm387_vm7, %v749_v24, %v384_v42  ;;  %v351_v0 = vpop.xlane.xlu0 %350 }
 0x12f   :  { %v508_v47 = vmul.f32 %v504_v44, %v938_v14  ;;  %v419_v48 = vmul.f32 %v388_v45, %v324_v41  ;;  %v366_v5 = vmul.f32 %v938_v14, %v351_v0 }
 0x130   :  { %v373_v50 = vsub.f32 %v365_v39, %v369_v43  ;;  %v330_v39 = vld [vmem:[%s1045_s5 + $0x10] sm:$0xff] }
 0x131   :  { %v512_v52 = vsub.f32 %v508_v47, %v510_v46  ;;  %433 = vperm.xlu0 %743, %v419_v48   ;;  %v423_v53 = vmul.f32 %v419_v48, %v359_v16 }
 0x132   :  { %v377_v54 = vadd.f32 1e-05, %v373_v50  ;;  %v327_v50 = vld [vmem:[%s1044_s4 + $0x18] sm:$0xff] }
 0x133   :  { %v751_v57 = vpop.eup %750  ;;  %v966_v58 = vadd.f32 1e-05, %v512_v52  ;;  %v339_v59 = vpop.xlane.xlu1 %338  ;;  %v427_v60 = vsub.f32 %v328_v51, %v423_v53 }
 0x134   :  { %v390_v62 = vmul.f32 %v751_v57, %v376_v37  ;;  %752 = vrsqrt.f32 %v377_v54  ;;  %v970_v1 = vmul.f32 %v938_v14, %v339_v59  ;;  %vm396_vm8 = vweird.f32 %v751_v57 }
 0x135   :  { %754 = vrsqrt.f32 %v966_v58  ;;  %457 = vperm.xlu1 %744, %v427_v60   ;;  %vm397_vm10 = vmor %vm395_vm9, %vm396_vm8  ;;  %vm405_vm12 = vweird.f32 %v377_v54  ;;  %vm531_vm1 = vweird.f32 %v966_v58  ;;  %v331_v60 = vld [vmem:[%s1045_s5 + $0x18] sm:$0xff] }
 0x136   :  { %v391_v2 = vmul.f32 %v751_v57, %v390_v62  ;;  %v370_v6 = vmul.f32 %v970_v1, %v970_v1 }
 0x138   :  { %v392_v7 = vmul.f32 0.5, %v391_v2  ;;  %v374_v8 = vsub.f32 %v366_v5, %v370_v6 }
 0x13a   :  { %v753_v9 = vpop.eup %752  ;;  %v393_v10 = vsub.f32 1.5, %v392_v7  ;;  %v378_v15 = vadd.f32 1e-05, %v374_v8 }
 0x13b   :  { %v978_v11 = vpop.eup %754  ;;  %v400_v13 = vmul.f32 %v753_v9, %v377_v54  ;;  %v502_v16 = vpop.xlane.xlu1 %501  ;;  %vm406_vm11 = vweird.f32 %v753_v9 }
 0x13c   :  { %v394_v18 = vmul.f32 %v751_v57, %v393_v10  ;;  %v526_v19 = vmul.f32 %v978_v11, %v966_v58  ;;  %v507_v20 = vmul.f32 %v502_v16, %v938_v14  ;;  %756 = vrsqrt.f32 %v378_v15  ;;  %vm407_vm13 = vmor %vm405_vm12, %vm406_vm11  ;;  %v491_v58 = vld [vmem:[%s1044_s4 + $0x20] sm:$0xff]  ;;  %v329_v10 = vld [vmem:[%s1045_s5 + $0x8] sm:$0xff] }
 0x13d   :  { %v401_v21 = vmul.f32 %v753_v9, %v400_v13  ;;  %vm532_vm15 = vweird.f32 %v978_v11  ;;  %vm415_vm0 = vweird.f32 %v378_v15 }
 0x13e   :  { %v398_v22 = vsel %vm397_vm10, %v751_v57, %v394_v18  ;;  %v511_v23 = vsub.f32 %v507_v20, %v509_v12  ;;  %v527_v26 = vmul.f32 %v978_v11, %v526_v19  ;;  %vm533_vm3 = vmor %vm531_vm1, %vm532_vm15  ;;  %v492_v57 = vld [vmem:[%s1044_s4 + $0x28] sm:$0xff] }
 0x13f   :  { %v420_v24 = vmul.f32 %v398_v22, %v325_v17  ;;  %v402_v25 = vmul.f32 0.5, %v401_v21 }
 0x140   :  { %v513_v27 = vadd.f32 1e-05, %v511_v23  ;;  %v528_v32 = vmul.f32 0.5, %v527_v26 }
 0x141   :  { %v403_v29 = vsub.f32 1.5, %v402_v25  ;;  %438 = vperm.xlu1 %744, %v420_v24  }
 0x142   :  { %758 = vrsqrt.f32 %v513_v27  ;;  %v757_v30 = vpop.eup %756  ;;  %v529_v38 = vsub.f32 1.5, %v528_v32  ;;  %vm521_vm5 = vweird.f32 %v513_v27 }
 0x143   :  { %v404_v14 = vmul.f32 %v753_v9, %v403_v29  ;;  %v410_v33 = vmul.f32 %v757_v30, %v378_v15  ;;  %vm416_vm14 = vweird.f32 %v757_v30 }
 0x144   :  { %v530_v48 = vmul.f32 %v978_v11, %v529_v38  ;;  %vm417_vm2 = vmor %vm415_vm0, %vm416_vm14 }
 0x145   :  { %v408_v34 = vsel %vm407_vm13, %v753_v9, %v404_v14  ;;  %v411_v37 = vmul.f32 %v757_v30, %v410_v33  ;;  %v424_v9 = vmul.f32 %v420_v24, %v943_v28  ;;  %v494_v28 = vld [vmem:[%s1045_s5 + $0x28] sm:$0xff] }
 0x146   :  { %v421_v35 = vmul.f32 %v408_v34, %v326_v31  ;;  %v534_v59 = vsel %vm533_vm3, %v978_v11, %v530_v48 }
 0x147   :  { %v412_v43 = vmul.f32 0.5, %v411_v37  ;;  %v536_v2 = vmul.f32 %v534_v59, %v492_v57  ;;  %v428_v12 = vsub.f32 %v329_v10, %v424_v9 }
 0x148   :  { %v759_v41 = vpop.eup %758  ;;  %v425_v42 = vmul.f32 %v421_v35, %v953_v40 }
 0x149   :  { %v516_v44 = vmul.f32 %v759_v41, %v513_v27  ;;  %v413_v45 = vsub.f32 1.5, %v412_v43  ;;  %vm522_vm4 = vweird.f32 %v759_v41  ;;  %v538_v13 = vmul.f32 %v536_v2, %v949_v36 }
 0x14a   :  { %v429_v46 = vsub.f32 %v330_v39, %v425_v42  ;;  %vm523_vm6 = vmor %vm521_vm5, %vm522_vm4 }
 0x14b   :  { %v517_v47 = vmul.f32 %v759_v41, %v516_v44  ;;  %v414_v51 = vmul.f32 %v757_v30, %v413_v45 }
 0x14c   :  { %467 = vperm.xlu1 %744, %v429_v46  }
 0x14d   :  { %v518_v40 = vmul.f32 0.5, %v517_v47  ;;  %v418_v52 = vsel %vm417_vm2, %v757_v30, %v414_v51 }
 0x14e   :  { %v422_v53 = vmul.f32 %v418_v52, %v327_v50 }
 0x14f   :  { %v519_v54 = vsub.f32 1.5, %v518_v40 }
 0x150   :  { %v426_v62 = vmul.f32 %v422_v53, %v970_v1  ;;  %v493_v1 = vld [vmem:[%s1045_s5 + $0x20] sm:$0xff] }
 0x151   :  { %v520_v0 = vmul.f32 %v759_v41, %v519_v54 }
 0x152   :  { %v430_v5 = vsub.f32 %v331_v60, %v426_v62 }
 0x153   :  { %v524_v6 = vsel %vm523_vm6, %v759_v41, %v520_v0 }
 0x154   :  { %548 = vperm.xlu1 %744, %v536_v2   ;;  %v535_v7 = vmul.f32 %v524_v6, %v491_v58  ;;  %472 = vperm.xlu0 %743, %v430_v5  }
 0x156   :  { %543 = vperm.xlu2 %745, %v535_v7   ;;  %v537_v8 = vmul.f32 %v535_v7, %v973_v4  ;;  %v540_v4 = vsub.f32 %v494_v28, %v538_v13 }
 0x158   :  { %v539_v11 = vsub.f32 %v493_v1, %v537_v8 }
 0x15c   :  { %555 = vperm.xlu0 %743, %v539_v11  }
 0x15e   :  { %462 = vperm.xlu2 %745, %v428_v12  }
 0x166   :  { %443 = vperm.xlu2 %745, %v421_v35  }
 0x16e   :  { %448 = vperm.xlu2 %745, %v422_v53  }
 0x176   :  { %560 = vperm.xlu2 %745, %v540_v4  }
 0x1a3   :  { %v434_v17 = vpop.permute.xlu0 %433 }
 0x1a4   :  { %v451_v19 = vmul.f32 %v434_v17, %v908_v49 }
 0x1a7   :  { %v458_v15 = vpop.permute.xlu1 %457 }
 0x1a8   :  { %v475_v20 = vadd.f32 %v458_v15, %v451_v19 }
 0x1aa   :  { %v479_v24 = vmax.f32 %v475_v20, 0.0 }
 0x1b0   :  { %v544_v16 = vpop.permute.xlu2 %543 }
 0x1b1   :  { %v551_v35 = vmul.f32 %v544_v16, %v913_v55 }
 0x1b3   :  { %v439_v18 = vpop.permute.xlu1 %438 }
 0x1b4   :  { %v452_v21 = vmul.f32 %v439_v18, %v915_v56 }
 0x1b8   :  { %v463_v22 = vpop.permute.xlu2 %462 }
 0x1b9   :  { %v476_v23 = vadd.f32 %v463_v22, %v452_v21 }
 0x1bb   :  { %v480_v25 = vmax.f32 %v476_v23, 0.0 }
 0x1bd   :  { %v726_v36 = vpack.c.bf16 %v480_v25, %v479_v24 }
 0x1be   :  { %v468_v27 = vpop.permute.xlu1 %467 }
 0x1bf   :  { %727 = vst [vmem:[%s1046_s6] sm:$0xff] %v726_v36  }
 0x1c0   :  { %v444_v26 = vpop.permute.xlu2 %443 }
 0x1c1   :  { %v453_v29 = vmul.f32 %v444_v26, %v922_v63 }
 0x1c3   :  { %v477_v14 = vadd.f32 %v468_v27, %v453_v29 }
 0x1c5   :  { %v481_v33 = vmax.f32 %v477_v14, 0.0 }
 0x1c6   :  { %v473_v30 = vpop.permute.xlu0 %472  ;;  %v549_v56 = vpop.permute.xlu1 %548 }
 0x1c7   :  { %v552_v37 = vmul.f32 %v549_v56, %v920_v61 }
 0x1c8   :  { %v449_v31 = vpop.permute.xlu2 %448 }
 0x1c9   :  { %v454_v49 = vmul.f32 %v449_v31, %v928_v3 }
 0x1cb   :  { %v478_v32 = vadd.f32 %v473_v30, %v454_v49 }
 0x1cd   :  { %v482_v34 = vmax.f32 %v478_v32, 0.0 }
 0x1ce   :  { %v556_v39 = vpop.permute.xlu0 %555 }
 0x1cf   :  { %v731_v38 = vpack.c.bf16 %v482_v34, %v481_v33  ;;  %v563_v41 = vadd.f32 %v556_v39, %v551_v35 }
 0x1d0   :  { %v561_v42 = vpop.permute.xlu2 %560 }
 0x1d1   :  { %738 = vst [vmem:[%s1046_s6 + $0x8] sm:$0xff] %v731_v38   ;;  %v564_v63 = vadd.f32 %v561_v42, %v552_v37  ;;  %v565_v43 = vmax.f32 %v563_v41, 0.0 }
 0x1d3   :  { %v566_v44 = vmax.f32 %v564_v63, 0.0 }
 0x1d5   :  { %v736_v3 = vpack.c.bf16 %v566_v44, %v565_v43 }
 0x1d7   :  { %739 = vst [vmem:[%s1046_s6 + $0x10] sm:$0xff] %v736_v3  }

// kernel: decoder_forward.7
= control target key start
LH: loop header
LB: loop body
LE: loop exit
PB: predicated region body
PF: predicated region fallthrough
CT: control target
= control target key end

     0   :  { %vm266_vm0 = vcmask 1045504   ;;  %vm262_vm1 = vcmask 97280   ;;  %vm491_vm2 = vcmask 1043456   ;;  %vm487_vm3 = vcmask 64512   ;;  %s1900_s0 = inlined_call_operand.vmem [shape: bf16[396,128], index: 0, kind: input, shape index: {}]   ;;  %s1901_s2 = inlined_call_operand.vmem [shape: bf16[264,128], index: 2, kind: input, shape index: {}]   ;;  %s1902_s1 = inlined_call_operand.vmem [shape: bf16[16,396], index: 1, kind: input, shape index: {}]   ;;  %s1903_s4 = inlined_call_operand.vmem [shape: bf16[264,128], index: 4, kind: input, shape index: {}]   ;;  %s1904_s3 = inlined_call_operand.vmem [shape: bf16[16,264], index: 3, kind: input, shape index: {}]   ;;  %s1905_s6 = inlined_call_operand.vmem [shape: bf16[176,128], index: 6, kind: input, shape index: {}]   ;;  %s1906_s5 = inlined_call_operand.vmem [shape: bf16[16,264], index: 5, kind: input, shape index: {}]   ;;  %s1907_s7 = inlined_call_operand.vmem [shape: bf16[16,176], index: 7, kind: input, shape index: {}]   ;;  %s1908_s8 = inlined_call_operand.vmem [shape: f32[16,1], index: 8, kind: input, shape index: {}]   ;;  %s1909_s9 = inlined_call_operand.vmem [shape: f32[16,1], index: 9, kind: input, shape index: {}]   ;;  %s1910_s10 = inlined_call_operand.vmem [shape: bf16[16,128], index: 10, kind: output, shape index: {0}]   ;;  %s1911_s11 = inlined_call_operand.vmem [shape: bf16[16,128], index: 11, kind: output, shape index: {1}]   ;;  %s1912_s12 = inlined_call_operand.vmem [shape: bf16[16,128], index: 12, kind: output, shape index: {2}]   ;;  %s1913_s13 = inlined_call_operand.vmem [shape: bf16[16,128], index: 13, kind: output, shape index: {3}]  }
   0x1   :  { %v1367_v0 = vld [vmem:[%s1900_s0 + $0x38] sm:$0xff]  ;;  %v1146_v2 = vld [vmem:[%s1900_s0 + $0xc0] sm:$0xf]  ;;  %v1384_v3 = vld [vmem:[%s1900_s0 + $0xc0] sm:$0x30]  ;;  %vm863_vm4 = vcmask 392192  }
   0x2   :  { %v1383_v1 = vld [vmem:[%s1900_s0 + $0xb8] sm:$0xff]  ;;  %270 = vmatpush.bf16.msra.mxu0 %v1367_v0  ;;  %v1147_v5 = vor.u32 %v1384_v3, %v1146_v2  ;;  %v1366_v7 = vld [vmem:[%s1900_s0 + $0x30] sm:$0xff]  ;;  %v1365_v12 = vld [vmem:[%s1900_s0 + $0x28] sm:$0xff] }
   0x3   :  { %v1375_v4 = vld [vmem:[%s1900_s0 + $0x78] sm:$0xff]  ;;  %298 = vmatpush.bf16.msra.mxu2 %v1383_v1  ;;  %v1382_v8 = vld [vmem:[%s1900_s0 + $0xb0] sm:$0xff]  ;;  %v1381_v13 = vld [vmem:[%s1900_s0 + $0xa8] sm:$0xff] }
   0x4   :  { %v1395_v6 = vld [vmem:[%s1901_s2 + $0x38] sm:$0xff]  ;;  %284 = vmatpush.bf16.msra.mxu1 %v1375_v4  ;;  %v1374_v9 = vld [vmem:[%s1900_s0 + $0x70] sm:$0xff]  ;;  %v268_v10 = vsel %vm266_vm0, %v1147_v5, 0  ;;  %v1373_v14 = vld [vmem:[%s1900_s0 + $0x68] sm:$0xff] }
   0x5   :  { %319 = vmatpush.bf16.msra.mxu3 %v268_v10  ;;  %v1394_v11 = vld [vmem:[%s1901_s2 + $0x30] sm:$0xff]  ;;  %v1357_v15 = vld [vmem:[%s1902_s1 + $0xc] sm:$0xf]  ;;  %v1044_v16 = vld [vmem:[%s1902_s1 + $0x18] sm:$0xf0] }
   0x6   :  { %271 = vmatpush.bf16.msra.mxu0 %v1366_v7  ;;  %v1393_v17 = vld [vmem:[%s1901_s2 + $0x28] sm:$0xff]  ;;  %v1364_v18 = vld [vmem:[%s1900_s0 + $0x20] sm:$0xff]  ;;  %v1047_v19 = vor.u32 %v1357_v15, %v1044_v16  ;;  %v1363_v23 = vld [vmem:[%s1900_s0 + $0x18] sm:$0xff] }
   0x7   :  { %299 = vmatpush.bf16.msra.mxu2 %v1382_v8  ;;  %v1380_v20 = vld [vmem:[%s1900_s0 + $0xa0] sm:$0xff]  ;;  %v1379_v24 = vld [vmem:[%s1900_s0 + $0x98] sm:$0xff]  ;;  %v1362_v27 = vld [vmem:[%s1900_s0 + $0x10] sm:$0xff] }
   0x8   :  { %285 = vmatpush.bf16.msra.mxu1 %v1374_v9  ;;  %v1372_v21 = vld [vmem:[%s1900_s0 + $0x60] sm:$0xff]  ;;  %1148 = vmatmul.msk.bf16.vlgmr.msra.gmra.mxu3 %vm262_vm1, %v1047_v19  ;;  %v1371_v25 = vld [vmem:[%s1900_s0 + $0x58] sm:$0xff]  ;;  %v1378_v28 = vld [vmem:[%s1900_s0 + $0x90] sm:$0xff] }
   0x9   :  { %495 = vmatpush.bf16.msrb.mxu3 %v1395_v6  ;;  %v1392_v22 = vld [vmem:[%s1901_s2 + $0x20] sm:$0xff]  ;;  %v1391_v26 = vld [vmem:[%s1901_s2 + $0x18] sm:$0xff]  ;;  %v1370_v29 = vld [vmem:[%s1900_s0 + $0x50] sm:$0xff] }
   0xa   :  { %272 = vmatpush.bf16.msra.mxu0 %v1365_v12  ;;  %v372_v30 = vld [vmem:[%s1901_s2 + $0x80] sm:$0xf]  ;;  %v1390_v31 = vld [vmem:[%s1901_s2 + $0x10] sm:$0xff]  ;;  %v1361_v32 = vld [vmem:[%s1900_s0 + $0x8] sm:$0xff] }
   0xb   :  { %300 = vmatpush.bf16.msra.mxu2 %v1381_v13  ;;  %v453_v33 = vunpack.c.l.b16 %v372_v30  ;;  %v1377_v34 = vld [vmem:[%s1900_s0 + $0x88] sm:$0xff]  ;;  %v587_v36 = vld [vmem:[%s1903_s4 + $0x80] sm:$0xf]  ;;  %v1403_v40 = vld [vmem:[%s1901_s2 + $0x78] sm:$0xff] }
   0xc   :  { %286 = vmatpush.bf16.msra.mxu1 %v1373_v14  ;;  %v1369_v35 = vld [vmem:[%s1900_s0 + $0x48] sm:$0xff]  ;;  %v1360_v38 = vld [vmem:[%s1900_s0] sm:$0xff]  ;;  %v1358_v42 = vld [vmem:[%s1902_s1 + $0xc] sm:$0xf0]  ;;  %v668_v44 = vunpack.c.l.b16 %v587_v36 }
   0xd   :  { %496 = vmatpush.bf16.msrb.mxu3 %v1394_v11  ;;  %v1389_v37 = vld [vmem:[%s1901_s2 + $0x8] sm:$0xff]  ;;  %v1376_v39 = vld [vmem:[%s1900_s0 + $0x80] sm:$0xff]  ;;  %v470_v43 = vpack.c.b16 %v453_v33, %v453_v33  ;;  %v1414_v45 = vld [vmem:[%s1903_s4 + $0x38] sm:$0xff] }
   0xe   :  { %273 = vmatpush.bf16.msra.mxu0 %v1364_v18  ;;  %v1034_v41 = vld [vmem:[%s1902_s1] sm:$0xf]  ;;  %v1042_v46 = vld [vmem:[%s1902_s1 + $0x8] sm:$0xf]  ;;  %v1359_v47 = vld [vmem:[%s1902_s1 + $0x14] sm:$0xf0]  ;;  %v685_v57 = vpack.c.b16 %v668_v44, %v668_v44 }
   0xf   :  { %301 = vmatpush.bf16.msra.mxu2 %v1380_v20  ;;  %v1368_v48 = vld [vmem:[%s1900_s0 + $0x40] sm:$0xff]  ;;  %v1036_v50 = vld [vmem:[%s1902_s1 + $0x10] sm:$0xf0]  ;;  %v1035_v51 = vor.u32 %v1358_v42, %v1034_v41  ;;  %v1043_v53 = vor.u32 %v1359_v47, %v1042_v46  ;;  %v1386_v55 = vld [vmem:[%s1904_s3 + $0x8] sm:$0xf0]  ;;  %v493_v56 = vsel %vm491_vm2, %v470_v43, 0 }
  0x10   :  { %287 = vmatpush.bf16.msra.mxu1 %v1372_v21  ;;  %v1356_v49 = vld [vmem:[%s1902_s1 + $0x4] sm:$0xf]  ;;  %v1151_v54 = vld [vmem:[%s1904_s3] sm:$0xf]  ;;  %v1422_v58 = vld [vmem:[%s1903_s4 + $0x78] sm:$0xff]  ;;  %v706_v63 = vsel %vm491_vm2, %v685_v57, 0 }
  0x11   :  { %497 = vmatpush.bf16.msrb.mxu3 %v1393_v17  ;;  %v1388_v52 = vld [vmem:[%s1901_s2] sm:$0xff]  ;;  %v1039_v59 = vor.u32 %v1356_v49, %v1036_v50  ;;  %v1402_v60 = vld [vmem:[%s1901_s2 + $0x70] sm:$0xff]  ;;  %v1152_v62 = vor.u32 %v1386_v55, %v1151_v54  ;;  %v1401_v1 = vld [vmem:[%s1901_s2 + $0x68] sm:$0xff] }
  0x12   :  { %274 = vmatpush.bf16.msra.mxu0 %v1363_v23  ;;  %v1413_v61 = vld [vmem:[%s1903_s4 + $0x30] sm:$0xff]  ;;  %v1412_v2 = vld [vmem:[%s1903_s4 + $0x28] sm:$0xff]  ;;  %v1400_v4 = vld [vmem:[%s1901_s2 + $0x60] sm:$0xff] }
  0x13   :  { %302 = vmatpush.bf16.msra.mxu2 %v1379_v24  ;;  %v1421_v0 = vld [vmem:[%s1903_s4 + $0x70] sm:$0xff]  ;;  %v1420_v3 = vld [vmem:[%s1903_s4 + $0x68] sm:$0xff]  ;;  %v1411_v5 = vld [vmem:[%s1903_s4 + $0x20] sm:$0xff] }
  0x14   :  { %288 = vmatpush.bf16.msra.mxu1 %v1371_v25  ;;  %v1419_v6 = vld [vmem:[%s1903_s4 + $0x60] sm:$0xff]  ;;  %v1399_v7 = vld [vmem:[%s1901_s2 + $0x58] sm:$0xff]  ;;  %v1159_v9 = vld [vmem:[%s1904_s3 + $0x8] sm:$0xf] }
  0x15   :  { %498 = vmatpush.bf16.msrb.mxu3 %v1392_v22  ;;  %v1410_v8 = vld [vmem:[%s1903_s4 + $0x18] sm:$0xff]  ;;  %v1387_v10 = vld [vmem:[%s1904_s3 + $0x10] sm:$0xf0]  ;;  %v1397_v17 = vld [vmem:[%s1901_s2 + $0x48] sm:$0xff] }
  0x16   :  { %275 = vmatpush.bf16.msra.mxu0 %v1362_v27  ;;  %v1418_v11 = vld [vmem:[%s1903_s4 + $0x58] sm:$0xff]  ;;  %v1160_v12 = vor.u32 %v1387_v10, %v1159_v9  ;;  %v1398_v13 = vld [vmem:[%s1901_s2 + $0x50] sm:$0xff]  ;;  %v1408_v18 = vld [vmem:[%s1903_s4 + $0x8] sm:$0xff] }
  0x17   :  { %303 = vmatpush.bf16.msra.mxu2 %v1378_v28  ;;  %v1409_v14 = vld [vmem:[%s1903_s4 + $0x10] sm:$0xff]  ;;  %v1434_v19 = vld [vmem:[%s1905_s6 + $0x48] sm:$0xff]  ;;  %v1396_v21 = vld [vmem:[%s1901_s2 + $0x40] sm:$0xff] }
  0x18   :  { %289 = vmatpush.bf16.msra.mxu1 %v1370_v29  ;;  %v1435_v15 = vld [vmem:[%s1905_s6 + $0x50] sm:$0xff]  ;;  %v1416_v20 = vld [vmem:[%s1903_s4 + $0x48] sm:$0xff]  ;;  %v1407_v22 = vld [vmem:[%s1903_s4] sm:$0xff] }
  0x19   :  { %499 = vmatpush.bf16.msrb.mxu3 %v1391_v26  ;;  %v1417_v16 = vld [vmem:[%s1903_s4 + $0x50] sm:$0xff]  ;;  %v1432_v23 = vld [vmem:[%s1905_s6 + $0x38] sm:$0xff]  ;;  %v1385_v24 = vld [vmem:[%s1904_s3 + $0x4] sm:$0xf] }
  0x1a   :  { %276 = vmatpush.bf16.msra.mxu0 %v1361_v32  ;;  %v1153_v25 = vld [vmem:[%s1904_s3 + $0xc] sm:$0xf0]  ;;  %v1228_v26 = vld [vmem:[%s1906_s5] sm:$0xf]  ;;  %v1405_v27 = vld [vmem:[%s1906_s5 + $0x8] sm:$0xf0] }
  0x1b   :  { %304 = vmatpush.bf16.msra.mxu2 %v1377_v34  ;;  %v1433_v28 = vld [vmem:[%s1905_s6 + $0x40] sm:$0xff]  ;;  %v1156_v30 = vor.u32 %v1385_v24, %v1153_v25  ;;  %v1230_v32 = vld [vmem:[%s1906_s5 + $0xc] sm:$0xf0]  ;;  %v1229_v33 = vor.u32 %v1405_v27, %v1228_v26  ;;  %v1236_v34 = vld [vmem:[%s1906_s5 + $0x8] sm:$0xf] }
  0x1c   :  { %290 = vmatpush.bf16.msra.mxu1 %v1369_v35  ;;  %v1415_v29 = vld [vmem:[%s1903_s4 + $0x40] sm:$0xff]  ;;  %v1406_v35 = vld [vmem:[%s1906_s5 + $0x10] sm:$0xf0]  ;;  %v1428_v41 = vld [vmem:[%s1905_s6 + $0x18] sm:$0xff] }
  0x1d   :  { %500 = vmatpush.bf16.msrb.mxu3 %v1390_v31  ;;  %v1404_v31 = vld [vmem:[%s1906_s5 + $0x4] sm:$0xf]  ;;  %v1431_v36 = vld [vmem:[%s1905_s6 + $0x30] sm:$0xff]  ;;  %v1307_v43 = vld [vmem:[%s1907_s7 + $0x8] sm:$0xf0] }
  0x1e   :  { %277 = vmatpush.bf16.msra.mxu0 %v1360_v38  ;;  %v1237_v38 = vor.u32 %v1406_v35, %v1236_v34  ;;  %v1423_v42 = vld [vmem:[%s1907_s7 + $0x4] sm:$0xf]  ;;  %v1427_v44 = vld [vmem:[%s1905_s6 + $0x10] sm:$0xff]  ;;  %v1426_v46 = vld [vmem:[%s1905_s6 + $0x8] sm:$0xff] }
  0x1f   :  { %305 = vmatpush.bf16.msra.mxu2 %v1376_v39  ;;  %v1430_v39 = vld [vmem:[%s1905_s6 + $0x28] sm:$0xff]  ;;  %v1425_v47 = vld [vmem:[%s1905_s6] sm:$0xff] }
  0x20   :  { %291 = vmatpush.bf16.msra.mxu1 %v1368_v48  ;;  %v1305_v48 = vld [vmem:[%s1907_s7] sm:$0xf]  ;;  %v1424_v49 = vld [vmem:[%s1907_s7 + $0x4] sm:$0xf0] }
  0x21   :  { %501 = vmatpush.bf16.msrb.mxu3 %v1389_v37  ;;  %278 = vmatmul.bf16.vlgmr.msra.gmra.mxu0 %v1035_v51  ;;  %v1233_v37 = vor.u32 %v1404_v31, %v1230_v32  ;;  %v1306_v50 = vor.u32 %v1424_v49, %v1305_v48 }
  0x22   :  { %509 = vmatpush.bf16.msrb.mxu0 %v1403_v40  ;;  %306 = vmatmul.bf16.vlgmr.msra.gmra.mxu2 %v1043_v53  ;;  %v1429_v40 = vld [vmem:[%s1905_s6 + $0x20] sm:$0xff] }
  0x23   :  { %708 = vmatpush.bf16.msrb.mxu2 %v1414_v45  ;;  %292 = vmatmul.bf16.vlgmr.msra.gmra.mxu1 %v1039_v59  ;;  %v1310_v45 = vor.u32 %v1423_v42, %v1307_v43 }
  0x24   :  { %530 = vmatpush.bf16.msrb.mxu1 %v493_v56 }
  0x25   :  { %502 = vmatpush.bf16.msrb.mxu3 %v1388_v52 }
  0x26   :  { %510 = vmatpush.bf16.msrb.mxu0 %v1402_v60 }
  0x27   :  { %709 = vmatpush.bf16.msrb.mxu2 %v1413_v61 }
  0x28   :  { %503 = vmatmul.bf16.vlgmr.msrb.gmra.mxu3 %v1152_v62  ;;  %743 = vmatpush.bf16.msra.mxu1 %v706_v63 }
  0x29   :  { %722 = vmatpush.bf16.msra.mxu3 %v1422_v58 }
  0x2a   :  { %511 = vmatpush.bf16.msrb.mxu0 %v1401_v1 }
  0x2b   :  { %710 = vmatpush.bf16.msrb.mxu2 %v1412_v2 }
  0x2d   :  { %723 = vmatpush.bf16.msra.mxu3 %v1421_v0 }
  0x2e   :  { %512 = vmatpush.bf16.msrb.mxu0 %v1400_v4 }
  0x2f   :  { %711 = vmatpush.bf16.msrb.mxu2 %v1411_v5 }
  0x31   :  { %724 = vmatpush.bf16.msra.mxu3 %v1420_v3 }
  0x32   :  { %513 = vmatpush.bf16.msrb.mxu0 %v1399_v7 }
  0x33   :  { %712 = vmatpush.bf16.msrb.mxu2 %v1410_v8  ;;  %1225 = vmatmul.msk.bf16.vlgmr.msrb.gmra.mxu1 %vm487_vm3, %v1160_v12 }
  0x34   :  { %886 = vmatpush.bf16.msrb.mxu1 %v1435_v15 }
  0x35   :  { %725 = vmatpush.bf16.msra.mxu3 %v1419_v6 }
  0x36   :  { %514 = vmatpush.bf16.msrb.mxu0 %v1398_v13 }
  0x37   :  { %713 = vmatpush.bf16.msrb.mxu2 %v1409_v14 }
  0x38   :  { %887 = vmatpush.bf16.msrb.mxu1 %v1434_v19 }
  0x39   :  { %726 = vmatpush.bf16.msra.mxu3 %v1418_v11 }
  0x3a   :  { %515 = vmatpush.bf16.msrb.mxu0 %v1397_v17 }
  0x3b   :  { %714 = vmatpush.bf16.msrb.mxu2 %v1408_v18 }
  0x3c   :  { %888 = vmatpush.bf16.msrb.mxu1 %v1433_v28 }
  0x3d   :  { %727 = vmatpush.bf16.msra.mxu3 %v1417_v16 }
  0x3e   :  { %516 = vmatpush.bf16.msrb.mxu0 %v1396_v21 }
  0x3f   :  { %715 = vmatpush.bf16.msrb.mxu2 %v1407_v22 }
  0x41   :  { %728 = vmatpush.bf16.msra.mxu3 %v1416_v20  ;;  %517 = vmatmul.bf16.vlgmr.msrb.gmra.mxu0 %v1156_v30 }
  0x42   :  { %867 = vmatpush.bf16.msra.mxu0 %v1432_v23  ;;  %716 = vmatmul.bf16.vlgmr.msrb.gmra.mxu2 %v1229_v33 }
  0x43   :  { %1302 = vmatmul.msk.bf16.vlgmr.msra.gmra.mxu1 %vm487_vm3, %v1237_v38  ;;  %v1467_v38 = vmov 450.0  }
  0x44   :  { %1461 = vrcp.f32 %v1467_v38 }
  0x45   :  { %729 = vmatpush.bf16.msra.mxu3 %v1415_v29 }
  0x46   :  { %868 = vmatpush.bf16.msra.mxu0 %v1431_v36 }
  0x48   :  { %730 = vmatmul.bf16.vlgmr.msra.gmra.mxu3 %v1233_v37 }
  0x4a   :  { %869 = vmatpush.bf16.msra.mxu0 %v1430_v39 }
  0x4e   :  { %870 = vmatpush.bf16.msra.mxu0 %v1429_v40 }
  0x52   :  { %871 = vmatpush.bf16.msra.mxu0 %v1428_v41  ;;  %v1462_v41 = vpop.eup %1461 }
  0x53   :  { %1355 = vmatmul.msk.bf16.vlgmr.msrb.gmra.mxu1 %vm863_vm4, %v1310_v45  ;;  %vm914_vm5 = vweird.f32 %v1462_v41 }
  0x56   :  { %872 = vmatpush.bf16.msra.mxu0 %v1427_v44  ;;  %v910_v44 = vmul.f32 450.0, %v1462_v41 }
  0x5a   :  { %873 = vmatpush.bf16.msra.mxu0 %v1426_v46  ;;  %v911_v46 = vsub.f32 1.0, %v910_v44 }
  0x5c   :  { %v912_v49 = vmul.f32 %v1462_v41, %v911_v46 }
  0x5e   :  { %874 = vmatpush.bf16.msra.mxu0 %v1425_v47 }
  0x61   :  { %875 = vmatmul.bf16.vlgmr.msra.gmra.mxu0 %v1306_v50 }
  0x8b   :  { %v321_v51 = vpop.f32.mrf.mxu3 }
  0x93   :  { %v323_v59 = vpop.f32.mrf.mxu3 }
  0x9e   :  { %v279_v52 = vpop.f32.mrf.mxu0 }
  0xa0   :  { %v293_v53 = vpop.f32.mrf.mxu1 }
  0xa1   :  { %v294_v54 = vadd.f32 %v293_v53, %v279_v52  ;;  %v1468_v53 = vmov 0  }
  0xa2   :  { %1458 = vset.pattern.permute.xlu1 %v1468_v53  ;;  %1460 = vset.pattern.permute.xlu0 %v1468_v53 }
  0xa3   :  { %1459 = vset.pattern.permute.xlu2 %v1468_v53 }
  0xa5   :  { %v307_v55 = vpop.f32.mrf.mxu2 }
  0xa6   :  { %v308_v56 = vadd.f32 %v307_v55, %v294_v54  ;;  %v281_v60 = vpop.f32.mrf.mxu0 }
  0xa8   :  { %v1828_v57 = vadd.f32 %v321_v51, %v308_v56  ;;  %v295_v58 = vpop.f32.mrf.mxu1  ;;  %v913_v51 = vadd.f32 %v1462_v41, %v912_v49 }
  0xa9   :  { %v296_v62 = vadd.f32 %v295_v58, %v281_v60 }
  0xaa   :  { %326 = vadd.xlane.f32.xlu0 %v1828_v57  ;;  %v330_v61 = vmul.f32 %v1828_v57, %v1828_v57  ;;  %v915_v58 = vsel %vm914_vm5, %v1462_v41, %v913_v51 }
  0xab   :  { %v504_v4 = vpop.f32.mrf.mxu3 }
  0xac   :  { %332 = vadd.xlane.f32.xlu2 %v330_v61 }
  0xad   :  { %v309_v63 = vpop.f32.mrf.mxu2 }
  0xae   :  { %v310_v0 = vadd.f32 %v309_v63, %v296_v62 }
  0xb0   :  { %v1833_v1 = vadd.f32 %v323_v59, %v310_v0  ;;  %v532_v2 = vpop.f32.mrf.mxu1 }
  0xb2   :  { %328 = vadd.xlane.f32.xlu0 %v1833_v1  ;;  %v331_v3 = vmul.f32 %v1833_v1, %v1833_v1 }
  0xb3   :  { %v506_v7 = vpop.f32.mrf.mxu3 }
  0xb4   :  { %334 = vadd.xlane.f32.xlu2 %v331_v3 }
  0xb8   :  { %v534_v5 = vpop.f32.mrf.mxu1 }
  0xbe   :  { %v518_v6 = vpop.f32.mrf.mxu0 }
  0xbf   :  { %v519_v8 = vadd.f32 %v518_v6, %v504_v4 }
  0xc0   :  { %v745_v11 = vpop.f32.mrf.mxu1 }
  0xc1   :  { %v1838_v9 = vadd.f32 %v532_v2, %v519_v8 }
  0xc3   :  { %537 = vadd.xlane.f32.xlu1 %v1838_v9  ;;  %v541_v10 = vmul.f32 %v1838_v9, %v1838_v9 }
  0xc5   :  { %v717_v12 = vpop.f32.mrf.mxu2  ;;  %543 = vadd.xlane.f32.xlu0 %v541_v10 }
  0xc6   :  { %v520_v13 = vpop.f32.mrf.mxu0 }
  0xc7   :  { %v521_v14 = vadd.f32 %v520_v13, %v506_v7 }
  0xc8   :  { %v747_v19 = vpop.f32.mrf.mxu1 }
  0xc9   :  { %v1843_v17 = vadd.f32 %v534_v5, %v521_v14 }
  0xcb   :  { %v731_v15 = vpop.f32.mrf.mxu3  ;;  %539 = vadd.xlane.f32.xlu1 %v1843_v17  ;;  %v542_v23 = vmul.f32 %v1843_v17, %v1843_v17 }
  0xcc   :  { %v732_v16 = vadd.f32 %v731_v15, %v717_v12 }
  0xcd   :  { %v719_v20 = vpop.f32.mrf.mxu2 }
  0xce   :  { %v1845_v18 = vadd.f32 %v745_v11, %v732_v16 }
  0xd0   :  { %750 = vadd.xlane.f32.xlu2 %v1845_v18  ;;  %v890_v26 = vpop.f32.mrf.mxu1  ;;  %v754_v27 = vmul.f32 %v1845_v18, %v1845_v18 }
  0xd3   :  { %v733_v21 = vpop.f32.mrf.mxu3  ;;  %545 = vadd.xlane.f32.xlu1 %v542_v23 }
  0xd4   :  { %v734_v22 = vadd.f32 %v733_v21, %v719_v20 }
  0xd6   :  { %v1851_v24 = vadd.f32 %v747_v19, %v734_v22 }
  0xd8   :  { %752 = vadd.xlane.f32.xlu0 %v1851_v24  ;;  %v755_v25 = vmul.f32 %v1851_v24, %v1851_v24  ;;  %v892_v31 = vpop.f32.mrf.mxu1 }
  0xda   :  { %758 = vadd.xlane.f32.xlu2 %v755_v25 }
  0xdb   :  { %756 = vadd.xlane.f32.xlu1 %v754_v27 }
  0xde   :  { %v876_v28 = vpop.f32.mrf.mxu0 }
  0xdf   :  { %v1858_v29 = vadd.f32 %v890_v26, %v876_v28 }
  0xe1   :  { %895 = vadd.xlane.f32.xlu0 %v1858_v29  ;;  %v899_v30 = vmul.f32 %v1858_v29, %v1858_v29 }
  0xe3   :  { %901 = vadd.xlane.f32.xlu2 %v899_v30 }
  0xe6   :  { %v878_v32 = vpop.f32.mrf.mxu0 }
  0xe7   :  { %v1863_v33 = vadd.f32 %v892_v31, %v878_v32  ;;  %v924_v31 = vld [vmem:[%s1908_s8] sm:$0xff] }
  0xe9   :  { %897 = vadd.xlane.f32.xlu1 %v1863_v33  ;;  %v900_v34 = vmul.f32 %v1863_v33, %v1863_v33 }
  0xeb   :  { %903 = vadd.xlane.f32.xlu0 %v900_v34 }
 0x11d   :  { %v327_v35 = vpop.xlane.xlu0 %326 }
 0x11f   :  { %v333_v36 = vpop.xlane.xlu2 %332 }
 0x125   :  { %v329_v39 = vpop.xlane.xlu0 %328 }
 0x127   :  { %v335_v40 = vpop.xlane.xlu2 %334 }
 0x136   :  { %v538_v37 = vpop.xlane.xlu1 %537 }
 0x137   :  { %v547_v52 = vadd.f32 %v538_v37, %v327_v35  ;;  %v950_v37 = vld [vmem:[%s1909_s9] sm:$0xff] }
 0x138   :  { %v544_v43 = vpop.xlane.xlu0 %543 }
 0x139   :  { %v549_v55 = vadd.f32 %v544_v43, %v333_v36 }
 0x13e   :  { %v540_v42 = vpop.xlane.xlu1 %539 }
 0x13f   :  { %v548_v2 = vadd.f32 %v540_v42, %v329_v39  ;;  %v925_v42 = vld [vmem:[%s1908_s8 + $0x8] sm:$0xff] }
 0x143   :  { %v751_v45 = vpop.xlane.xlu2 %750 }
 0x144   :  { %v760_v56 = vadd.f32 %v751_v45, %v547_v52 }
 0x146   :  { %v546_v47 = vpop.xlane.xlu1 %545 }
 0x147   :  { %v550_v3 = vadd.f32 %v546_v47, %v335_v40  ;;  %v951_v47 = vld [vmem:[%s1909_s9 + $0x8] sm:$0xff] }
 0x14b   :  { %v753_v48 = vpop.xlane.xlu0 %752 }
 0x14c   :  { %v761_v6 = vadd.f32 %v753_v48, %v548_v2 }
 0x14d   :  { %v759_v50 = vpop.xlane.xlu2 %758 }
 0x14e   :  { %v757_v54 = vpop.xlane.xlu1 %756  ;;  %v763_v10 = vadd.f32 %v759_v50, %v550_v3 }
 0x14f   :  { %v762_v60 = vadd.f32 %v757_v54, %v549_v55 }
 0x154   :  { %v896_v59 = vpop.xlane.xlu0 %895 }
 0x155   :  { %v905_v61 = vadd.f32 %v896_v59, %v760_v56 }
 0x156   :  { %v902_v62 = vpop.xlane.xlu2 %901 }
 0x157   :  { %v916_v63 = vmul.f32 %v915_v58, %v905_v61  ;;  %v907_v0 = vadd.f32 %v902_v62, %v762_v60 }
 0x159   :  { %v920_v4 = vmul.f32 %v916_v63, %v916_v63  ;;  %v918_v5 = vmul.f32 %v915_v58, %v907_v0 }
 0x15b   :  { %v922_v7 = vsub.f32 %v918_v5, %v920_v4 }
 0x15c   :  { %v898_v8 = vpop.xlane.xlu1 %897 }
 0x15d   :  { %v926_v11 = vadd.f32 1e-05, %v922_v7  ;;  %v906_v12 = vadd.f32 %v898_v8, %v761_v6 }
 0x15e   :  { %v904_v13 = vpop.xlane.xlu0 %903 }
 0x15f   :  { %1463 = vrsqrt.f32 %v926_v11  ;;  %v917_v14 = vmul.f32 %v915_v58, %v906_v12  ;;  %v908_v15 = vadd.f32 %v904_v13, %v763_v10  ;;  %vm934_vm7 = vweird.f32 %v926_v11 }
 0x161   :  { %v921_v16 = vmul.f32 %v917_v14, %v917_v14  ;;  %v919_v19 = vmul.f32 %v915_v58, %v908_v15 }
 0x163   :  { %v923_v20 = vsub.f32 %v919_v19, %v921_v16 }
 0x165   :  { %v1464_v21 = vpop.eup %1463  ;;  %v927_v22 = vadd.f32 1e-05, %v923_v20 }
 0x166   :  { %v929_v23 = vmul.f32 %v1464_v21, %v926_v11  ;;  %vm935_vm6 = vweird.f32 %v1464_v21 }
 0x167   :  { %1465 = vrsqrt.f32 %v927_v22  ;;  %vm936_vm8 = vmor %vm934_vm7, %vm935_vm6  ;;  %vm944_vm10 = vweird.f32 %v927_v22 }
 0x168   :  { %v930_v25 = vmul.f32 %v1464_v21, %v929_v23 }
 0x16a   :  { %v931_v26 = vmul.f32 0.5, %v930_v25 }
 0x16c   :  { %v932_v27 = vsub.f32 1.5, %v931_v26 }
 0x16d   :  { %v1466_v28 = vpop.eup %1465 }
 0x16e   :  { %v939_v30 = vmul.f32 %v1466_v28, %v927_v22  ;;  %v933_v32 = vmul.f32 %v1464_v21, %v932_v27  ;;  %vm945_vm9 = vweird.f32 %v1466_v28 }
 0x16f   :  { %vm946_vm11 = vmor %vm944_vm10, %vm945_vm9 }
 0x170   :  { %v940_v34 = vmul.f32 %v1466_v28, %v939_v30  ;;  %v937_v35 = vsel %vm936_vm8, %v1464_v21, %v933_v32 }
 0x171   :  { %v948_v36 = vmul.f32 %v937_v35, %v924_v31 }
 0x172   :  { %v941_v38 = vmul.f32 0.5, %v940_v34 }
 0x173   :  { %958 = vperm.xlu1 %1458, %v948_v36   ;;  %v952_v39 = vmul.f32 %v948_v36, %v916_v63 }
 0x174   :  { %v942_v40 = vsub.f32 1.5, %v941_v38 }
 0x175   :  { %v954_v41 = vsub.f32 %v950_v37, %v952_v39 }
 0x176   :  { %v943_v43 = vmul.f32 %v1466_v28, %v942_v40 }
 0x177   :  { %970 = vperm.xlu0 %1460, %v954_v41  }
 0x178   :  { %v947_v44 = vsel %vm946_vm11, %v1466_v28, %v943_v43 }
 0x179   :  { %v949_v45 = vmul.f32 %v947_v44, %v925_v42 }
 0x17b   :  { %963 = vperm.xlu2 %1459, %v949_v45   ;;  %v953_v46 = vmul.f32 %v949_v45, %v917_v14 }
 0x17d   :  { %v955_v48 = vsub.f32 %v951_v47, %v953_v46 }
 0x183   :  { %975 = vperm.xlu2 %1459, %v955_v48  }
 0x1d5   :  { %v964_v49 = vpop.permute.xlu2 %963 }
 0x1d6   :  { %v967_v51 = vmul.f32 %v964_v49, %v1833_v1  ;;  %v987_v52 = vmul.f32 %v964_v49, %v1843_v17  ;;  %v997_v53 = vmul.f32 %v964_v49, %v1851_v24  ;;  %v1007_v55 = vmul.f32 %v964_v49, %v1863_v33 }
 0x1dd   :  { %v976_v50 = vpop.permute.xlu2 %975 }
 0x1de   :  { %v979_v56 = vadd.f32 %v976_v50, %v967_v51  ;;  %v989_v58 = vadd.f32 %v987_v52, %v976_v50  ;;  %v999_v59 = vadd.f32 %v997_v53, %v976_v50  ;;  %v1009_v0 = vadd.f32 %v1007_v55, %v976_v50 }
 0x1e0   :  { %v981_v4 = vmax.f32 %v979_v56, 0.0  ;;  %v991_v5 = vmax.f32 %v989_v58, 0.0  ;;  %v1001_v33 = vmax.f32 %v999_v59, 0.0 }
 0x1e5   :  { %v959_v54 = vpop.permute.xlu1 %958 }
 0x1e6   :  { %v966_v60 = vmul.f32 %v959_v54, %v1828_v57  ;;  %v986_v61 = vmul.f32 %v959_v54, %v1838_v9  ;;  %v996_v62 = vmul.f32 %v959_v54, %v1845_v18  ;;  %v1006_v63 = vmul.f32 %v959_v54, %v1858_v29 }
 0x1e7   :  { %v1011_v57 = vmax.f32 %v1009_v0, 0.0 }
 0x1e9   :  { %v971_v1 = vpop.permute.xlu0 %970 }
 0x1ea   :  { %v978_v2 = vadd.f32 %v971_v1, %v966_v60  ;;  %v988_v17 = vadd.f32 %v986_v61, %v971_v1  ;;  %v998_v3 = vadd.f32 %v996_v62, %v971_v1  ;;  %v1008_v24 = vadd.f32 %v1006_v63, %v971_v1 }
 0x1ec   :  { %v980_v6 = vmax.f32 %v978_v2, 0.0  ;;  %v990_v7 = vmax.f32 %v988_v17, 0.0  ;;  %v1000_v8 = vmax.f32 %v998_v3, 0.0  ;;  %v1010_v10 = vmax.f32 %v1008_v24, 0.0 }
 0x1ee   :  { %v1439_v11 = vpack.c.bf16 %v981_v4, %v980_v6  ;;  %v1444_v9 = vpack.c.bf16 %v991_v5, %v990_v7  ;;  %v1449_v12 = vpack.c.bf16 %v1001_v33, %v1000_v8  ;;  %v1454_v18 = vpack.c.bf16 %v1011_v57, %v1010_v10 }
 0x1f0   :  { %1440 = vst [vmem:[%s1910_s10] sm:$0xff] %v1439_v11  }
 0x1f1   :  { %1445 = vst [vmem:[%s1911_s11] sm:$0xff] %v1444_v9  }
 0x1f2   :  { %1450 = vst [vmem:[%s1912_s12] sm:$0xff] %v1449_v12  }
 0x1f3   :  { %1455 = vst [vmem:[%s1913_s13] sm:$0xff] %v1454_v18  }

// kernel: decoder_forward.8
= control target key start
LH: loop header
LB: loop body
LE: loop exit
PB: predicated region body
PF: predicated region fallthrough
CT: control target
= control target key end

     0   :  { %vm137_vm0 = vcmask 523264   ;;  %vm256_vm1 = vcmask 261120   ;;  %vm473_vm2 = vcmask 130048   ;;  %s1304_s0 = inlined_call_operand.vmem [shape: bf16[64,512], index: 0, kind: input, shape index: {}]   ;;  %s1305_s2 = inlined_call_operand.vmem [shape: bf16[32,512], index: 2, kind: input, shape index: {}]   ;;  %s1306_s1 = inlined_call_operand.vmem [shape: bf16[8,64], index: 1, kind: input, shape index: {}]   ;;  %s1307_s4 = inlined_call_operand.vmem [shape: bf16[32,512], index: 4, kind: input, shape index: {}]   ;;  %s1308_s6 = inlined_call_operand.vmem [shape: bf16[16,512], index: 6, kind: input, shape index: {}]   ;;  %s1309_s3 = inlined_call_operand.vmem [shape: bf16[8,32], index: 3, kind: input, shape index: {}]   ;;  %s1310_s5 = inlined_call_operand.vmem [shape: bf16[8,32], index: 5, kind: input, shape index: {}]   ;;  %s1311_s7 = inlined_call_operand.vmem [shape: bf16[8,16], index: 7, kind: input, shape index: {}]   ;;  %s1312_s8 = inlined_call_operand.vmem [shape: f32[8,1], index: 8, kind: input, shape index: {}]   ;;  %s1313_s9 = inlined_call_operand.vmem [shape: f32[8,1], index: 9, kind: input, shape index: {}]   ;;  %s1314_s10 = inlined_call_operand.vmem [shape: bf16[8,512], index: 10, kind: output, shape index: {0}]   ;;  %s1315_s11 = inlined_call_operand.vmem [shape: bf16[8,512], index: 11, kind: output, shape index: {1}]   ;;  %s1316_s12 = inlined_call_operand.vmem [shape: bf16[8,512], index: 12, kind: output, shape index: {2}]   ;;  %s1317_s13 = inlined_call_operand.vmem [shape: bf16[8,512], index: 13, kind: output, shape index: {3}]  }
   0x1   :  { %v712_v0 = vld [vmem:[%s1304_s0 + $0x60] sm:$0xf]  ;;  %v836_v1 = vld [vmem:[%s1304_s0 + $0x6c] sm:$0xf0]  ;;  %v834_v2 = vld [vmem:[%s1304_s0 + $0x64] sm:$0xf] }
   0x2   :  { %v713_v3 = vor.u32 %v836_v1, %v712_v0  ;;  %v714_v4 = vld [vmem:[%s1304_s0 + $0x70] sm:$0xf0]  ;;  %v720_v5 = vld [vmem:[%s1304_s0 + $0x68] sm:$0xf]  ;;  %v837_v6 = vld [vmem:[%s1304_s0 + $0x74] sm:$0xf0] }
   0x3   :  { %v717_v7 = vor.u32 %v834_v2, %v714_v4  ;;  %v721_v8 = vor.u32 %v837_v6, %v720_v5  ;;  %v835_v9 = vld [vmem:[%s1304_s0 + $0x6c] sm:$0xf]  ;;  %v722_v10 = vld [vmem:[%s1304_s0 + $0x78] sm:$0xf0]  ;;  %v696_v11 = vld [vmem:[%s1304_s0 + $0x40] sm:$0xf] }
   0x4   :  { %145 = vmatpush.bf16.msra.mxu0 %v713_v3  ;;  %v725_v12 = vor.u32 %v835_v9, %v722_v10  ;;  %v832_v13 = vld [vmem:[%s1304_s0 + $0x4c] sm:$0xf0]  ;;  %v830_v14 = vld [vmem:[%s1304_s0 + $0x44] sm:$0xf]  ;;  %v698_v15 = vld [vmem:[%s1304_s0 + $0x50] sm:$0xf0] }
   0x5   :  { %158 = vmatpush.bf16.msra.mxu1 %v717_v7  ;;  %171 = vmatpush.bf16.msra.mxu2 %v721_v8  ;;  %v697_v16 = vor.u32 %v832_v13, %v696_v11  ;;  %v701_v17 = vor.u32 %v830_v14, %v698_v15  ;;  %v704_v18 = vld [vmem:[%s1304_s0 + $0x48] sm:$0xf]  ;;  %v833_v19 = vld [vmem:[%s1304_s0 + $0x54] sm:$0xf0]  ;;  %v831_v20 = vld [vmem:[%s1304_s0 + $0x4c] sm:$0xf] }
   0x6   :  { %184 = vmatpush.bf16.msra.mxu3 %v725_v12  ;;  %v705_v21 = vor.u32 %v833_v19, %v704_v18  ;;  %v706_v22 = vld [vmem:[%s1304_s0 + $0x58] sm:$0xf0]  ;;  %v680_v23 = vld [vmem:[%s1304_s0 + $0x20] sm:$0xf]  ;;  %v828_v24 = vld [vmem:[%s1304_s0 + $0x2c] sm:$0xf0] }
   0x7   :  { %v709_v25 = vor.u32 %v831_v20, %v706_v22  ;;  %v826_v26 = vld [vmem:[%s1304_s0 + $0x24] sm:$0xf]  ;;  %v682_v27 = vld [vmem:[%s1304_s0 + $0x30] sm:$0xf0]  ;;  %v688_v28 = vld [vmem:[%s1304_s0 + $0x28] sm:$0xf]  ;;  %v681_v29 = vor.u32 %v828_v24, %v680_v23 }
   0x8   :  { %146 = vmatpush.bf16.msra.mxu0 %v697_v16  ;;  %v829_v30 = vld [vmem:[%s1304_s0 + $0x34] sm:$0xf0]  ;;  %v827_v31 = vld [vmem:[%s1304_s0 + $0x2c] sm:$0xf]  ;;  %v690_v32 = vld [vmem:[%s1304_s0 + $0x38] sm:$0xf0]  ;;  %v685_v33 = vor.u32 %v826_v26, %v682_v27 }
   0x9   :  { %159 = vmatpush.bf16.msra.mxu1 %v701_v17  ;;  %172 = vmatpush.bf16.msra.mxu2 %v705_v21  ;;  %v689_v34 = vor.u32 %v829_v30, %v688_v28  ;;  %v664_v35 = vld [vmem:[%s1304_s0] sm:$0xf]  ;;  %v824_v36 = vld [vmem:[%s1304_s0 + $0xc] sm:$0xf0]  ;;  %v822_v37 = vld [vmem:[%s1304_s0 + $0x4] sm:$0xf]  ;;  %v693_v38 = vor.u32 %v827_v31, %v690_v32 }
   0xa   :  { %185 = vmatpush.bf16.msra.mxu3 %v709_v25  ;;  %v666_v39 = vld [vmem:[%s1304_s0 + $0x10] sm:$0xf0]  ;;  %v672_v40 = vld [vmem:[%s1304_s0 + $0x8] sm:$0xf]  ;;  %v825_v41 = vld [vmem:[%s1304_s0 + $0x14] sm:$0xf0]  ;;  %v665_v44 = vor.u32 %v824_v36, %v664_v35 }
   0xb   :  { %v823_v42 = vld [vmem:[%s1304_s0 + $0xc] sm:$0xf]  ;;  %v674_v43 = vld [vmem:[%s1304_s0 + $0x18] sm:$0xf0]  ;;  %v756_v45 = vld [vmem:[%s1305_s2 + $0x28] sm:$0xf]  ;;  %v669_v48 = vor.u32 %v822_v37, %v666_v39  ;;  %v673_v49 = vor.u32 %v825_v41, %v672_v40 }
   0xc   :  { %147 = vmatpush.bf16.msra.mxu0 %v681_v29  ;;  %v845_v46 = vld [vmem:[%s1305_s2 + $0x34] sm:$0xf0]  ;;  %v843_v47 = vld [vmem:[%s1305_s2 + $0x2c] sm:$0xf]  ;;  %v758_v50 = vld [vmem:[%s1305_s2 + $0x38] sm:$0xf0]  ;;  %v677_v52 = vor.u32 %v823_v42, %v674_v43 }
   0xd   :  { %160 = vmatpush.bf16.msra.mxu1 %v685_v33  ;;  %173 = vmatpush.bf16.msra.mxu2 %v689_v34  ;;  %v748_v51 = vld [vmem:[%s1305_s2 + $0x20] sm:$0xf]  ;;  %v757_v54 = vor.u32 %v845_v46, %v756_v45  ;;  %v844_v55 = vld [vmem:[%s1305_s2 + $0x2c] sm:$0xf0]  ;;  %v842_v56 = vld [vmem:[%s1305_s2 + $0x24] sm:$0xf]  ;;  %v761_v58 = vor.u32 %v843_v47, %v758_v50 }
   0xe   :  { %186 = vmatpush.bf16.msra.mxu3 %v693_v38  ;;  %v40_v53 = vld [vmem:[%s1306_s1] sm:$0xf]  ;;  %v750_v57 = vld [vmem:[%s1305_s2 + $0x30] sm:$0xf0]  ;;  %v740_v59 = vld [vmem:[%s1305_s2 + $0x8] sm:$0xf]  ;;  %v749_v1 = vor.u32 %v844_v55, %v748_v51 }
   0xf   :  { %v841_v60 = vld [vmem:[%s1305_s2 + $0x14] sm:$0xf0]  ;;  %v839_v61 = vld [vmem:[%s1305_s2 + $0xc] sm:$0xf]  ;;  %v742_v62 = vld [vmem:[%s1305_s2 + $0x18] sm:$0xf0]  ;;  %v753_v5 = vor.u32 %v842_v56, %v750_v57 }
  0x10   :  { %148 = vmatpush.bf16.msra.mxu0 %v665_v44  ;;  %v732_v63 = vld [vmem:[%s1305_s2] sm:$0xf]  ;;  %v840_v0 = vld [vmem:[%s1305_s2 + $0xc] sm:$0xf0]  ;;  %v838_v2 = vld [vmem:[%s1305_s2 + $0x4] sm:$0xf]  ;;  %v741_v6 = vor.u32 %v841_v60, %v740_v59  ;;  %v745_v10 = vor.u32 %v839_v61, %v742_v62 }
  0x11   :  { %161 = vmatpush.bf16.msra.mxu1 %v669_v48  ;;  %174 = vmatpush.bf16.msra.mxu2 %v673_v49  ;;  %v734_v3 = vld [vmem:[%s1305_s2 + $0x10] sm:$0xf0]  ;;  %v792_v4 = vld [vmem:[%s1307_s4 + $0x28] sm:$0xf]  ;;  %v853_v7 = vld [vmem:[%s1307_s4 + $0x34] sm:$0xf0]  ;;  %v733_v19 = vor.u32 %v840_v0, %v732_v63 }
  0x12   :  { %187 = vmatpush.bf16.msra.mxu3 %v677_v52  ;;  %v851_v8 = vld [vmem:[%s1307_s4 + $0x2c] sm:$0xf]  ;;  %v794_v9 = vld [vmem:[%s1307_s4 + $0x38] sm:$0xf0]  ;;  %v793_v11 = vor.u32 %v853_v7, %v792_v4  ;;  %v784_v12 = vld [vmem:[%s1307_s4 + $0x20] sm:$0xf]  ;;  %v737_v22 = vor.u32 %v838_v2, %v734_v3 }
  0x13   :  { %726 = vmatmul.msk.bf16.vlgmr.msra.gmra.mxu0 %vm137_vm0, %v40_v53  ;;  %v852_v13 = vld [vmem:[%s1307_s4 + $0x2c] sm:$0xf0]  ;;  %v850_v14 = vld [vmem:[%s1307_s4 + $0x24] sm:$0xf]  ;;  %v797_v15 = vor.u32 %v851_v8, %v794_v9  ;;  %v786_v16 = vld [vmem:[%s1307_s4 + $0x30] sm:$0xf0] }
  0x14   :  { %727 = vmatmul.msk.bf16.vlgmr.msra.gmra.mxu1 %vm137_vm0, %v40_v53  ;;  %728 = vmatmul.msk.bf16.vlgmr.msra.gmra.mxu2 %vm137_vm0, %v40_v53  ;;  %v776_v17 = vld [vmem:[%s1307_s4 + $0x8] sm:$0xf]  ;;  %v849_v18 = vld [vmem:[%s1307_s4 + $0x14] sm:$0xf0]  ;;  %v847_v20 = vld [vmem:[%s1307_s4 + $0xc] sm:$0xf]  ;;  %v785_v23 = vor.u32 %v852_v13, %v784_v12  ;;  %v789_v24 = vor.u32 %v850_v14, %v786_v16 }
  0x15   :  { %292 = vmatpush.bf16.msrb.mxu2 %v757_v54  ;;  %729 = vmatmul.msk.bf16.vlgmr.msra.gmra.mxu3 %vm137_vm0, %v40_v53  ;;  %v778_v21 = vld [vmem:[%s1307_s4 + $0x18] sm:$0xf0]  ;;  %v777_v25 = vor.u32 %v849_v18, %v776_v17  ;;  %v768_v26 = vld [vmem:[%s1307_s4] sm:$0xf]  ;;  %v848_v27 = vld [vmem:[%s1307_s4 + $0xc] sm:$0xf0] }
  0x16   :  { %305 = vmatpush.bf16.msrb.mxu3 %v761_v58  ;;  %266 = vmatpush.bf16.msrb.mxu0 %v749_v1  ;;  %v781_v28 = vor.u32 %v847_v20, %v778_v21  ;;  %v846_v29 = vld [vmem:[%s1307_s4 + $0x4] sm:$0xf]  ;;  %v770_v30 = vld [vmem:[%s1307_s4 + $0x10] sm:$0xf0]  ;;  %v769_v31 = vor.u32 %v848_v27, %v768_v26  ;;  %v812_v33 = vld [vmem:[%s1308_s6 + $0x8] sm:$0xf] }
  0x17   :  { %279 = vmatpush.bf16.msrb.mxu1 %v753_v5  ;;  %v773_v32 = vor.u32 %v846_v29, %v770_v30  ;;  %v857_v34 = vld [vmem:[%s1308_s6 + $0x14] sm:$0xf0]  ;;  %v855_v35 = vld [vmem:[%s1308_s6 + $0xc] sm:$0xf]  ;;  %v814_v36 = vld [vmem:[%s1308_s6 + $0x18] sm:$0xf0] }
  0x18   :  { %v804_v37 = vld [vmem:[%s1308_s6] sm:$0xf]  ;;  %v856_v38 = vld [vmem:[%s1308_s6 + $0xc] sm:$0xf0]  ;;  %v854_v40 = vld [vmem:[%s1308_s6 + $0x4] sm:$0xf]  ;;  %v813_v42 = vor.u32 %v857_v34, %v812_v33  ;;  %v817_v43 = vor.u32 %v855_v35, %v814_v36 }
  0x19   :  { %293 = vmatpush.bf16.msrb.mxu2 %v741_v6  ;;  %v207_v39 = vld [vmem:[%s1309_s3] sm:$0xf]  ;;  %v806_v41 = vld [vmem:[%s1308_s6 + $0x10] sm:$0xf0]  ;;  %v805_v44 = vor.u32 %v856_v38, %v804_v37 }
  0x1a   :  { %306 = vmatpush.bf16.msrb.mxu3 %v745_v10  ;;  %267 = vmatpush.bf16.msrb.mxu0 %v733_v19  ;;  %v809_v45 = vor.u32 %v854_v40, %v806_v41  ;;  %v328_v46 = vld [vmem:[%s1310_s5] sm:$0xf] }
  0x1b   :  { %280 = vmatpush.bf16.msrb.mxu1 %v737_v22  ;;  %v448_v47 = vld [vmem:[%s1311_s7] sm:$0xf] }
  0x1d   :  { %412 = vmatpush.bf16.msra.mxu2 %v793_v11 }
  0x1e   :  { %425 = vmatpush.bf16.msra.mxu3 %v797_v15  ;;  %386 = vmatpush.bf16.msra.mxu0 %v785_v23 }
  0x1f   :  { %399 = vmatpush.bf16.msra.mxu1 %v789_v24 }
  0x21   :  { %413 = vmatpush.bf16.msra.mxu2 %v777_v25 }
  0x22   :  { %426 = vmatpush.bf16.msra.mxu3 %v781_v28  ;;  %387 = vmatpush.bf16.msra.mxu0 %v769_v31 }
  0x23   :  { %400 = vmatpush.bf16.msra.mxu1 %v773_v32  ;;  %762 = vmatmul.msk.bf16.vlgmr.msrb.gmra.mxu0 %vm256_vm1, %v207_v39 }
  0x24   :  { %763 = vmatmul.msk.bf16.vlgmr.msrb.gmra.mxu1 %vm256_vm1, %v207_v39  ;;  %764 = vmatmul.msk.bf16.vlgmr.msrb.gmra.mxu2 %vm256_vm1, %v207_v39 }
  0x25   :  { %765 = vmatmul.msk.bf16.vlgmr.msrb.gmra.mxu3 %vm256_vm1, %v207_v39  ;;  %510 = vmatpush.bf16.msrb.mxu2 %v813_v42 }
  0x26   :  { %523 = vmatpush.bf16.msrb.mxu3 %v817_v43  ;;  %484 = vmatpush.bf16.msrb.mxu0 %v805_v44 }
  0x27   :  { %497 = vmatpush.bf16.msrb.mxu1 %v809_v45 }
  0x33   :  { %798 = vmatmul.msk.bf16.vlgmr.msra.gmra.mxu0 %vm256_vm1, %v328_v46 }
  0x34   :  { %799 = vmatmul.msk.bf16.vlgmr.msra.gmra.mxu1 %vm256_vm1, %v328_v46  ;;  %800 = vmatmul.msk.bf16.vlgmr.msra.gmra.mxu2 %vm256_vm1, %v328_v46 }
  0x35   :  { %801 = vmatmul.msk.bf16.vlgmr.msra.gmra.mxu3 %vm256_vm1, %v328_v46 }
  0x43   :  { %818 = vmatmul.msk.bf16.vlgmr.msrb.gmra.mxu0 %vm473_vm2, %v448_v47 }
  0x44   :  { %819 = vmatmul.msk.bf16.vlgmr.msrb.gmra.mxu1 %vm473_vm2, %v448_v47  ;;  %820 = vmatmul.msk.bf16.vlgmr.msrb.gmra.mxu2 %vm473_vm2, %v448_v47 }
  0x45   :  { %821 = vmatmul.msk.bf16.vlgmr.msrb.gmra.mxu3 %vm473_vm2, %v448_v47 }
  0x90   :  { %v1178_v48 = vpop.f32.mrf.mxu0 }
  0x91   :  { %v1180_v49 = vpop.f32.mrf.mxu1  ;;  %v198_v50 = vmul.f32 %v1178_v48, %v1178_v48 }
  0x92   :  { %v199_v51 = vmul.f32 %v1180_v49, %v1180_v49  ;;  %v193_v52 = vadd.f32 %v1180_v49, %v1178_v48 }
  0x94   :  { %v202_v53 = vadd.f32 %v199_v51, %v198_v50 }
  0x97   :  { %v1188_v54 = vpop.f32.mrf.mxu2 }
  0x98   :  { %v200_v55 = vmul.f32 %v1188_v54, %v1188_v54  ;;  %v1192_v56 = vpop.f32.mrf.mxu3  ;;  %v152_v57 = vpop.f32.mrf.mxu0  ;;  %v194_v58 = vadd.f32 %v193_v52, %v1188_v54 }
  0x99   :  { %v165_v59 = vpop.f32.mrf.mxu1  ;;  %v201_v60 = vmul.f32 %v1192_v56, %v1192_v56 }
  0x9a   :  { %v195_v61 = vadd.f32 %v194_v58, %v1192_v56  ;;  %v203_v62 = vadd.f32 %v202_v53, %v200_v55 }
  0x9c   :  { %196 = vadd.xlane.f32.xlu0 %v195_v61  ;;  %v204_v63 = vadd.f32 %v203_v62, %v201_v60  ;;  %v866_v60 = vmov 1682.0  }
  0x9d   :  { %862 = vrcp.f32 %v866_v60 }
  0x9e   :  { %205 = vadd.xlane.f32.xlu1 %v204_v63 }
  0x9f   :  { %v178_v0 = vpop.f32.mrf.mxu2 }
  0xa0   :  { %v191_v1 = vpop.f32.mrf.mxu3  ;;  %v1198_v2 = vpop.f32.mrf.mxu0 }
  0xa1   :  { %v1200_v3 = vpop.f32.mrf.mxu1  ;;  %v317_v4 = vmul.f32 %v1198_v2, %v1198_v2 }
  0xa2   :  { %v318_v5 = vmul.f32 %v1200_v3, %v1200_v3  ;;  %v312_v6 = vadd.f32 %v1200_v3, %v1198_v2 }
  0xa3   :  { %v863_v61 = vpop.eup %862 }
  0xa4   :  { %v321_v7 = vadd.f32 %v318_v5, %v317_v4  ;;  %v546_v63 = vmul.f32 1682.0, %v863_v61  ;;  %v867_v5 = vmov 0   ;;  %vm550_vm3 = vweird.f32 %v863_v61 }
  0xa5   :  { %860 = vset.pattern.permute.xlu2 %v867_v5  ;;  %861 = vset.pattern.permute.xlu0 %v867_v5 }
  0xa6   :  { %v547_v4 = vsub.f32 1.0, %v546_v63 }
  0xa7   :  { %v1208_v8 = vpop.f32.mrf.mxu2 }
  0xa8   :  { %v319_v9 = vmul.f32 %v1208_v8, %v1208_v8  ;;  %v1212_v10 = vpop.f32.mrf.mxu3  ;;  %v271_v11 = vpop.f32.mrf.mxu0  ;;  %v313_v12 = vadd.f32 %v312_v6, %v1208_v8 }
  0xa9   :  { %v284_v13 = vpop.f32.mrf.mxu1  ;;  %v320_v14 = vmul.f32 %v1212_v10, %v1212_v10 }
  0xaa   :  { %v314_v15 = vadd.f32 %v313_v12, %v1212_v10  ;;  %v322_v16 = vadd.f32 %v321_v7, %v319_v9  ;;  %v548_v7 = vmul.f32 %v863_v61, %v547_v4 }
  0xac   :  { %315 = vadd.xlane.f32.xlu0 %v314_v15  ;;  %v323_v17 = vadd.f32 %v322_v16, %v320_v14  ;;  %v549_v11 = vadd.f32 %v863_v61, %v548_v7 }
  0xae   :  { %324 = vadd.xlane.f32.xlu1 %v323_v17  ;;  %v551_v16 = vsel %vm550_vm3, %v863_v61, %v549_v11 }
  0xaf   :  { %v297_v18 = vpop.f32.mrf.mxu2 }
  0xb0   :  { %v310_v19 = vpop.f32.mrf.mxu3  ;;  %v1218_v20 = vpop.f32.mrf.mxu0 }
  0xb1   :  { %v1220_v21 = vpop.f32.mrf.mxu1  ;;  %v437_v23 = vmul.f32 %v1218_v20, %v1218_v20 }
  0xb2   :  { %v432_v22 = vadd.f32 %v1220_v21, %v1218_v20  ;;  %v438_v24 = vmul.f32 %v1220_v21, %v1220_v21 }
  0xb4   :  { %v441_v32 = vadd.f32 %v438_v24, %v437_v23 }
  0xb7   :  { %v1228_v25 = vpop.f32.mrf.mxu2 }
  0xb8   :  { %v1230_v26 = vpop.f32.mrf.mxu3  ;;  %v391_v27 = vpop.f32.mrf.mxu0  ;;  %v433_v28 = vadd.f32 %v432_v22, %v1228_v25  ;;  %v439_v30 = vmul.f32 %v1228_v25, %v1228_v25 }
  0xb9   :  { %v404_v29 = vpop.f32.mrf.mxu1  ;;  %v440_v33 = vmul.f32 %v1230_v26, %v1230_v26 }
  0xba   :  { %v434_v31 = vadd.f32 %v433_v28, %v1230_v26  ;;  %v442_v34 = vadd.f32 %v441_v32, %v439_v30 }
  0xbc   :  { %435 = vadd.xlane.f32.xlu2 %v434_v31  ;;  %v443_v41 = vadd.f32 %v442_v34, %v440_v33 }
  0xbf   :  { %v417_v35 = vpop.f32.mrf.mxu2 }
  0xc0   :  { %v430_v36 = vpop.f32.mrf.mxu3  ;;  %v1238_v37 = vpop.f32.mrf.mxu0 }
  0xc1   :  { %v1240_v38 = vpop.f32.mrf.mxu1  ;;  %v534_v39 = vmul.f32 %v1238_v37, %v1238_v37  ;;  %v556_v36 = vld [vmem:[%s1312_s8] sm:$0xff] }
  0xc2   :  { %v535_v40 = vmul.f32 %v1240_v38, %v1240_v38  ;;  %v529_v42 = vadd.f32 %v1240_v38, %v1238_v37 }
  0xc4   :  { %444 = vadd.xlane.f32.xlu2 %v443_v41  ;;  %v538_v43 = vadd.f32 %v535_v40, %v534_v39 }
  0xc7   :  { %v1248_v44 = vpop.f32.mrf.mxu2 }
  0xc8   :  { %v536_v45 = vmul.f32 %v1248_v44, %v1248_v44  ;;  %v1252_v46 = vpop.f32.mrf.mxu3  ;;  %v488_v47 = vpop.f32.mrf.mxu0  ;;  %v530_v50 = vadd.f32 %v529_v42, %v1248_v44  ;;  %v569_v42 = vld [vmem:[%s1313_s9] sm:$0xff] }
  0xc9   :  { %v501_v51 = vpop.f32.mrf.mxu1  ;;  %v537_v52 = vmul.f32 %v1252_v46, %v1252_v46 }
  0xca   :  { %v531_v53 = vadd.f32 %v530_v50, %v1252_v46  ;;  %v539_v55 = vadd.f32 %v538_v43, %v536_v45 }
  0xcc   :  { %532 = vadd.xlane.f32.xlu0 %v531_v53  ;;  %v540_v57 = vadd.f32 %v539_v55, %v537_v52 }
  0xce   :  { %541 = vadd.xlane.f32.xlu1 %v540_v57 }
  0xcf   :  { %v514_v58 = vpop.f32.mrf.mxu2 }
  0xd0   :  { %v527_v59 = vpop.f32.mrf.mxu3 }
 0x10f   :  { %v197_v62 = vpop.xlane.xlu0 %196 }
 0x111   :  { %v206_v0 = vpop.xlane.xlu1 %205 }
 0x11f   :  { %v316_v6 = vpop.xlane.xlu0 %315 }
 0x120   :  { %v326_v12 = vadd.f32 %v316_v6, %v197_v62 }
 0x121   :  { %v325_v9 = vpop.xlane.xlu1 %324 }
 0x122   :  { %v327_v14 = vadd.f32 %v325_v9, %v206_v0 }
 0x12f   :  { %v436_v1 = vpop.xlane.xlu2 %435 }
 0x130   :  { %v446_v15 = vadd.f32 %v436_v1, %v326_v12 }
 0x137   :  { %v445_v13 = vpop.xlane.xlu2 %444 }
 0x138   :  { %v447_v18 = vadd.f32 %v445_v13, %v327_v14 }
 0x13f   :  { %v533_v17 = vpop.xlane.xlu0 %532 }
 0x140   :  { %v543_v19 = vadd.f32 %v533_v17, %v446_v15 }
 0x141   :  { %v542_v22 = vpop.xlane.xlu1 %541 }
 0x142   :  { %v552_v23 = vmul.f32 %v551_v16, %v543_v19  ;;  %v544_v24 = vadd.f32 %v542_v22, %v447_v18 }
 0x144   :  { %v554_v27 = vmul.f32 %v552_v23, %v552_v23  ;;  %v553_v28 = vmul.f32 %v551_v16, %v544_v24 }
 0x146   :  { %v555_v29 = vsub.f32 %v553_v28, %v554_v27 }
 0x148   :  { %v557_v30 = vadd.f32 1e-05, %v555_v29 }
 0x14a   :  { %864 = vrsqrt.f32 %v557_v30  ;;  %vm564_vm5 = vweird.f32 %v557_v30 }
 0x150   :  { %v865_v31 = vpop.eup %864 }
 0x151   :  { %v559_v32 = vmul.f32 %v865_v31, %v557_v30  ;;  %vm565_vm4 = vweird.f32 %v865_v31 }
 0x152   :  { %vm566_vm6 = vmor %vm564_vm5, %vm565_vm4 }
 0x153   :  { %v560_v33 = vmul.f32 %v865_v31, %v559_v32 }
 0x155   :  { %v561_v34 = vmul.f32 0.5, %v560_v33 }
 0x157   :  { %v562_v35 = vsub.f32 1.5, %v561_v34 }
 0x159   :  { %v563_v39 = vmul.f32 %v865_v31, %v562_v35 }
 0x15b   :  { %v567_v40 = vsel %vm566_vm6, %v865_v31, %v563_v39 }
 0x15c   :  { %v568_v41 = vmul.f32 %v567_v40, %v556_v36 }
 0x15e   :  { %574 = vperm.xlu2 %860, %v568_v41   ;;  %v570_v43 = vmul.f32 %v568_v41, %v552_v23 }
 0x160   :  { %v571_v45 = vsub.f32 %v569_v42, %v570_v43 }
 0x162   :  { %583 = vperm.xlu0 %861, %v571_v45  }
 0x1b8   :  { %v575_v47 = vpop.permute.xlu2 %574 }
 0x1b9   :  { %v577_v50 = vmul.f32 %v575_v47, %v1178_v48  ;;  %v578_v51 = vmul.f32 %v575_v47, %v1180_v49  ;;  %v579_v52 = vmul.f32 %v575_v47, %v1188_v54  ;;  %v580_v53 = vmul.f32 %v575_v47, %v1192_v56 }
 0x1ba   :  { %v598_v55 = vmul.f32 %v575_v47, %v1198_v2  ;;  %v599_v57 = vmul.f32 %v575_v47, %v1200_v3  ;;  %v600_v58 = vmul.f32 %v575_v47, %v1208_v8  ;;  %v601_v59 = vmul.f32 %v575_v47, %v1212_v10 }
 0x1bb   :  { %v614_v60 = vmul.f32 %v575_v47, %v1218_v20  ;;  %v615_v61 = vmul.f32 %v575_v47, %v1220_v21  ;;  %v616_v48 = vmul.f32 %v575_v47, %v1228_v25  ;;  %v617_v49 = vmul.f32 %v575_v47, %v1230_v26 }
 0x1bc   :  { %v630_v54 = vmul.f32 %v575_v47, %v1238_v37  ;;  %v631_v56 = vmul.f32 %v575_v47, %v1240_v38  ;;  %v632_v2 = vmul.f32 %v575_v47, %v1248_v44  ;;  %v633_v3 = vmul.f32 %v575_v47, %v1252_v46 }
 0x1d4   :  { %v584_v62 = vpop.permute.xlu0 %583 }
 0x1d5   :  { %v586_v8 = vadd.f32 %v584_v62, %v577_v50  ;;  %v587_v63 = vadd.f32 %v584_v62, %v578_v51  ;;  %v588_v10 = vadd.f32 %v584_v62, %v579_v52  ;;  %v589_v0 = vadd.f32 %v584_v62, %v580_v53 }
 0x1d6   :  { %v602_v20 = vadd.f32 %v598_v55, %v584_v62  ;;  %v603_v1 = vadd.f32 %v599_v57, %v584_v62  ;;  %v604_v21 = vadd.f32 %v600_v58, %v584_v62  ;;  %v605_v4 = vadd.f32 %v601_v59, %v584_v62 }
 0x1d7   :  { %v590_v25 = vmax.f32 %v586_v8, 0.0  ;;  %v591_v5 = vmax.f32 %v587_v63, 0.0  ;;  %v592_v26 = vmax.f32 %v588_v10, 0.0  ;;  %v593_v6 = vmax.f32 %v589_v0, 0.0 }
 0x1d8   :  { %v606_v37 = vmax.f32 %v602_v20, 0.0  ;;  %v607_v7 = vmax.f32 %v603_v1, 0.0  ;;  %v608_v38 = vmax.f32 %v604_v21, 0.0  ;;  %v609_v9 = vmax.f32 %v605_v4, 0.0 }
 0x1d9   :  { %v594_v44 = vpack.c.bf16 %v591_v5, %v590_v25  ;;  %v595_v11 = vpack.c.bf16 %v593_v6, %v592_v26  ;;  %v618_v46 = vadd.f32 %v614_v60, %v584_v62  ;;  %v619_v12 = vadd.f32 %v615_v61, %v584_v62 }
 0x1da   :  { %v610_v13 = vpack.c.bf16 %v607_v7, %v606_v37  ;;  %v611_v14 = vpack.c.bf16 %v609_v9, %v608_v38  ;;  %v620_v15 = vadd.f32 %v616_v48, %v584_v62  ;;  %v621_v16 = vadd.f32 %v617_v49, %v584_v62 }
 0x1db   :  { %596 = vst [vmem:[%s1314_s10] sm:$0xff] %v594_v44  ;;  %v622_v17 = vmax.f32 %v618_v46, 0.0  ;;  %v623_v18 = vmax.f32 %v619_v12, 0.0  ;;  %v634_v19 = vadd.f32 %v630_v54, %v584_v62  ;;  %v635_v22 = vadd.f32 %v631_v56, %v584_v62 }
 0x1dc   :  { %597 = vst [vmem:[%s1314_s10 + $0x8] sm:$0xff] %v595_v11  ;;  %v624_v23 = vmax.f32 %v620_v15, 0.0  ;;  %v625_v24 = vmax.f32 %v621_v16, 0.0  ;;  %v636_v27 = vadd.f32 %v632_v2, %v584_v62  ;;  %v637_v28 = vadd.f32 %v633_v3, %v584_v62 }
 0x1dd   :  { %612 = vst [vmem:[%s1315_s11] sm:$0xff] %v610_v13  ;;  %v626_v29 = vpack.c.bf16 %v623_v18, %v622_v17  ;;  %v638_v30 = vmax.f32 %v634_v19, 0.0  ;;  %v639_v31 = vmax.f32 %v635_v22, 0.0 }
 0x1de   :  { %613 = vst [vmem:[%s1315_s11 + $0x8] sm:$0xff] %v611_v14  ;;  %v627_v32 = vpack.c.bf16 %v625_v24, %v624_v23  ;;  %v640_v33 = vmax.f32 %v636_v27, 0.0  ;;  %v641_v34 = vmax.f32 %v637_v28, 0.0 }
 0x1df   :  { %628 = vst [vmem:[%s1316_s12] sm:$0xff] %v626_v29  ;;  %v642_v35 = vpack.c.bf16 %v639_v31, %v638_v30 }
 0x1e0   :  { %629 = vst [vmem:[%s1316_s12 + $0x8] sm:$0xff] %v627_v32  ;;  %v643_v36 = vpack.c.bf16 %v641_v34, %v640_v33 }
 0x1e1   :  { %644 = vst [vmem:[%s1317_s13] sm:$0xff] %v642_v35 }
 0x1e2   :  { %645 = vst [vmem:[%s1317_s13 + $0x8] sm:$0xff] %v643_v36 }

// kernel: decoder_forward.9
= control target key start
LH: loop header
LB: loop body
LE: loop exit
PB: predicated region body
PF: predicated region fallthrough
CT: control target
= control target key end

     0   :  { %s1426_s9 = smov 0   ;;  %s1428_s10 = smov 0   ;;  %s1787_s0 = inlined_call_operand.vmem [shape: bf16[129,1792], index: 0, kind: input, shape index: {}]   ;;  %s1788_s1 = inlined_call_operand.vmem [shape: bf16[3,129], index: 1, kind: input, shape index: {}]   ;;  %s1789_s2 = inlined_call_operand.vmem [shape: f32[3,1792], index: 2, kind: output, shape index: {}]  }
   0x1   :  { %s1430_s11 = smov 0  }
   0x2 LB: > { %s1014_s12 = sadd.s32 4294967295, %s1408_s11   ;;  %s1443_s13 = sadd.s32 1, %s1408_s11   ;;  %s1408_s11 = sphi %s1430_s11, %s1792_s11   ;;  %s1404_s10 = sphi %s1428_s10, %s1791_s10   ;;  %s1400_s9 = sphi %s1426_s9, %s1790_s9  }
   0x3   : > { %s16_s14 = ssub.s32 %s1408_s11, %s1443_s13  ;;  %s19_s15 = sadd.s32 1, %s1404_s10 }
   0x4   : > { %p17_p0 = scmp.eq.s32.totalorder %s16_s14, 0  ;;  %p26_p1 = scmp.ne.s32.totalorder %s1404_s10, %s1400_s9 }
   0x5   : > { %p27_p2 = scmp.eq.s32.totalorder %s1408_s11, 0  ;;  %p1017_p4 = scmp.ge.s32.totalorder %s1408_s11, 2 }
   0x6   : > { %s1452_s16 = scalar_select %p17_p0, %s1404_s10, %s19_s15  }
   0x7   : > { %p28_p3 = por %p27_p2, %p26_p1  ;;  %102 = sbr.rel (%p1017_p4) target bundleno = 85 (0x55), region = 20 }
   0xc   : > { %105 = sbr.rel (!%p28_p3) target bundleno = 85 (0x55), region = 24  ;;  %s107_s17 = sand.u32 (%p28_p3), 1, %s1404_s10  }
   0xd   : > { %s1288_s18 = smul.u32 (%p28_p3), 28, %s1408_s11 }
   0xe   : > { %s1345_s19 = smul.u32 (%p28_p3), 476, %s107_s17 }
   0xf   : > { %s1460_s22 = scalar_lea.vmem (%p28_p3), %s1787_s0, %s1288_s18 }
  0x10   : > { %v127_v0 = vld [vmem:[%s1460_s22] sm:$0xff] (%p28_p3)  ;;  %v129_v1 = vld [vmem:[%s1460_s22 + $0x8] sm:$0xff] (%p28_p3)  ;;  %v131_v2 = vld [vmem:[%s1460_s22 + $0x10] sm:$0xff] (%p28_p3)  ;;  %s1465_s23 = scalar_lea.vmem (%p28_p3), [#allocation2], %s1345_s19 }
  0x11   : > { %128 = vst [vmem:[%s1465_s23] sm:$0xff] %v127_v0  ;;  %v133_v3 = vld [vmem:[%s1460_s22 + $0x38] sm:$0xff]  ;;  %v135_v4 = vld [vmem:[%s1460_s22 + $0x40] sm:$0xff]  ;;  %v137_v5 = vld [vmem:[%s1460_s22 + $0x48] sm:$0xff] }
  0x12   : > { %130 = vst [vmem:[%s1465_s23 + $0x8] sm:$0xff] %v129_v1  ;;  %v139_v6 = vld [vmem:[%s1460_s22 + $0x70] sm:$0xff]  ;;  %v141_v7 = vld [vmem:[%s1460_s22 + $0x78] sm:$0xff]  ;;  %v143_v8 = vld [vmem:[%s1460_s22 + $0x80] sm:$0xff] }
  0x13   : > { %132 = vst [vmem:[%s1465_s23 + $0x10] sm:$0xff] %v131_v2  ;;  %v145_v9 = vld [vmem:[%s1460_s22 + $0xa8] sm:$0xff]  ;;  %v147_v10 = vld [vmem:[%s1460_s22 + $0xb0] sm:$0xff]  ;;  %v149_v11 = vld [vmem:[%s1460_s22 + $0xb8] sm:$0xff] }
  0x14   : > { %134 = vst [vmem:[%s1465_s23 + $0x1c] sm:$0xff] %v133_v3  ;;  %v151_v12 = vld [vmem:[%s1460_s22 + $0xe0] sm:$0xff]  ;;  %v153_v13 = vld [vmem:[%s1460_s22 + $0xe8] sm:$0xff]  ;;  %v155_v14 = vld [vmem:[%s1460_s22 + $0xf0] sm:$0xff] }
  0x15   : > { %136 = vst [vmem:[%s1465_s23 + $0x24] sm:$0xff] %v135_v4  ;;  %v157_v15 = vld [vmem:[%s1460_s22 + $0x118] sm:$0xff]  ;;  %v159_v16 = vld [vmem:[%s1460_s22 + $0x120] sm:$0xff]  ;;  %v161_v17 = vld [vmem:[%s1460_s22 + $0x128] sm:$0xff] }
  0x16   : > { %138 = vst [vmem:[%s1465_s23 + $0x2c] sm:$0xff] %v137_v5  ;;  %v163_v18 = vld [vmem:[%s1460_s22 + $0x150] sm:$0xff]  ;;  %v165_v19 = vld [vmem:[%s1460_s22 + $0x158] sm:$0xff]  ;;  %v167_v20 = vld [vmem:[%s1460_s22 + $0x160] sm:$0xff] }
  0x17   : > { %140 = vst [vmem:[%s1465_s23 + $0x38] sm:$0xff] %v139_v6  ;;  %v169_v21 = vld [vmem:[%s1460_s22 + $0x188] sm:$0xff]  ;;  %v171_v22 = vld [vmem:[%s1460_s22 + $0x190] sm:$0xff]  ;;  %v173_v23 = vld [vmem:[%s1460_s22 + $0x198] sm:$0xff] }
  0x18   : > { %142 = vst [vmem:[%s1465_s23 + $0x40] sm:$0xff] %v141_v7  ;;  %v175_v24 = vld [vmem:[%s1460_s22 + $0x1c0] sm:$0xff]  ;;  %v177_v25 = vld [vmem:[%s1460_s22 + $0x1c8] sm:$0xff]  ;;  %v179_v26 = vld [vmem:[%s1460_s22 + $0x1d0] sm:$0xff] }
  0x19   : > { %144 = vst [vmem:[%s1465_s23 + $0x48] sm:$0xff] %v143_v8  ;;  %v181_v27 = vld [vmem:[%s1460_s22 + $0x1f8] sm:$0xff]  ;;  %v183_v28 = vld [vmem:[%s1460_s22 + $0x200] sm:$0xff]  ;;  %v185_v29 = vld [vmem:[%s1460_s22 + $0x208] sm:$0xff] }
  0x1a   : > { %146 = vst [vmem:[%s1465_s23 + $0x54] sm:$0xff] %v145_v9  ;;  %v187_v30 = vld [vmem:[%s1460_s22 + $0x230] sm:$0xff]  ;;  %v189_v31 = vld [vmem:[%s1460_s22 + $0x238] sm:$0xff]  ;;  %v191_v32 = vld [vmem:[%s1460_s22 + $0x240] sm:$0xff] }
  0x1b   : > { %148 = vst [vmem:[%s1465_s23 + $0x5c] sm:$0xff] %v147_v10  ;;  %v193_v33 = vld [vmem:[%s1460_s22 + $0x268] sm:$0xff]  ;;  %v195_v34 = vld [vmem:[%s1460_s22 + $0x270] sm:$0xff]  ;;  %v197_v35 = vld [vmem:[%s1460_s22 + $0x278] sm:$0xff] }
  0x1c   : > { %150 = vst [vmem:[%s1465_s23 + $0x64] sm:$0xff] %v149_v11  ;;  %v199_v36 = vld [vmem:[%s1460_s22 + $0x2a0] sm:$0xff]  ;;  %v201_v37 = vld [vmem:[%s1460_s22 + $0x2a8] sm:$0xff]  ;;  %v203_v38 = vld [vmem:[%s1460_s22 + $0x2b0] sm:$0xff] }
  0x1d   : > { %152 = vst [vmem:[%s1465_s23 + $0x70] sm:$0xff] %v151_v12  ;;  %v205_v39 = vld [vmem:[%s1460_s22 + $0x2d8] sm:$0xff]  ;;  %v207_v40 = vld [vmem:[%s1460_s22 + $0x2e0] sm:$0xff]  ;;  %v209_v41 = vld [vmem:[%s1460_s22 + $0x2e8] sm:$0xff] }
  0x1e   : > { %154 = vst [vmem:[%s1465_s23 + $0x78] sm:$0xff] %v153_v13  ;;  %v211_v42 = vld [vmem:[%s1460_s22 + $0x310] sm:$0xff]  ;;  %v213_v43 = vld [vmem:[%s1460_s22 + $0x318] sm:$0xff]  ;;  %v215_v44 = vld [vmem:[%s1460_s22 + $0x320] sm:$0xff] }
  0x1f   : > { %156 = vst [vmem:[%s1465_s23 + $0x80] sm:$0xff] %v155_v14  ;;  %v217_v45 = vld [vmem:[%s1460_s22 + $0x348] sm:$0xff]  ;;  %v219_v46 = vld [vmem:[%s1460_s22 + $0x350] sm:$0xff]  ;;  %v221_v47 = vld [vmem:[%s1460_s22 + $0x358] sm:$0xff] }
  0x20   : > { %158 = vst [vmem:[%s1465_s23 + $0x8c] sm:$0xff] %v157_v15  ;;  %v223_v48 = vld [vmem:[%s1460_s22 + $0x380] sm:$0xff]  ;;  %v225_v49 = vld [vmem:[%s1460_s22 + $0x388] sm:$0xff]  ;;  %v227_v50 = vld [vmem:[%s1460_s22 + $0x390] sm:$0xff] }
  0x21   : > { %160 = vst [vmem:[%s1465_s23 + $0x94] sm:$0xff] %v159_v16  ;;  %v1019_v51 = vld [vmem:[%s1460_s22 + $0x18] sm:$0xf]  ;;  %v1021_v52 = vld [vmem:[%s1460_s22 + $0x50] sm:$0xf] }
  0x22   : > { %162 = vst [vmem:[%s1465_s23 + $0x9c] sm:$0xff] %v161_v17  ;;  %v1023_v53 = vld [vmem:[%s1460_s22 + $0x88] sm:$0xf]  ;;  %v1025_v54 = vld [vmem:[%s1460_s22 + $0xc0] sm:$0xf] }
  0x23   : > { %164 = vst [vmem:[%s1465_s23 + $0xa8] sm:$0xff] %v163_v18  ;;  %v1027_v55 = vld [vmem:[%s1460_s22 + $0xf8] sm:$0xf]  ;;  %v1029_v56 = vld [vmem:[%s1460_s22 + $0x130] sm:$0xf] }
  0x24   : > { %166 = vst [vmem:[%s1465_s23 + $0xb0] sm:$0xff] %v165_v19  ;;  %v1031_v57 = vld [vmem:[%s1460_s22 + $0x168] sm:$0xf]  ;;  %v1033_v58 = vld [vmem:[%s1460_s22 + $0x1a0] sm:$0xf] }
  0x25   : > { %168 = vst [vmem:[%s1465_s23 + $0xb8] sm:$0xff] %v167_v20  ;;  %v1035_v59 = vld [vmem:[%s1460_s22 + $0x1d8] sm:$0xf]  ;;  %v1037_v60 = vld [vmem:[%s1460_s22 + $0x210] sm:$0xf] }
  0x26   : > { %170 = vst [vmem:[%s1465_s23 + $0xc4] sm:$0xff] %v169_v21  ;;  %v1039_v61 = vld [vmem:[%s1460_s22 + $0x248] sm:$0xf]  ;;  %v1041_v62 = vld [vmem:[%s1460_s22 + $0x280] sm:$0xf] }
  0x27   : > { %172 = vst [vmem:[%s1465_s23 + $0xcc] sm:$0xff] %v171_v22  ;;  %v1043_v63 = vld [vmem:[%s1460_s22 + $0x2b8] sm:$0xf]  ;;  %v1045_v0 = vld [vmem:[%s1460_s22 + $0x2f0] sm:$0xf] }
  0x28   : > { %174 = vst [vmem:[%s1465_s23 + $0xd4] sm:$0xff] %v173_v23  ;;  %v1047_v1 = vld [vmem:[%s1460_s22 + $0x328] sm:$0xf]  ;;  %v1049_v2 = vld [vmem:[%s1460_s22 + $0x360] sm:$0xf] }
  0x29   : > { %176 = vst [vmem:[%s1465_s23 + $0xe0] sm:$0xff] %v175_v24  ;;  %v1051_v3 = vld [vmem:[%s1460_s22 + $0x398] sm:$0xf] }
  0x2a   : > { %178 = vst [vmem:[%s1465_s23 + $0xe8] sm:$0xff] %v177_v25 }
  0x2b   : > { %180 = vst [vmem:[%s1465_s23 + $0xf0] sm:$0xff] %v179_v26 }
  0x2c   : > { %182 = vst [vmem:[%s1465_s23 + $0xfc] sm:$0xff] %v181_v27 }
  0x2d   : > { %184 = vst [vmem:[%s1465_s23 + $0x104] sm:$0xff] %v183_v28 }
  0x2e   : > { %186 = vst [vmem:[%s1465_s23 + $0x10c] sm:$0xff] %v185_v29 }
  0x2f   : > { %188 = vst [vmem:[%s1465_s23 + $0x118] sm:$0xff] %v187_v30 }
  0x30   : > { %190 = vst [vmem:[%s1465_s23 + $0x120] sm:$0xff] %v189_v31 }
  0x31   : > { %192 = vst [vmem:[%s1465_s23 + $0x128] sm:$0xff] %v191_v32 }
  0x32   : > { %194 = vst [vmem:[%s1465_s23 + $0x134] sm:$0xff] %v193_v33 }
  0x33   : > { %196 = vst [vmem:[%s1465_s23 + $0x13c] sm:$0xff] %v195_v34 }
  0x34   : > { %198 = vst [vmem:[%s1465_s23 + $0x144] sm:$0xff] %v197_v35 }
  0x35   : > { %200 = vst [vmem:[%s1465_s23 + $0x150] sm:$0xff] %v199_v36 }
  0x36   : > { %202 = vst [vmem:[%s1465_s23 + $0x158] sm:$0xff] %v201_v37 }
  0x37   : > { %204 = vst [vmem:[%s1465_s23 + $0x160] sm:$0xff] %v203_v38 }
  0x38   : > { %206 = vst [vmem:[%s1465_s23 + $0x16c] sm:$0xff] %v205_v39 }
  0x39   : > { %208 = vst [vmem:[%s1465_s23 + $0x174] sm:$0xff] %v207_v40 }
  0x3a   : > { %210 = vst [vmem:[%s1465_s23 + $0x17c] sm:$0xff] %v209_v41 }
  0x3b   : > { %212 = vst [vmem:[%s1465_s23 + $0x188] sm:$0xff] %v211_v42 }
  0x3c   : > { %214 = vst [vmem:[%s1465_s23 + $0x190] sm:$0xff] %v213_v43 }
  0x3d   : > { %216 = vst [vmem:[%s1465_s23 + $0x198] sm:$0xff] %v215_v44 }
  0x3e   : > { %218 = vst [vmem:[%s1465_s23 + $0x1a4] sm:$0xff] %v217_v45 }
  0x3f   : > { %220 = vst [vmem:[%s1465_s23 + $0x1ac] sm:$0xff] %v219_v46 }
  0x40   : > { %222 = vst [vmem:[%s1465_s23 + $0x1b4] sm:$0xff] %v221_v47 }
  0x41   : > { %224 = vst [vmem:[%s1465_s23 + $0x1c0] sm:$0xff] %v223_v48 }
  0x42   : > { %226 = vst [vmem:[%s1465_s23 + $0x1c8] sm:$0xff] %v225_v49 }
  0x43   : > { %228 = vst [vmem:[%s1465_s23 + $0x1d0] sm:$0xff] %v227_v50 }
  0x44   : > { %1020 = vst [vmem:[%s1465_s23 + $0x18] sm:$0xf] %v1019_v51 }
  0x45   : > { %1022 = vst [vmem:[%s1465_s23 + $0x34] sm:$0xf] %v1021_v52 }
  0x46   : > { %1024 = vst [vmem:[%s1465_s23 + $0x50] sm:$0xf] %v1023_v53 }
  0x47   : > { %1026 = vst [vmem:[%s1465_s23 + $0x6c] sm:$0xf] %v1025_v54 }
  0x48   : > { %1028 = vst [vmem:[%s1465_s23 + $0x88] sm:$0xf] %v1027_v55 }
  0x49   : > { %1030 = vst [vmem:[%s1465_s23 + $0xa4] sm:$0xf] %v1029_v56 }
  0x4a   : > { %1032 = vst [vmem:[%s1465_s23 + $0xc0] sm:$0xf] %v1031_v57 }
  0x4b   : > { %1034 = vst [vmem:[%s1465_s23 + $0xdc] sm:$0xf] %v1033_v58 }
  0x4c   : > { %1036 = vst [vmem:[%s1465_s23 + $0xf8] sm:$0xf] %v1035_v59 }
  0x4d   : > { %1038 = vst [vmem:[%s1465_s23 + $0x114] sm:$0xf] %v1037_v60 }
  0x4e   : > { %1040 = vst [vmem:[%s1465_s23 + $0x130] sm:$0xf] %v1039_v61 }
  0x4f   : > { %1042 = vst [vmem:[%s1465_s23 + $0x14c] sm:$0xf] %v1041_v62 }
  0x50   : > { %1044 = vst [vmem:[%s1465_s23 + $0x168] sm:$0xf] %v1043_v63 }
  0x51   : > { %1046 = vst [vmem:[%s1465_s23 + $0x184] sm:$0xf] %v1045_v0 }
  0x52   : > { %1048 = vst [vmem:[%s1465_s23 + $0x1a0] sm:$0xf] %v1047_v1 }
  0x53   : > { %1050 = vst [vmem:[%s1465_s23 + $0x1bc] sm:$0xf] %v1049_v2 }
  0x54   : > { %1052 = vst [vmem:[%s1465_s23 + $0x1d8] sm:$0xf] %v1051_v3 }
  0x55 PF: > { %p1053_p5 = scmp.ge.s32.totalorder %s1408_s11, 1  ;;  %p275_p6 = scmp.lt.s32.totalorder %s1408_s11, 3 }
  0x57   : > { %p276_p7 = pnand %p1053_p5, %p275_p6 }
  0x58   : > { %s282_s24 = sand.u32 (!%p276_p7), 1, %s1400_s9   ;;  %s304_s29 = smul.u32 (!%p276_p7), 7, %s1014_s12 }
  0x59   : > { %279 = sbr.rel (%p276_p7) target bundleno = 326 (0x146), region = 50 }
  0x5a   : > { %s1346_s27 = smul.u32 (!%p276_p7), 476, %s282_s24  ;;  %p305_p8 = scmp.lt.s32.totalorder (!%p276_p7), %s304_s29, 13 }
  0x5c   : > { %s1606_s28 = scalar_lea.vmem (!%p276_p7), [#allocation2], %s1346_s27 }
  0x5e   : > { %v311_v4 = vld [vmem:[%s1788_s1] sm:$0xf]  ;;  %vm694_vm0 = vcmask 1040384   ;;  %v1253_v5 = vld [vmem:[%s1606_s28 + $0x188] sm:$0xf]  ;;  %v1410_v22 = vmov 0  }
  0x5f   : > { %381 = vst [vmem:[#allocation1] ss:$4 sm:$0xff] %v311_v4  ;;  %v1341_v6 = vld [vmem:[%s1606_s28 + $0x1a0] sm:$0xf0]  ;;  %v1338_v7 = vld [vmem:[%s1606_s28 + $0x18c] sm:$0xf] }
  0x60   : > { %v1254_v8 = vor.u32 %v1341_v6, %v1253_v5  ;;  %v1255_v9 = vld [vmem:[%s1606_s28 + $0x1a4] sm:$0xf0]  ;;  %v1225_v10 = vld [vmem:[%s1606_s28 + $0x150] sm:$0xf]  ;;  %v1334_v11 = vld [vmem:[%s1606_s28 + $0x168] sm:$0xf0] }
  0x61   : > { %v1258_v12 = vor.u32 %v1338_v7, %v1255_v9  ;;  %v376_v13 = vld [vmem:[%s1606_s28 + $0x1c0] sm:$0x11]  ;;  %v1331_v14 = vld [vmem:[%s1606_s28 + $0x154] sm:$0xf]  ;;  %v1227_v15 = vld [vmem:[%s1606_s28 + $0x16c] sm:$0xf0]  ;;  %v1226_v16 = vor.u32 %v1334_v11, %v1225_v10 }
  0x62   : > { %718 = vmatpush.bf16.msra.mxu0 %v1254_v8  ;;  %v565_v17 = vunpack.c.l.b16 %v376_v13  ;;  %v566_v18 = vunpack.c.h.b16 %v376_v13  ;;  %v1261_v19 = vld [vmem:[%s1606_s28 + $0x190] sm:$0xf]  ;;  %v1342_v20 = vld [vmem:[%s1606_s28 + $0x1a8] sm:$0xf0]  ;;  %v1623_v23 = vsel %vm694_vm0, 65535, %v1410_v22  ;;  %v1230_v24 = vor.u32 %v1331_v14, %v1227_v15  ;;  %s1794_s29 = smov (!%p305_p8, %s304_s29), 13 }
  0x63   : > { %v1620_v21 = vld [vmem:[%s1606_s28 + $0x1c8] sm:$0x11]  ;;  %744 = vmatpush.bf16.msra.mxu2 %v1258_v12  ;;  %v1197_v26 = vld [vmem:[%s1606_s28 + $0x118] sm:$0xf]  ;;  %v1327_v27 = vld [vmem:[%s1606_s28 + $0x130] sm:$0xf0]  ;;  %v1262_v32 = vor.u32 %v1342_v20, %v1261_v19 }
  0x64   : > { %v567_v25 = vunpack.c.l.b16 %v1620_v21  ;;  %v628_v28 = vpack.c.b16 %v565_v17, %v565_v17  ;;  %v629_v29 = vpack.c.b16 %v566_v18, %v566_v18  ;;  %v1324_v30 = vld [vmem:[%s1606_s28 + $0x11c] sm:$0xf]  ;;  %v1199_v31 = vld [vmem:[%s1606_s28 + $0x134] sm:$0xf0]  ;;  %v1339_v34 = vld [vmem:[%s1606_s28 + $0x194] sm:$0xf]  ;;  %v1198_v38 = vor.u32 %v1327_v27, %v1197_v26 }
  0x65   : > { %v1263_v35 = vld [vmem:[%s1606_s28 + $0x1ac] sm:$0xf0]  ;;  %v1233_v40 = vld [vmem:[%s1606_s28 + $0x158] sm:$0xf]  ;;  %v1335_v41 = vld [vmem:[%s1606_s28 + $0x170] sm:$0xf0]  ;;  %v1202_v43 = vor.u32 %v1324_v30, %v1199_v31  ;;  %v568_v18 = vunpack.c.h.b16 %v1620_v21 }
  0x66   : > { %v630_v33 = vpack.c.b16 %v567_v25, %v567_v25  ;;  %719 = vmatpush.bf16.msra.mxu0 %v1226_v16  ;;  %v698_v36 = vand.u32 %v1623_v23, %v628_v28  ;;  %v701_v37 = vand.u32 %v1623_v23, %v629_v29  ;;  %v1634_v39 = vld.sshfl [vmem:[#allocation1 + $0x8] sm:$0xff pattern:$0x73625140]  ;;  %v1320_v45 = vld [vmem:[%s1606_s28 + $0xf8] sm:$0xf0]  ;;  %vm691_vm1 = vcmask 7168  }
  0x67   : > { %745 = vmatpush.bf16.msra.mxu2 %v1230_v24  ;;  %v1169_v44 = vld [vmem:[%s1606_s28 + $0xe0] sm:$0xf]  ;;  %v1266_v46 = vor.u32 %v1339_v34, %v1263_v35  ;;  %v1317_v47 = vld [vmem:[%s1606_s28 + $0xe4] sm:$0xf]  ;;  %v1234_v49 = vor.u32 %v1335_v41, %v1233_v40  ;;  %v1332_v50 = vld [vmem:[%s1606_s28 + $0x15c] sm:$0xf] }
  0x68   : > { %v704_v42 = vand.u32 %v1623_v23, %v630_v33  ;;  %738 = vmatpush.bf16.msra.mxu1 %v698_v36  ;;  %764 = vmatpush.bf16.msra.mxu3 %v701_v37  ;;  %v1171_v48 = vld [vmem:[%s1606_s28 + $0xfc] sm:$0xf0]  ;;  %v1235_v51 = vld [vmem:[%s1606_s28 + $0x174] sm:$0xf0]  ;;  %v1170_v52 = vor.u32 %v1320_v45, %v1169_v44  ;;  %v1328_v54 = vld [vmem:[%s1606_s28 + $0x138] sm:$0xf0] }
  0x69   : > { %v1205_v53 = vld [vmem:[%s1606_s28 + $0x120] sm:$0xf]  ;;  %v1174_v55 = vor.u32 %v1317_v47, %v1171_v48  ;;  %v1141_v56 = vld [vmem:[%s1606_s28 + $0xa8] sm:$0xf]  ;;  %v1313_v57 = vld [vmem:[%s1606_s28 + $0xc0] sm:$0xf0]  ;;  %v1238_v58 = vor.u32 %v1332_v50, %v1235_v51 }
  0x6a   : > { %720 = vmatpush.bf16.msra.mxu0 %v1198_v38  ;;  %v1310_v59 = vld [vmem:[%s1606_s28 + $0xac] sm:$0xf]  ;;  %v1143_v60 = vld [vmem:[%s1606_s28 + $0xc4] sm:$0xf0]  ;;  %v1206_v61 = vor.u32 %v1328_v54, %v1205_v53  ;;  %v1325_v62 = vld [vmem:[%s1606_s28 + $0x124] sm:$0xf]  ;;  %v1142_v0 = vor.u32 %v1313_v57, %v1141_v56 }
  0x6b   : > { %746 = vmatpush.bf16.msra.mxu2 %v1202_v43  ;;  %1280 = vmatmul.msk.bf16.vlgmr.msra.gmra.mxu3 %vm691_vm1, %v1634_v39  ;;  %v1207_v63 = vld [vmem:[%s1606_s28 + $0x13c] sm:$0xf0]  ;;  %v1177_v1 = vld [vmem:[%s1606_s28 + $0xe8] sm:$0xf]  ;;  %v1321_v2 = vld [vmem:[%s1606_s28 + $0x100] sm:$0xf0]  ;;  %v1146_v3 = vor.u32 %v1310_v59, %v1143_v60 }
  0x6c   : > { %770 = vmatpush.bf16.msrb.mxu1 %v1262_v32  ;;  %790 = vmatpush.bf16.msrb.mxu3 %v704_v42  ;;  %v1113_v4 = vld [vmem:[%s1606_s28 + $0x70] sm:$0xf]  ;;  %v1306_v5 = vld [vmem:[%s1606_s28 + $0x88] sm:$0xf0]  ;;  %v1210_v6 = vor.u32 %v1325_v62, %v1207_v63  ;;  %v1303_v7 = vld [vmem:[%s1606_s28 + $0x74] sm:$0xf]  ;;  %v1178_v9 = vor.u32 %v1321_v2, %v1177_v1  ;;  %v631_v32 = vpack.c.b16 %v568_v18, %v568_v18 }
  0x6d   : > { %1279 = vmatmul.msk.bf16.vlgmr.msra.gmra.mxu1 %vm691_vm1, %v1634_v39  ;;  %v1115_v8 = vld [vmem:[%s1606_s28 + $0x8c] sm:$0xf0]  ;;  %v1318_v10 = vld [vmem:[%s1606_s28 + $0xec] sm:$0xf]  ;;  %v1179_v11 = vld [vmem:[%s1606_s28 + $0x104] sm:$0xf0]  ;;  %v1114_v12 = vor.u32 %v1306_v5, %v1113_v4 }
  0x6e   : > { %721 = vmatpush.bf16.msra.mxu0 %v1170_v52  ;;  %v1149_v13 = vld [vmem:[%s1606_s28 + $0xb0] sm:$0xf]  ;;  %v1314_v14 = vld [vmem:[%s1606_s28 + $0xc8] sm:$0xf0]  ;;  %v1118_v15 = vor.u32 %v1303_v7, %v1115_v8  ;;  %v1085_v16 = vld [vmem:[%s1606_s28 + $0x38] sm:$0xf]  ;;  %v1182_v19 = vor.u32 %v1318_v10, %v1179_v11 }
  0x6f   : > { %747 = vmatpush.bf16.msra.mxu2 %v1174_v55  ;;  %v1299_v17 = vld [vmem:[%s1606_s28 + $0x50] sm:$0xf0]  ;;  %v1296_v20 = vld [vmem:[%s1606_s28 + $0x3c] sm:$0xf]  ;;  %v1087_v22 = vld [vmem:[%s1606_s28 + $0x54] sm:$0xf0]  ;;  %v1150_v24 = vor.u32 %v1314_v14, %v1149_v13 }
  0x70   : > { %796 = vmatpush.bf16.msra.mxu3 %v1266_v46  ;;  %771 = vmatpush.bf16.msrb.mxu1 %v1234_v49  ;;  %v1311_v25 = vld [vmem:[%s1606_s28 + $0xb4] sm:$0xf]  ;;  %v1151_v26 = vld [vmem:[%s1606_s28 + $0xcc] sm:$0xf0]  ;;  %v1086_v27 = vor.u32 %v1299_v17, %v1085_v16  ;;  %v1121_v28 = vld [vmem:[%s1606_s28 + $0x78] sm:$0xf]  ;;  %v1090_v21 = vor.u32 %v1296_v20, %v1087_v22  ;;  %v707_v46 = vand.u32 %v1623_v23, %v631_v32 }
  0x71   : > { %v1307_v29 = vld [vmem:[%s1606_s28 + $0x90] sm:$0xf0]  ;;  %v1057_v30 = vld [vmem:[%s1606_s28] sm:$0xf]  ;;  %v1292_v31 = vld [vmem:[%s1606_s28 + $0x18] sm:$0xf0]  ;;  %v1154_v33 = vor.u32 %v1311_v25, %v1151_v26 }
  0x72   : > { %722 = vmatpush.bf16.msra.mxu0 %v1142_v0  ;;  %v1289_v34 = vld [vmem:[%s1606_s28 + $0x4] sm:$0xf]  ;;  %v1059_v35 = vld [vmem:[%s1606_s28 + $0x1c] sm:$0xf0]  ;;  %v1304_v36 = vld [vmem:[%s1606_s28 + $0x7c] sm:$0xf]  ;;  %v1122_v37 = vor.u32 %v1307_v29, %v1121_v28  ;;  %v1058_v42 = vor.u32 %v1292_v31, %v1057_v30 }
  0x73   : > { %748 = vmatpush.bf16.msra.mxu2 %v1146_v3  ;;  %v1123_v38 = vld [vmem:[%s1606_s28 + $0x94] sm:$0xf0]  ;;  %v1343_v41 = vld [vmem:[%s1606_s28 + $0x1b0] sm:$0xf0]  ;;  %v1093_v43 = vld [vmem:[%s1606_s28 + $0x40] sm:$0xf]  ;;  %v1062_v45 = vor.u32 %v1289_v34, %v1059_v35 }
  0x74   : > { %797 = vmatpush.bf16.msra.mxu3 %v1238_v58  ;;  %772 = vmatpush.bf16.msrb.mxu1 %v1206_v61  ;;  %v1269_v40 = vld [vmem:[%s1606_s28 + $0x198] sm:$0xf]  ;;  %v1300_v44 = vld [vmem:[%s1606_s28 + $0x58] sm:$0xf0]  ;;  %v1126_v49 = vor.u32 %v1304_v36, %v1123_v38  ;;  %v1297_v52 = vld [vmem:[%s1606_s28 + $0x44] sm:$0xf] }
  0x75   : > { %v1340_v47 = vld [vmem:[%s1606_s28 + $0x19c] sm:$0xf]  ;;  %v1271_v48 = vld [vmem:[%s1606_s28 + $0x1b4] sm:$0xf0]  ;;  %v1270_v50 = vor.u32 %v1343_v41, %v1269_v40  ;;  %v1095_v53 = vld [vmem:[%s1606_s28 + $0x5c] sm:$0xf0]  ;;  %v1094_v54 = vor.u32 %v1300_v44, %v1093_v43 }
  0x76   : > { %723 = vmatpush.bf16.msra.mxu0 %v1114_v12  ;;  %v1691_v51 = vld.sshfl [vmem:[#allocation1] sm:$0xff pattern:$0x73625140]  ;;  %v378_v57 = vld [vmem:[%s1606_s28 + $0x1d0] sm:$0x11]  ;;  %v1274_v60 = vor.u32 %v1340_v47, %v1271_v48  ;;  %v1098_v1 = vor.u32 %v1297_v52, %v1095_v53  ;;  %s1054_s30 = sshll.u32 %s1794_s29, 2 }
  0x77   : > { %749 = vmatpush.bf16.msra.mxu2 %v1118_v15  ;;  %v1241_v55 = vld [vmem:[%s1606_s28 + $0x160] sm:$0xf]  ;;  %v1336_v56 = vld [vmem:[%s1606_s28 + $0x178] sm:$0xf0]  ;;  %v1065_v58 = vld [vmem:[%s1606_s28 + $0x8] sm:$0xf]  ;;  %v569_v61 = vunpack.c.l.b16 %v378_v57  ;;  %v570_v0 = vunpack.c.h.b16 %v378_v57  ;;  %s1768_s5 = scalar_lea.vmem %s1789_s2, %s1054_s30 }
  0x78   : > { %798 = vmatpush.bf16.msra.mxu3 %v1210_v6  ;;  %773 = vmatpush.bf16.msrb.mxu1 %v1178_v9  ;;  %v1293_v59 = vld [vmem:[%s1606_s28 + $0x20] sm:$0xf0]  ;;  %v1243_v63 = vld [vmem:[%s1606_s28 + $0x17c] sm:$0xf0]  ;;  %v1242_v2 = vor.u32 %v1336_v56, %v1241_v55  ;;  %v1290_v5 = vld [vmem:[%s1606_s28 + $0xc] sm:$0xf] }
  0x79   : > { %v1333_v62 = vld [vmem:[%s1606_s28 + $0x164] sm:$0xf]  ;;  %v632_v3 = vpack.c.b16 %v569_v61, %v569_v61  ;;  %v1066_v4 = vor.u32 %v1293_v59, %v1065_v58  ;;  %v1067_v6 = vld [vmem:[%s1606_s28 + $0x24] sm:$0xf0]  ;;  %v1277_v9 = vld [vmem:[%s1606_s28 + $0x1a0] sm:$0xf]  ;;  %v633_v13 = vpack.c.b16 %v570_v0, %v570_v0 }
  0x7a   : > { %724 = vmatpush.bf16.msra.mxu0 %v1086_v27  ;;  %v1213_v7 = vld [vmem:[%s1606_s28 + $0x128] sm:$0xf]  ;;  %v1329_v8 = vld [vmem:[%s1606_s28 + $0x140] sm:$0xf0]  ;;  %v1344_v10 = vld [vmem:[%s1606_s28 + $0x1b8] sm:$0xf0]  ;;  %v1246_v11 = vor.u32 %v1333_v62, %v1243_v63  ;;  %v1070_v16 = vor.u32 %v1290_v5, %v1067_v6 }
  0x7b   : > { %750 = vmatpush.bf16.msra.mxu2 %v1090_v21  ;;  %1281 = vmatmul.msk.bf16.vlgmr.msrb.gmra.mxu3 %vm691_vm1, %v1634_v39  ;;  %v710_v12 = vand.u32 %v1623_v23, %v632_v3  ;;  %v1326_v14 = vld [vmem:[%s1606_s28 + $0x12c] sm:$0xf]  ;;  %v1215_v15 = vld [vmem:[%s1606_s28 + $0x144] sm:$0xf0]  ;;  %v1214_v17 = vor.u32 %v1329_v8, %v1213_v7  ;;  %v1278_v18 = vor.u32 %v1344_v10, %v1277_v9  ;;  %v1319_v27 = vld [vmem:[%s1606_s28 + $0xf4] sm:$0xf] }
  0x7c   : > { %799 = vmatpush.bf16.msra.mxu3 %v1182_v19  ;;  %774 = vmatpush.bf16.msrb.mxu1 %v1150_v24  ;;  %v1185_v19 = vld [vmem:[%s1606_s28 + $0xf0] sm:$0xf]  ;;  %v1322_v20 = vld [vmem:[%s1606_s28 + $0x108] sm:$0xf0]  ;;  %v1249_v22 = vld [vmem:[%s1606_s28 + $0x168] sm:$0xf]  ;;  %v1218_v25 = vor.u32 %v1326_v14, %v1215_v15  ;;  %v713_v26 = vand.u32 %v1623_v23, %v633_v13 }
  0x7d   : > { %v1337_v24 = vld [vmem:[%s1606_s28 + $0x180] sm:$0xf0]  ;;  %v1187_v28 = vld [vmem:[%s1606_s28 + $0x10c] sm:$0xf0]  ;;  %v1186_v29 = vor.u32 %v1322_v20, %v1185_v19  ;;  %v1157_v30 = vld [vmem:[%s1606_s28 + $0xb8] sm:$0xf] }
  0x7e   : > { %725 = vmatpush.bf16.msra.mxu0 %v1058_v42  ;;  %v1250_v21 = vor.u32 %v1337_v24, %v1249_v22  ;;  %v1315_v31 = vld [vmem:[%s1606_s28 + $0xd0] sm:$0xf0]  ;;  %v1221_v32 = vld [vmem:[%s1606_s28 + $0x130] sm:$0xf]  ;;  %v1190_v34 = vor.u32 %v1319_v27, %v1187_v28  ;;  %v1312_v35 = vld [vmem:[%s1606_s28 + $0xbc] sm:$0xf] }
  0x7f   : > { %751 = vmatpush.bf16.msra.mxu2 %v1062_v45  ;;  %v1159_v36 = vld [vmem:[%s1606_s28 + $0xd4] sm:$0xf0]  ;;  %v1129_v40 = vld [vmem:[%s1606_s28 + $0x80] sm:$0xf]  ;;  %v1308_v41 = vld [vmem:[%s1606_s28 + $0x98] sm:$0xf0] }
  0x80   : > { %800 = vmatpush.bf16.msra.mxu3 %v1154_v33  ;;  %775 = vmatpush.bf16.msrb.mxu1 %v1122_v37  ;;  %v1330_v33 = vld [vmem:[%s1606_s28 + $0x148] sm:$0xf0]  ;;  %v1158_v37 = vor.u32 %v1315_v31, %v1157_v30  ;;  %v1193_v42 = vld [vmem:[%s1606_s28 + $0xf8] sm:$0xf]  ;;  %v1323_v43 = vld [vmem:[%s1606_s28 + $0x110] sm:$0xf0]  ;;  %v1162_v44 = vor.u32 %v1312_v35, %v1159_v36  ;;  %v1130_v48 = vor.u32 %v1308_v41, %v1129_v40 }
  0x81   : > { %726 = vmatmul.bf16.vlgmr.msra.gmra.mxu0 %v1691_v51  ;;  %v1222_v38 = vor.u32 %v1330_v33, %v1221_v32  ;;  %v379_v45 = vld [vmem:[%s1606_s28 + $0x1d8] sm:$0x1]  ;;  %v1131_v47 = vld [vmem:[%s1606_s28 + $0x9c] sm:$0xf0]  ;;  %v1301_v52 = vld [vmem:[%s1606_s28 + $0x60] sm:$0xf0] }
  0x82   : > { %816 = vmatpush.bf16.msrb.mxu0 %v707_v46  ;;  %752 = vmatmul.bf16.vlgmr.msra.gmra.mxu2 %v1691_v51  ;;  %v1305_v46 = vld [vmem:[%s1606_s28 + $0x84] sm:$0xf]  ;;  %v1165_v53 = vld [vmem:[%s1606_s28 + $0xc0] sm:$0xf]  ;;  %v571_v55 = vunpack.c.l.b16 %v379_v45  ;;  %v1298_v57 = vld [vmem:[%s1606_s28 + $0x4c] sm:$0xf] }
  0x83   : > { %822 = vmatpush.bf16.msrb.mxu2 %v1270_v50  ;;  %v1101_v50 = vld [vmem:[%s1606_s28 + $0x48] sm:$0xf]  ;;  %v1134_v56 = vor.u32 %v1305_v46, %v1131_v47  ;;  %v1073_v61 = vld [vmem:[%s1606_s28 + $0x10] sm:$0xf]  ;;  %v1294_v62 = vld [vmem:[%s1606_s28 + $0x28] sm:$0xf0] }
  0x84   : > { %801 = vmatpush.bf16.msra.mxu3 %v1126_v49  ;;  %776 = vmatpush.bf16.msrb.mxu1 %v1094_v54  ;;  %v1194_v49 = vor.u32 %v1323_v43, %v1193_v42  ;;  %v1316_v54 = vld [vmem:[%s1606_s28 + $0xd8] sm:$0xf0]  ;;  %v1103_v58 = vld [vmem:[%s1606_s28 + $0x64] sm:$0xf0]  ;;  %v1102_v59 = vor.u32 %v1301_v52, %v1101_v50  ;;  %v1309_v0 = vld [vmem:[%s1606_s28 + $0xa0] sm:$0xf0]  ;;  %v1074_v5 = vor.u32 %v1294_v62, %v1073_v61 }
  0x85   : > { %v1137_v63 = vld [vmem:[%s1606_s28 + $0x88] sm:$0xf]  ;;  %v1291_v3 = vld [vmem:[%s1606_s28 + $0x14] sm:$0xf]  ;;  %v1109_v8 = vld [vmem:[%s1606_s28 + $0x50] sm:$0xf] }
  0x86   : > { %848 = vmatpush.bf16.msra.mxu0 %v1274_v60  ;;  %v1166_v60 = vor.u32 %v1316_v54, %v1165_v53  ;;  %v1138_v6 = vor.u32 %v1309_v0, %v1137_v63  ;;  %v1302_v9 = vld [vmem:[%s1606_s28 + $0x68] sm:$0xf0]  ;;  %v1295_v13 = vld [vmem:[%s1606_s28 + $0x30] sm:$0xf0]  ;;  %vm937_vm2 = vcmask 1043456  }
  0x87   : > { %823 = vmatpush.bf16.msrb.mxu2 %v1242_v2  ;;  %v1106_v2 = vor.u32 %v1298_v57, %v1103_v58 }
  0x88   : > { %802 = vmatpush.bf16.msra.mxu3 %v1098_v1  ;;  %777 = vmatpush.bf16.msrb.mxu1 %v1066_v4  ;;  %v634_v1 = vpack.c.b16 %v571_v55, %v571_v55  ;;  %v1075_v4 = vld [vmem:[%s1606_s28 + $0x2c] sm:$0xf0] }
  0x89   : > { %v1078_v10 = vor.u32 %v1291_v3, %v1075_v4 }
  0x8a   : > { %849 = vmatpush.bf16.msra.mxu0 %v1246_v11  ;;  %v716_v7 = vand.u32 %v1623_v23, %v634_v1  ;;  %v1110_v11 = vor.u32 %v1302_v9, %v1109_v8 }
  0x8b   : > { %778 = vmatmul.bf16.vlgmr.msrb.gmra.mxu1 %v1691_v51  ;;  %824 = vmatpush.bf16.msrb.mxu2 %v1214_v17 }
  0x8c   : > { %842 = vmatpush.bf16.msra.mxu1 %v710_v12  ;;  %803 = vmatpush.bf16.msra.mxu3 %v1070_v16  ;;  %v1081_v12 = vld [vmem:[%s1606_s28 + $0x18] sm:$0xf] }
  0x8d   : > { %v1082_v14 = vor.u32 %v1295_v13, %v1081_v12 }
  0x8e   : > { %850 = vmatpush.bf16.msra.mxu0 %v1218_v25 }
  0x8f   : > { %804 = vmatmul.bf16.vlgmr.msra.gmra.mxu3 %v1691_v51  ;;  %825 = vmatpush.bf16.msrb.mxu2 %v1186_v29 }
  0x90   : > { %874 = vmatpush.bf16.msrb.mxu3 %v1278_v18  ;;  %868 = vmatpush.bf16.msrb.mxu1 %v713_v26 }
  0x91   : > { %1282 = vmatmul.msk.bf16.vlgmr.msrb.gmra.mxu0 %vm691_vm1, %v1634_v39 }
  0x92   : > { %851 = vmatpush.bf16.msra.mxu0 %v1190_v34 }
  0x93   : > { %826 = vmatpush.bf16.msrb.mxu2 %v1158_v37 }
  0x94   : > { %875 = vmatpush.bf16.msrb.mxu3 %v1250_v21 }
  0x96   : > { %852 = vmatpush.bf16.msra.mxu0 %v1162_v44 }
  0x97   : > { %827 = vmatpush.bf16.msrb.mxu2 %v1130_v48 }
  0x98   : > { %876 = vmatpush.bf16.msrb.mxu3 %v1222_v38 }
  0x9a   : > { %853 = vmatpush.bf16.msra.mxu0 %v1134_v56 }
  0x9b   : > { %1283 = vmatmul.msk.bf16.vlgmr.msra.gmra.mxu1 %vm691_vm1, %v1634_v39  ;;  %828 = vmatpush.bf16.msrb.mxu2 %v1102_v59 }
  0x9c   : > { %877 = vmatpush.bf16.msrb.mxu3 %v1194_v49 }
  0x9e   : > { %854 = vmatpush.bf16.msra.mxu0 %v1106_v2 }
  0x9f   : > { %829 = vmatpush.bf16.msrb.mxu2 %v1074_v5 }
  0xa0   : > { %878 = vmatpush.bf16.msrb.mxu3 %v1166_v60 }
  0xa2   : > { %855 = vmatpush.bf16.msra.mxu0 %v1078_v10  ;;  %830 = vmatmul.bf16.vlgmr.msrb.gmra.mxu2 %v1691_v51 }
  0xa3   : > { %894 = vmatpush.bf16.msra.mxu2 %v716_v7 }
  0xa4   : > { %879 = vmatpush.bf16.msrb.mxu3 %v1138_v6 }
  0xa5   : > { %856 = vmatmul.bf16.vlgmr.msra.gmra.mxu0 %v1691_v51 }
  0xa8   : > { %880 = vmatpush.bf16.msrb.mxu3 %v1110_v11 }
  0xab   : > { %1284 = vmatmul.msk.bf16.vlgmr.msrb.gmra.mxu1 %vm691_vm1, %v1634_v39 }
  0xac   : > { %881 = vmatpush.bf16.msrb.mxu3 %v1082_v14 }
  0xaf   : > { %882 = vmatmul.bf16.vlgmr.msrb.gmra.mxu3 %v1691_v51 }
  0xb2   : > { %1285 = vmatmul.msk.bf16.vlgmr.msra.gmra.mxu2 %vm691_vm1, %v1634_v39 }
  0xea   : > { %v740_v23 = vpop.f32.mrf.mxu1 }
  0xee   : > { %v766_v15 = vpop.f32.mrf.mxu3 }
  0xf2   : > { %v742_v16 = vpop.f32.mrf.mxu1 }
  0xf6   : > { %v768_v17 = vpop.f32.mrf.mxu3 }
  0xfe   : > { %v727_v18 = vpop.f32.mrf.mxu0  ;;  %v792_v19 = vpop.f32.mrf.mxu3 }
  0xff   : > { %v741_v20 = vadd.f32 %v740_v23, %v727_v18 }
 0x101   : > { %v900_v22 = vmul.f32 0.5, %v741_v20 }
 0x103   : > { %1372 = vtanh.f32 %v900_v22 }
 0x105   : > { %v753_v25 = vpop.f32.mrf.mxu2 }
 0x106   : > { %v767_v26 = vadd.f32 %v766_v15, %v753_v25  ;;  %v729_v27 = vpop.f32.mrf.mxu0  ;;  %v794_v28 = vpop.f32.mrf.mxu3 }
 0x108   : > { %v779_v24 = vpop.f32.mrf.mxu1  ;;  %v901_v29 = vmul.f32 0.5, %v767_v26 }
 0x109   : > { %v793_v51 = vadd.f32 %v792_v19, %v779_v24  ;;  %v1373_v32 = vpop.eup %1372 }
 0x10a   : > { %1374 = vtanh.f32 %v901_v29  ;;  %v914_v36 = vadd.f32 1.0, %v1373_v32 }
 0x10b   : > { %v902_v30 = vmul.f32 0.5, %v793_v51 }
 0x10c   : > { %v921_v42 = vmul.f32 0.5, %v914_v36 }
 0x10d   : > { %v755_v21 = vpop.f32.mrf.mxu2  ;;  %1376 = vtanh.f32 %v902_v30 }
 0x10e   : > { %v818_v33 = vpop.f32.mrf.mxu0 }
 0x110   : > { %v781_v39 = vpop.f32.mrf.mxu1  ;;  %v1375_v35 = vpop.eup %1374 }
 0x111   : > { %v915_v37 = vadd.f32 1.0, %v1375_v35 }
 0x112   : > { %v805_v31 = vpop.f32.mrf.mxu3 }
 0x113   : > { %v819_v34 = vadd.f32 %v818_v33, %v805_v31  ;;  %v922_v40 = vmul.f32 0.5, %v915_v37  ;;  %v1377_v46 = vpop.eup %1376 }
 0x114   : > { %v916_v49 = vadd.f32 1.0, %v1377_v46 }
 0x115   : > { %v903_v38 = vmul.f32 0.5, %v819_v34  ;;  %v934_v43 = vrot.slane %v922_v40, 4 }
 0x116   : > { %v820_v45 = vpop.f32.mrf.mxu0  ;;  %v923_v54 = vmul.f32 0.5, %v916_v49 }
 0x117   : > { %1378 = vtanh.f32 %v903_v38  ;;  %v938_v47 = vsel %vm937_vm2, %v921_v42, %v934_v43 }
 0x118   : > { %v844_v41 = vpop.f32.mrf.mxu1  ;;  %944 = vst [vmem:[%s1768_s5] sm:$0x77] %v938_v47 }
 0x11a   : > { %v807_v44 = vpop.f32.mrf.mxu3 }
 0x11d   : > { %v1379_v48 = vpop.eup %1378 }
 0x11e   : > { %v917_v50 = vadd.f32 1.0, %v1379_v48 }
 0x120   : > { %v924_v52 = vmul.f32 0.5, %v917_v50  ;;  %v846_v53 = vpop.f32.mrf.mxu1 }
 0x122   : > { %v935_v55 = vrot.slane %v924_v52, 4  ;;  %v857_v56 = vpop.f32.mrf.mxu0 }
 0x124   : > { %v939_v57 = vsel %vm937_vm2, %v923_v54, %v935_v55 }
 0x125   : > { %945 = vst [vmem:[%s1768_s5 + $0x8] sm:$0x77] %v939_v57  ;;  %v831_v58 = vpop.f32.mrf.mxu2 }
 0x126   : > { %v845_v59 = vadd.f32 %v844_v41, %v831_v58 }
 0x128   : > { %v870_v60 = vpop.f32.mrf.mxu1  ;;  %v904_v61 = vmul.f32 0.5, %v845_v59 }
 0x129   : > { %v871_v62 = vadd.f32 %v870_v60, %v857_v56 }
 0x12a   : > { %v859_v63 = vpop.f32.mrf.mxu0  ;;  %1380 = vtanh.f32 %v904_v61 }
 0x12b   : > { %v905_v0 = vmul.f32 0.5, %v871_v62 }
 0x12d   : > { %1382 = vtanh.f32 %v905_v0  ;;  %v833_v1 = vpop.f32.mrf.mxu2 }
 0x130   : > { %v872_v3 = vpop.f32.mrf.mxu1  ;;  %v1381_v4 = vpop.eup %1380 }
 0x131   : > { %v918_v6 = vadd.f32 1.0, %v1381_v4 }
 0x132   : > { %v883_v2 = vpop.f32.mrf.mxu3 }
 0x133   : > { %v1383_v5 = vpop.eup %1382  ;;  %v925_v12 = vmul.f32 0.5, %v918_v6 }
 0x134   : > { %v919_v7 = vadd.f32 1.0, %v1383_v5 }
 0x135   : > { %v896_v10 = vpop.f32.mrf.mxu2 }
 0x136   : > { %v926_v8 = vmul.f32 0.5, %v919_v7  ;;  %v897_v11 = vadd.f32 %v896_v10, %v883_v2 }
 0x138   : > { %v936_v13 = vrot.slane %v926_v8, 4  ;;  %v906_v14 = vmul.f32 0.5, %v897_v11 }
 0x13a   : > { %v885_v9 = vpop.f32.mrf.mxu3  ;;  %v940_v23 = vsel %vm937_vm2, %v925_v12, %v936_v13  ;;  %1384 = vtanh.f32 %v906_v14 }
 0x13b   : > { %946 = vst [vmem:[%s1768_s5 + $0x10] sm:$0x77] %v940_v23 }
 0x13d   : > { %v898_v15 = vpop.f32.mrf.mxu2 }
 0x140   : > { %v1385_v16 = vpop.eup %1384 }
 0x141   : > { %v920_v17 = vadd.f32 1.0, %v1385_v16 }
 0x143   : > { %v927_v18 = vmul.f32 0.5, %v920_v17 }
 0x145   : > { %947 = vst [vmem:[%s1768_s5 + $0x18] sm:$0x7] %v927_v18 }
 0x146 PF: > { %p9_p9 = scmp.ge.s32.totalorder %s1443_s13, 4   ;;  %s1790_s9 = smov %s1404_s10 }
 0x147   : > { %s1791_s10 = smov %s1452_s16  ;;  %s1792_s11 = smov %s1443_s13 }
 0x148   :  { %11 = sbr.rel (!%p9_p9) target bundleno = 2 (0x2), region = 95 }

</bundles_post_ra>
